<compile_context>
chip_gen: v5e
topology: v5e:2x2
jax: 0.10.0
libtpu: 0.0.40
codegen_flags: <defaults>
</compile_context>

<pallas_src>
import functools

import jax
import jax.numpy as jnp
from jax.experimental import pallas as pl
from jax.experimental.pallas import tpu as pltpu

_LANE = 128
_TM_MAX = 512
_TN_MAX = 512
_VMEM_LIMIT = 32 * 1024 * 1024        # scoped VMEM cap to request (safe on v5e/v6e/v7x)
_PIPELINE_BUDGET = 20 * 1024 * 1024   # double-buffered panel footprint must stay under this


def _round_up(x, m):
    return ((x + m - 1) // m) * m


def _choose_layout(kin, nout, rank, in_itemsize, out_itemsize):
    """Pick (kp, np_, tn, tk).  tk == kp means the K grid axis is collapsed."""
    kp = _round_up(kin, _LANE)
    tn = min(_TN_MAX, _round_up(nout, _LANE))
    np_ = _round_up(nout, tn)

    def footprint(tk, with_acc):
        fp = 2 * (_TM_MAX * tk + tk * tn) * in_itemsize        # x / W.T panels (dbl-buffered)
        fp += 2 * (_TM_MAX * rank + rank * tn + tn) * 4        # xa / scaled-B / bias panels
        fp += 2 * _TM_MAX * tn * out_itemsize                  # output panel
        if with_acc:
            fp += _TM_MAX * tn * 4                             # f32 accumulator scratch
        return fp

    if footprint(kp, with_acc=False) <= _PIPELINE_BUDGET:
        return kp, np_, tn, kp                                 # K fits: drop the K axis
    for tk in (1024, 512, 256, 128):
        if footprint(tk, with_acc=True) <= _PIPELINE_BUDGET:
            break
    kp = _round_up(kin, tk)
    return kp, np_, tn, tk


def prepare_lora_linear(w, b, lora_a, lora_b, alpha, *, force_tk=None):
    """One-time, cacheable weight-side prep.

    w: (out, in)  b: (out,)  lora_a: (in, rank)  lora_b: (rank, out)
    Returns a dict of prepped (padded / transposed / alpha-folded) parameters plus
    the tiling layout, consumed by linear_with_lora().
    """
    nout, kin = w.shape
    rank = lora_a.shape[1]
    kp, np_, tn, tk = _choose_layout(kin, nout, rank,
                                     w.dtype.itemsize, w.dtype.itemsize)
    if force_tk is not None:            # for testing the K-tiled path
        tk = force_tk
        kp = _round_up(kin, tk)

    wt = jnp.transpose(w)               # (in, out), done once
    if (kp - kin) or (np_ - nout):
        wt = jnp.pad(wt, ((0, kp - kin), (0, np_ - nout)))
    b_p = b if np_ == nout else jnp.pad(b, (0, np_ - nout))
    b_p = b_p.reshape(1, np_)
    lb = (alpha * lora_b).astype(jnp.float32)      # fold alpha into B once
    if np_ - nout:
        lb = jnp.pad(lb, ((0, 0), (0, np_ - nout)))

    return dict(wt=wt, bias=b_p, lora_a=lora_a, lora_b_scaled=lb,
                kin=kin, nout=nout, rank=rank, kp=kp, np_=np_, tn=tn, tk=tk)


def _kernel_fused(x_ref, xa_ref, wt_ref, lb_ref, b_ref, o_ref):
    """Single K panel per (i, j) tile: one dot straight to o_ref, no scratch."""
    acc = jnp.dot(x_ref[...], wt_ref[...], preferred_element_type=jnp.float32)
    acc += jnp.dot(xa_ref[...], lb_ref[...], preferred_element_type=jnp.float32)
    o_ref[...] = (acc + b_ref[...].astype(jnp.float32)).astype(o_ref.dtype)


def _kernel_ktiled(x_ref, xa_ref, wt_ref, lb_ref, b_ref, o_ref, acc_ref):
    """K-tiled fallback: f32 VMEM accumulator, LoRA + bias added at finalize."""
    k = pl.program_id(2)

    @pl.when(k == 0)
    def _init():
        acc_ref[...] = jnp.zeros_like(acc_ref)

    acc_ref[...] += jnp.dot(x_ref[...], wt_ref[...],
                            preferred_element_type=jnp.float32)

    @pl.when(k == pl.num_programs(2) - 1)
    def _finalize():
        lora = jnp.dot(xa_ref[...], lb_ref[...],
                       preferred_element_type=jnp.float32)
        o_ref[...] = (acc_ref[...] + lora
                      + b_ref[...].astype(jnp.float32)).astype(o_ref.dtype)


def linear_with_lora(x, params):
    """x: (M, in).  params: output of prepare_lora_linear (cached)."""
    kin, nout, rank = params["kin"], params["nout"], params["rank"]
    kp, np_, tn, tk = params["kp"], params["np_"], params["tn"], params["tk"]
    m = x.shape[0]
    tm = min(_TM_MAX, _round_up(m, _LANE))
    mp = _round_up(m, tm)

    # LoRA-A hoisted out of the grid: tiny (M x in x rank) matmul, alpha already
    # folded into the prepped B.
    xa = jnp.dot(x, params["lora_a"], preferred_element_type=jnp.float32)

    # Pad only the axes that actually need it (K-pad zeros are inert in the dots).
    x_p = x
    if (mp - m) or (kp - kin):
        x_p = jnp.pad(x, ((0, mp - m), (0, kp - kin)))
    xa_p = xa if mp == m else jnp.pad(xa, ((0, mp - m), (0, 0)))

    collapse_k = (tk == kp)
    if collapse_k:
        grid = (mp // tm, np_ // tn)
        in_specs = [
            pl.BlockSpec((tm, kp), lambda i, j: (i, 0)),        # x panel
            pl.BlockSpec((tm, rank), lambda i, j: (i, 0)),      # xa = x @ A
            pl.BlockSpec((kp, tn), lambda i, j: (0, j)),        # W.T panel
            pl.BlockSpec((rank, tn), lambda i, j: (0, j)),      # alpha * B
            pl.BlockSpec((1, tn), lambda i, j: (0, j)),         # bias
        ]
        out_spec = pl.BlockSpec((tm, tn), lambda i, j: (i, j))
        scratch = []
        kernel = _kernel_fused
        dims = ("parallel", "parallel")
    else:
        grid = (mp // tm, np_ // tn, kp // tk)
        in_specs = [
            pl.BlockSpec((tm, tk), lambda i, j, k: (i, k)),
            pl.BlockSpec((tm, rank), lambda i, j, k: (i, 0)),
            pl.BlockSpec((tk, tn), lambda i, j, k: (k, j)),
            pl.BlockSpec((rank, tn), lambda i, j, k: (0, j)),
            pl.BlockSpec((1, tn), lambda i, j, k: (0, j)),
        ]
        out_spec = pl.BlockSpec((tm, tn), lambda i, j, k: (i, j))
        scratch = [pltpu.VMEM((tm, tn), jnp.float32)]
        kernel = _kernel_ktiled
        dims = ("parallel", "parallel", "arbitrary")

    wt_p, lb_p, b_p = params["wt"], params["lora_b_scaled"], params["bias"]
    flops = 2 * mp * kp * np_ + 2 * m * kin * rank + 2 * mp * rank * np_
    bytes_accessed = int(
        x_p.size * x_p.dtype.itemsize + xa_p.size * xa_p.dtype.itemsize
        + wt_p.size * wt_p.dtype.itemsize + lb_p.size * lb_p.dtype.itemsize
        + b_p.size * b_p.dtype.itemsize + mp * np_ * x.dtype.itemsize)

    out_p = pl.pallas_call(
        kernel,
        out_shape=jax.ShapeDtypeStruct((mp, np_), x.dtype),
        grid_spec=pltpu.PrefetchScalarGridSpec(
            num_scalar_prefetch=0,
            grid=grid,
            in_specs=in_specs,
            out_specs=out_spec,
            scratch_shapes=scratch,
        ),
        compiler_params=pltpu.CompilerParams(
            dimension_semantics=dims,
            vmem_limit_bytes=_VMEM_LIMIT),
        cost_estimate=pl.CostEstimate(
            flops=flops, transcendentals=0, bytes_accessed=bytes_accessed),
    )(x_p, xa_p, wt_p, lb_p, b_p)

    if mp == m and np_ == nout:
        return out_p
    return out_p[:m, :nout]


if __name__ == "__main__":
    # Small but grid-exercising shapes (M not tile-aligned to exercise padding).
    M, IN_F, OUT_F, RANK, ALPHA = 200, 512, 384, 8, 2.0

    key = jax.random.PRNGKey(0)
    kx, kw, kb, ka, kB = jax.random.split(key, 5)

    x = jax.random.normal(kx, (M, IN_F), dtype=jnp.float32)
    w = jax.random.normal(kw, (OUT_F, IN_F), dtype=jnp.float32) * 0.05
    b = jax.random.normal(kb, (OUT_F,), dtype=jnp.float32) * 0.1
    # Reference LoRA init has B = 0; use nonzero B so the LoRA path is exercised.
    lora_a = jax.random.normal(ka, (IN_F, RANK), dtype=jnp.float32) / jnp.sqrt(RANK)
    lora_b = jax.random.normal(kB, (RANK, OUT_F), dtype=jnp.float32) * 0.05

    # Plain-JAX reference (high precision matmuls for a stable comparison).
    hp = jax.lax.Precision.HIGHEST
    ref = (jnp.dot(x, w.T, precision=hp) + b
           + ALPHA * jnp.dot(jnp.dot(x, lora_a, precision=hp), lora_b, precision=hp))

    # Main path: weight prep cached once, K axis collapsed (panels fit VMEM).
    params = prepare_lora_linear(w, b, lora_a, lora_b, ALPHA)
    out = jax.block_until_ready(linear_with_lora(x, params))
    assert out.shape == (M, OUT_F)
    assert jnp.allclose(out, ref, atol=1e-2, rtol=1e-2), "fused-K mismatch vs reference"

    # Also exercise the K-tiled fallback path (forced small tk).
    params_kt = prepare_lora_linear(w, b, lora_a, lora_b, ALPHA, force_tk=128)
    out_kt = jax.block_until_ready(linear_with_lora(x, params_kt))
    assert jnp.allclose(out_kt, ref, atol=1e-2, rtol=1e-2), "K-tiled mismatch vs reference"

    print("KERNEL_OK")
</pallas_src>

<mosaic_0001>
module attributes {stable_mosaic.version = 11 : i64} {
  func.func @_kernel_fused(%arg0: i32, %arg1: i32, %arg2: memref<256x512xf32, #tpu.memory_space<vmem>>, %arg3: memref<256x8xf32, #tpu.memory_space<vmem>>, %arg4: memref<512x384xf32, #tpu.memory_space<vmem>>, %arg5: memref<8x384xf32, #tpu.memory_space<vmem>>, %arg6: memref<1x384xf32, #tpu.memory_space<vmem>>, %arg7: memref<256x384xf32, #tpu.memory_space<vmem>>) attributes {dimension_semantics = [#tpu.dimension_semantics<parallel>, #tpu.dimension_semantics<parallel>], iteration_bounds = array<i64: 1, 1>, scalar_prefetch = 0 : i64, scratch_operands = 0 : i64, tpu.core_type = #tpu.core_type<tc>, window_params = [{transform_indices = @transform_0, window_bounds = array<i64: 256, 512>}, {transform_indices = @transform_1, window_bounds = array<i64: 256, 8>}, {transform_indices = @transform_2, window_bounds = array<i64: 512, 384>}, {transform_indices = @transform_3, window_bounds = array<i64: 8, 384>}, {transform_indices = @transform_4, window_bounds = array<i64: 1, 384>}, {transform_indices = @transform_5, window_bounds = array<i64: 256, 384>}]} {
    %c0 = arith.constant 0 : index
    %c0_0 = arith.constant 0 : index
    %0 = vector.load %arg2[%c0, %c0_0] : memref<256x512xf32, #tpu.memory_space<vmem>>, vector<256x512xf32>
    %c0_1 = arith.constant 0 : index
    %c0_2 = arith.constant 0 : index
    %1 = vector.load %arg4[%c0_1, %c0_2] : memref<512x384xf32, #tpu.memory_space<vmem>>, vector<512x384xf32>
    %cst = arith.constant dense<0.000000e+00> : vector<256x384xf32>
    %2 = tpu.matmul %0, %1, %cst {dimension_numbers = #tpu.dot_dimension_numbers<[1], [0], [0], [1], [0, 0, 1, 1], [], []>} : vector<256x512xf32>, vector<512x384xf32>, vector<256x384xf32> -> vector<256x384xf32>
    %c0_3 = arith.constant 0 : index
    %c0_4 = arith.constant 0 : index
    %3 = vector.load %arg3[%c0_3, %c0_4] : memref<256x8xf32, #tpu.memory_space<vmem>>, vector<256x8xf32>
    %c0_5 = arith.constant 0 : index
    %c0_6 = arith.constant 0 : index
    %4 = vector.load %arg5[%c0_5, %c0_6] : memref<8x384xf32, #tpu.memory_space<vmem>>, vector<8x384xf32>
    %cst_7 = arith.constant dense<0.000000e+00> : vector<256x384xf32>
    %5 = tpu.matmul %3, %4, %cst_7 {dimension_numbers = #tpu.dot_dimension_numbers<[1], [0], [0], [1], [0, 0, 1, 1], [], []>} : vector<256x8xf32>, vector<8x384xf32>, vector<256x384xf32> -> vector<256x384xf32>
    %6 = arith.addf %2, %5 : vector<256x384xf32>
    %c0_8 = arith.constant 0 : index
    %c0_9 = arith.constant 0 : index
    %7 = vector.load %arg6[%c0_8, %c0_9] : memref<1x384xf32, #tpu.memory_space<vmem>>, vector<1x384xf32>
    %8 = vector.broadcast %7 : vector<1x384xf32> to vector<256x384xf32>
    %9 = arith.addf %6, %8 : vector<256x384xf32>
    %c0_10 = arith.constant 0 : index
    %c0_11 = arith.constant 0 : index
    %10 = vector.load %arg7[%c0_10, %c0_11] : memref<256x384xf32, #tpu.memory_space<vmem>>, vector<256x384xf32>
    tpu.vector_store %arg7[%c0_10, %c0_11], %9 {strides = array<i32>} : memref<256x384xf32, #tpu.memory_space<vmem>>, vector<256x384xf32>,
    return
  }
  func.func @transform_0(%arg0: i32, %arg1: i32) -> (i32, i32) {
    %c0_i32 = arith.constant 0 : i32
    %c0_i32_0 = arith.constant 0 : i32
    return %arg0, %c0_i32 : i32, i32
  }
  func.func @transform_1(%arg0: i32, %arg1: i32) -> (i32, i32) {
    %c0_i32 = arith.constant 0 : i32
    %c0_i32_0 = arith.constant 0 : i32
    return %arg0, %c0_i32 : i32, i32
  }
  func.func @transform_2(%arg0: i32, %arg1: i32) -> (i32, i32) {
    %c0_i32 = arith.constant 0 : i32
    %c0_i32_0 = arith.constant 0 : i32
    return %c0_i32, %arg1 : i32, i32
  }
  func.func @transform_3(%arg0: i32, %arg1: i32) -> (i32, i32) {
    %c0_i32 = arith.constant 0 : i32
    %c0_i32_0 = arith.constant 0 : i32
    return %c0_i32, %arg1 : i32, i32
  }
  func.func @transform_4(%arg0: i32, %arg1: i32) -> (i32, i32) {
    %c0_i32 = arith.constant 0 : i32
    %c0_i32_0 = arith.constant 0 : i32
    return %c0_i32, %arg1 : i32, i32
  }
  func.func @transform_5(%arg0: i32, %arg1: i32) -> (i32, i32) {
    %c0_i32 = arith.constant 0 : i32
    return %arg0, %arg1 : i32, i32
  }
}

</mosaic_0001>

<bundles_post_ra>
// kernel: tpu_custom_call.1
= control target key start
LH: loop header
LB: loop body
LE: loop exit
PB: predicated region body
PF: predicated region fallthrough
CT: control target
= control target key end

     0   :  { %10 = vsyncpa [#allocation3], 0  ;;  %s3788_s0 = inlined_call_operand.hbm [shape: f32[256,512], index: 0, kind: input, shape index: {}]   ;;  %s3789_s1 = inlined_call_operand.vmem [shape: f32[256,8], index: 1, kind: input, shape index: {}]   ;;  %s3790_s2 = inlined_call_operand.hbm [shape: f32[512,384], index: 2, kind: input, shape index: {}]   ;;  %s3791_s3 = inlined_call_operand.vmem [shape: f32[8,384], index: 3, kind: input, shape index: {}]   ;;  %s3792_s4 = inlined_call_operand.vmem [shape: f32[1,384], index: 4, kind: input, shape index: {}]   ;;  %s3793_s5 = inlined_call_operand.hbm [shape: f32[256,384], index: 5, kind: output, shape index: {}]  }
   0x1   :  { %11 = vsyncpa [#allocation6], 0 }
   0x2   :  { %12 = vsyncpa [#allocation4], 0  ;;  %s17_s20 = sshll.u32 %s3788_s0, 4  ;;  %s2783_s21 = smov [#allocation2]   ;;  %s18_s20 = int_to_ptr.hbm [resolvable:$true] %s17_s20 }
   0x3   :  { %s19_s22 = sshll.u32 %s2783_s21, 4  ;;  %s32_s25 = sshll.u32 %s3790_s2, 4  ;;  %s20_s22 = int_to_ptr.vmem [resolvable:$true] %s19_s22  ;;  %s33_s25 = int_to_ptr.hbm [resolvable:$true] %s32_s25 }
   0x4   :  { %s2784_s26 = smov 512   ;;  %s2785_s27 = smov 32  }
   0x5   :  { %25 = dma.hbm_to_vmem [thread:$0]  %s18_s20, 16384, %s20_s22, [#allocation3], %s2784_s26, %s2784_s26, %s2785_s27  }
   0x6   :  { %s2786_s28 = smov [#allocation5]   ;;  %s2787_s30 = smov 384  }
   0x7   :  { %s34_s29 = sshll.u32 %s2786_s28, 4  ;;  %s2788_s6 = smov 24   ;;  %s35_s29 = int_to_ptr.vmem [resolvable:$true] %s34_s29 }
   0x8   :  { %40 = dma.hbm_to_vmem [thread:$0]  %s33_s25, 24576, %s35_s29, [#allocation6], %s2787_s30, %s2787_s30, %s2788_s6  }
   0x9   :  { %2777 = dma.done.wait [#allocation3], 16384  }
   0xa   :  { %2778 = vsyncadd [#allocation3], 4294950912 }
   0xb   :  { %2779 = dma.done.wait [#allocation6], 24576  }
   0xc   :  { %2780 = vsyncadd [#allocation6], 4294942720  ;;  %vm408_vm0 = vcmask 64512   ;;  %v405_v0 = vld [vmem:[%s3791_s3] sm:$0xff]  ;;  %v407_v2 = vld [vmem:[%s3791_s3 + $0x10] sm:$0xff]  ;;  %s2406_s28 = sshll.u32 %s3793_s5, 4  ;;  %s2407_s28 = int_to_ptr.hbm [resolvable:$true] %s2406_s28 }
   0xd   :  { %v2835_v1 = vld [vmem:[%s3789_s1 + $0xc0] sm:$0xff]  ;;  %2516 = vmatpush.msra.mxu3 %v405_v0  ;;  %v370_v4 = vld [vmem:[#allocation5 + $0x5e8] sm:$0xff]  ;;  %520 = vmatpush.msra.mxu0 %v405_v0  ;;  %v367_v7 = vld [vmem:[#allocation5 + $0x5d0] sm:$0xff] }
   0xe   :  { %v373_v3 = vld [vmem:[%s3789_s1] sm:$0xff]  ;;  %2444 = vmatmul.msk.f32.vlgmr.msra.gmra.mxu3 %vm408_vm0, %v2835_v1  ;;  %v406_v5 = vld [vmem:[%s3791_s3 + $0x8] sm:$0xff]  ;;  %746 = vmatpush.msra.mxu2 %v407_v2  ;;  %v271_v9 = vld [vmem:[#allocation5 + $0x2d0] sm:$0xff] }
   0xf   :  { %v274_v6 = vld [vmem:[#allocation5 + $0x2e8] sm:$0xff]  ;;  %2517 = vmatpush.msrb.mxu3 %v406_v5  ;;  %2484 = vmatmul.msk.f32.vlgmr.msra.gmra.mxu2 %vm408_vm0, %v373_v3  ;;  %v364_v10 = vld [vmem:[#allocation5 + $0x5b8] sm:$0xff]  ;;  %v319_v11 = vld [vmem:[#allocation5 + $0x450] sm:$0xff] }
  0x10   :  { %1183 = vmatpush.msrb.mxu2 %v370_v4  ;;  %2420 = vmatmul.msk.f32.vlgmr.msra.gmra.mxu0 %vm408_vm0, %v373_v3  ;;  %v322_v8 = vld [vmem:[#allocation5 + $0x468] sm:$0xff]  ;;  %v268_v12 = vld [vmem:[#allocation5 + $0x2b8] sm:$0xff]  ;;  %v361_v16 = vld [vmem:[#allocation5 + $0x5a0] sm:$0xff] }
  0x11   :  { %957 = vmatpush.msrb.mxu0 %v274_v6  ;;  %633 = vmatpush.msra.mxu1 %v406_v5  ;;  %v2854_v13 = vld [vmem:[%s3789_s1 + $0xc8] sm:$0xff]  ;;  %v316_v15 = vld [vmem:[#allocation5 + $0x438] sm:$0xff]  ;;  %v265_v17 = vld [vmem:[#allocation5 + $0x2a0] sm:$0xff] }
  0x12   :  { %2452 = vmatmul.msk.f32.vlgmr.msra.gmra.mxu1 %vm408_vm0, %v373_v3  ;;  %1184 = vmatpush.msrb.mxu2 %v367_v7  ;;  %v374_v14 = vld [vmem:[%s3789_s1 + $0x8] sm:$0xff]  ;;  %v313_v18 = vld [vmem:[#allocation5 + $0x420] sm:$0xff]  ;;  %v2867_v19 = vld [vmem:[%s3789_s1 + $0xd0] sm:$0xff] }
  0x13   :  { %1070 = vmatpush.msrb.mxu1 %v322_v8  ;;  %958 = vmatpush.msrb.mxu0 %v271_v9  ;;  %v375_v20 = vld [vmem:[%s3789_s1 + $0x10] sm:$0xff]  ;;  %v358_v21 = vld [vmem:[#allocation5 + $0x588] sm:$0xff]  ;;  %v2880_v22 = vld [vmem:[%s3789_s1 + $0xd8] sm:$0xff] }
  0x14   :  { %1185 = vmatpush.msrb.mxu2 %v364_v10  ;;  %2518 = vmatpush.msra.mxu3 %v407_v2  ;;  %v376_v23 = vld [vmem:[%s3789_s1 + $0x18] sm:$0xff]  ;;  %v262_v24 = vld [vmem:[#allocation5 + $0x288] sm:$0xff]  ;;  %v2893_v26 = vld [vmem:[%s3789_s1 + $0xe0] sm:$0xff] }
  0x15   :  { %1071 = vmatpush.msrb.mxu1 %v319_v11  ;;  %959 = vmatpush.msrb.mxu0 %v268_v12  ;;  %v310_v25 = vld [vmem:[#allocation5 + $0x408] sm:$0xff]  ;;  %v377_v27 = vld [vmem:[%s3789_s1 + $0x20] sm:$0xff]  ;;  %v355_v28 = vld [vmem:[#allocation5 + $0x570] sm:$0xff] }
  0x16   :  { %2445 = vmatmul.msk.f32.gmra.mxu3 %vm408_vm0, %v2854_v13  ;;  %1186 = vmatpush.msrb.mxu2 %v361_v16  ;;  %v259_v29 = vld [vmem:[#allocation5 + $0x270] sm:$0xff]  ;;  %v2906_v31 = vld [vmem:[%s3789_s1 + $0xe8] sm:$0xff]  ;;  %v352_v33 = vld [vmem:[#allocation5 + $0x558] sm:$0xff] }
  0x17   :  { %2485 = vmatmul.msk.f32.gmra.mxu2 %vm408_vm0, %v374_v14  ;;  %1072 = vmatpush.msrb.mxu1 %v316_v15  ;;  %v307_v30 = vld [vmem:[#allocation5 + $0x3f0] sm:$0xff]  ;;  %v378_v32 = vld [vmem:[%s3789_s1 + $0x28] sm:$0xff]  ;;  %v256_v36 = vld [vmem:[#allocation5 + $0x258] sm:$0xff] }
  0x18   :  { %2421 = vmatmul.msk.f32.gmra.mxu0 %vm408_vm0, %v374_v14  ;;  %1187 = vmatpush.msrb.mxu2 %v358_v21  ;;  %v2919_v34 = vld [vmem:[%s3789_s1 + $0xf0] sm:$0xff]  ;;  %v304_v37 = vld [vmem:[#allocation5 + $0x3d8] sm:$0xff]  ;;  %v349_v40 = vld [vmem:[#allocation5 + $0x540] sm:$0xff] }
  0x19   :  { %960 = vmatpush.msrb.mxu0 %v265_v17  ;;  %1073 = vmatpush.msrb.mxu1 %v313_v18  ;;  %v379_v35 = vld [vmem:[%s3789_s1 + $0x30] sm:$0xff]  ;;  %v2932_v38 = vld [vmem:[%s3789_s1 + $0xf8] sm:$0xff]  ;;  %v253_v41 = vld [vmem:[#allocation5 + $0x240] sm:$0xff] }
  0x1a   :  { %2453 = vmatmul.msk.f32.gmra.mxu1 %vm408_vm0, %v374_v14  ;;  %1188 = vmatpush.msrb.mxu2 %v355_v28  ;;  %v380_v39 = vld [vmem:[%s3789_s1 + $0x38] sm:$0xff]  ;;  %v301_v42 = vld [vmem:[#allocation5 + $0x3c0] sm:$0xff]  ;;  %v346_v44 = vld [vmem:[#allocation5 + $0x528] sm:$0xff] }
  0x1b   :  { %961 = vmatpush.msrb.mxu0 %v262_v24  ;;  %1074 = vmatpush.msrb.mxu1 %v310_v25  ;;  %v381_v43 = vld [vmem:[%s3789_s1 + $0x40] sm:$0xff]  ;;  %v382_v45 = vld [vmem:[%s3789_s1 + $0x48] sm:$0xff]  ;;  %v383_v48 = vld [vmem:[%s3789_s1 + $0x50] sm:$0xff] }
  0x1c   :  { %1189 = vmatpush.msrb.mxu2 %v352_v33  ;;  %v250_v46 = vld [vmem:[#allocation5 + $0x228] sm:$0xff]  ;;  %v343_v49 = vld [vmem:[#allocation5 + $0x510] sm:$0xff]  ;;  %v384_v52 = vld [vmem:[%s3789_s1 + $0x58] sm:$0xff] }
  0x1d   :  { %962 = vmatpush.msrb.mxu0 %v259_v29  ;;  %1075 = vmatpush.msrb.mxu1 %v307_v30  ;;  %v298_v47 = vld [vmem:[#allocation5 + $0x3a8] sm:$0xff]  ;;  %v247_v50 = vld [vmem:[#allocation5 + $0x210] sm:$0xff]  ;;  %v340_v53 = vld [vmem:[#allocation5 + $0x4f8] sm:$0xff] }
  0x1e   :  { %2446 = vmatmul.msk.f32.gmra.mxu3 %vm408_vm0, %v2867_v19  ;;  %1190 = vmatpush.msrb.mxu2 %v349_v40  ;;  %v295_v51 = vld [vmem:[#allocation5 + $0x390] sm:$0xff]  ;;  %v385_v54 = vld [vmem:[%s3789_s1 + $0x60] sm:$0xff]  ;;  %v226_v55 = vld [vmem:[#allocation5 + $0x168] sm:$0xff] }
  0x1f   :  { %2486 = vmatmul.msk.f32.gmra.mxu2 %vm408_vm0, %v375_v20  ;;  %963 = vmatpush.msrb.mxu0 %v256_v36  ;;  %v244_v56 = vld [vmem:[#allocation5 + $0x1f8] sm:$0xff]  ;;  %v223_v58 = vld [vmem:[#allocation5 + $0x150] sm:$0xff]  ;;  %v386_v59 = vld [vmem:[%s3789_s1 + $0x68] sm:$0xff] }
  0x20   :  { %2422 = vmatmul.msk.f32.gmra.mxu0 %vm408_vm0, %v375_v20  ;;  %1076 = vmatpush.msrb.mxu1 %v304_v37  ;;  %v292_v57 = vld [vmem:[#allocation5 + $0x378] sm:$0xff]  ;;  %v337_v61 = vld [vmem:[#allocation5 + $0x4e0] sm:$0xff]  ;;  %v387_v2 = vld [vmem:[%s3789_s1 + $0x70] sm:$0xff] }
  0x21   :  { %964 = vmatpush.msrb.mxu0 %v253_v41  ;;  %1191 = vmatpush.msrb.mxu2 %v346_v44  ;;  %v220_v60 = vld [vmem:[#allocation5 + $0x138] sm:$0xff]  ;;  %v217_v62 = vld [vmem:[#allocation5 + $0x120] sm:$0xff]  ;;  %v214_v3 = vld [vmem:[#allocation5 + $0x108] sm:$0xff] }
  0x22   :  { %2454 = vmatmul.msk.f32.gmra.mxu1 %vm408_vm0, %v375_v20  ;;  %v241_v63 = vld [vmem:[#allocation5 + $0x1e0] sm:$0xff]  ;;  %v211_v4 = vld [vmem:[#allocation5 + $0xf0] sm:$0xff]  ;;  %v334_v5 = vld [vmem:[#allocation5 + $0x4c8] sm:$0xff] }
  0x23   :  { %1077 = vmatpush.msrb.mxu1 %v301_v42  ;;  %965 = vmatpush.msrb.mxu0 %v250_v46  ;;  %v289_v0 = vld [vmem:[#allocation5 + $0x360] sm:$0xff]  ;;  %v388_v6 = vld [vmem:[%s3789_s1 + $0x78] sm:$0xff]  ;;  %v238_v8 = vld [vmem:[#allocation5 + $0x1c8] sm:$0xff] }
  0x24   :  { %1192 = vmatpush.msrb.mxu2 %v343_v49  ;;  %v208_v7 = vld [vmem:[#allocation5 + $0xd8] sm:$0xff]  ;;  %v286_v9 = vld [vmem:[#allocation5 + $0x348] sm:$0xff]  ;;  %v205_v10 = vld [vmem:[#allocation5 + $0xc0] sm:$0xff] }
  0x25   :  { %1078 = vmatpush.msrb.mxu1 %v298_v47  ;;  %966 = vmatpush.msrb.mxu0 %v247_v50  ;;  %v389_v11 = vld [vmem:[%s3789_s1 + $0x80] sm:$0xff]  ;;  %v202_v14 = vld [vmem:[#allocation5 + $0xa8] sm:$0xff]  ;;  %v331_v15 = vld [vmem:[#allocation5 + $0x4b0] sm:$0xff] }
  0x26   :  { %2447 = vmatmul.msk.f32.gmra.mxu3 %vm408_vm0, %v2880_v22  ;;  %1193 = vmatpush.msrb.mxu2 %v340_v53  ;;  %v199_v18 = vld [vmem:[#allocation5 + $0x90] sm:$0xff]  ;;  %v196_v25 = vld [vmem:[#allocation5 + $0x78] sm:$0xff]  ;;  %v193_v29 = vld [vmem:[#allocation5 + $0x60] sm:$0xff] }
  0x27   :  { %2487 = vmatmul.msk.f32.gmra.mxu2 %vm408_vm0, %v376_v23  ;;  %1079 = vmatpush.msrb.mxu1 %v295_v51  ;;  %v235_v20 = vld [vmem:[#allocation5 + $0x1b0] sm:$0xff]  ;;  %v328_v30 = vld [vmem:[#allocation5 + $0x498] sm:$0xff]  ;;  %v229_v49 = vld [vmem:[#allocation5 + $0x180] sm:$0xff] }
  0x28   :  { %2423 = vmatmul.msk.f32.gmra.mxu0 %vm408_vm0, %v376_v23  ;;  %1194 = vmatpush.msrb.mxu2 %v337_v61  ;;  %v232_v36 = vld [vmem:[#allocation5 + $0x198] sm:$0xff]  ;;  %v187_v41 = vld [vmem:[#allocation5 + $0x30] sm:$0xff]  ;;  %v393_v51 = vld [vmem:[%s3789_s1 + $0xa0] sm:$0xff] }
  0x29   :  { %1080 = vmatpush.msrb.mxu1 %v292_v57  ;;  %967 = vmatpush.msrb.mxu0 %v244_v56  ;;  %v280_v37 = vld [vmem:[#allocation5 + $0x318] sm:$0xff]  ;;  %v227_v53 = vld [vmem:[#allocation5 + $0x170] sm:$0xff] }
  0x2a   :  { %2455 = vmatmul.msk.f32.gmra.mxu1 %vm408_vm0, %v376_v23  ;;  %1195 = vmatpush.msrb.mxu2 %v334_v5  ;;  %v390_v23 = vld [vmem:[%s3789_s1 + $0x88] sm:$0xff]  ;;  %v184_v44 = vld [vmem:[#allocation5 + $0x18] sm:$0xff]  ;;  %v371_v56 = vld [vmem:[#allocation5 + $0x5f0] sm:$0xff] }
  0x2b   :  { %968 = vmatpush.msrb.mxu0 %v241_v63  ;;  %1081 = vmatpush.msrb.mxu1 %v289_v0  ;;  %v368_v5 = vld [vmem:[#allocation5 + $0x5d8] sm:$0xff] }
  0x2c   :  { %1196 = vmatpush.msrb.mxu2 %v331_v15  ;;  %v53_v15 = vld [vmem:[#allocation2] sm:$0xff] }
  0x2d   :  { %1082 = vmatpush.msrb.mxu1 %v286_v9  ;;  %969 = vmatpush.msrb.mxu0 %v238_v8  ;;  %v272_v8 = vld [vmem:[#allocation5 + $0x2d8] sm:$0xff] }
  0x2e   :  { %2448 = vmatmul.msk.f32.gmra.mxu3 %vm408_vm0, %v2893_v26  ;;  %1197 = vmatpush.msrb.mxu2 %v328_v30  ;;  %v320_v9 = vld [vmem:[#allocation5 + $0x458] sm:$0xff]  ;;  %v365_v30 = vld [vmem:[#allocation5 + $0x5c0] sm:$0xff] }
  0x2f   :  { %2488 = vmatmul.msk.f32.gmra.mxu2 %vm408_vm0, %v377_v27  ;;  %970 = vmatpush.msrb.mxu0 %v235_v20 }
  0x30   :  { %2424 = vmatmul.msk.f32.gmra.mxu0 %vm408_vm0, %v377_v27 }
  0x31   :  { %971 = vmatpush.msrb.mxu0 %v232_v36  ;;  %v60_v36 = vld [vmem:[#allocation2 + $0x38] sm:$0xff] }
  0x32   :  { %2456 = vmatmul.msk.f32.gmra.mxu1 %vm408_vm0, %v377_v27 }
  0x33   :  { %972 = vmatpush.msrb.mxu0 %v229_v49 }
  0x36   :  { %2449 = vmatmul.msk.f32.gmra.mxu3 %vm408_vm0, %v2906_v31 }
  0x37   :  { %2489 = vmatmul.msk.f32.gmra.mxu2 %vm408_vm0, %v378_v32 }
  0x38   :  { %2425 = vmatmul.msk.f32.gmra.mxu0 %vm408_vm0, %v378_v32 }
  0x3a   :  { %2457 = vmatmul.msk.f32.gmra.mxu1 %vm408_vm0, %v378_v32 }
  0x3e   :  { %2450 = vmatmul.msk.f32.gmra.mxu3 %vm408_vm0, %v2919_v34 }
  0x3f   :  { %2490 = vmatmul.msk.f32.gmra.mxu2 %vm408_vm0, %v379_v35 }
  0x40   :  { %2426 = vmatmul.msk.f32.gmra.mxu0 %vm408_vm0, %v379_v35 }
  0x42   :  { %2458 = vmatmul.msk.f32.gmra.mxu1 %vm408_vm0, %v379_v35  ;;  %v190_v35 = vld [vmem:[#allocation5 + $0x48] sm:$0xff] }
  0x46   :  { %2451 = vmatmul.msk.f32.gmra.mxu3 %vm408_vm0, %v2932_v38 }
  0x47   :  { %2491 = vmatmul.msk.f32.gmra.mxu2 %vm408_vm0, %v380_v39 }
  0x48   :  { %2427 = vmatmul.msk.f32.gmra.mxu0 %vm408_vm0, %v380_v39 }
  0x4a   :  { %2459 = vmatmul.msk.f32.gmra.mxu1 %vm408_vm0, %v380_v39 }
  0x4e   :  { %2476 = vmatmul.msk.f32.vlgmr.msrb.gmra.mxu3 %vm408_vm0, %v2835_v1 }
  0x4f   :  { %2492 = vmatmul.msk.f32.gmra.mxu2 %vm408_vm0, %v381_v43  ;;  %844 = vmatpush.msrb.mxu3 %v226_v55 }
  0x50   :  { %2428 = vmatmul.msk.f32.gmra.mxu0 %vm408_vm0, %v381_v43 }
  0x51   :  { %845 = vmatpush.msrb.mxu3 %v223_v58 }
  0x52   :  { %2460 = vmatmul.msk.f32.gmra.mxu1 %vm408_vm0, %v381_v43 }
  0x53   :  { %846 = vmatpush.msrb.mxu3 %v220_v60  ;;  %v323_v60 = vld [vmem:[#allocation5 + $0x470] sm:$0xff] }
  0x55   :  { %847 = vmatpush.msrb.mxu3 %v217_v62 }
  0x56   :  { %2477 = vmatmul.msk.f32.gmra.mxu3 %vm408_vm0, %v2854_v13 }
  0x57   :  { %2493 = vmatmul.msk.f32.gmra.mxu2 %vm408_vm0, %v382_v45  ;;  %848 = vmatpush.msrb.mxu3 %v214_v3 }
  0x58   :  { %2429 = vmatmul.msk.f32.gmra.mxu0 %vm408_vm0, %v382_v45 }
  0x59   :  { %849 = vmatpush.msrb.mxu3 %v211_v4 }
  0x5a   :  { %2461 = vmatmul.msk.f32.gmra.mxu1 %vm408_vm0, %v382_v45  ;;  %v325_v45 = vld [vmem:[#allocation5 + $0x480] sm:$0xff] }
  0x5b   :  { %850 = vmatpush.msrb.mxu3 %v208_v7  ;;  %1198 = vmatpush.msrb.mxu2 %v325_v45 }
  0x5d   :  { %851 = vmatpush.msrb.mxu3 %v205_v10  ;;  %1635 = vmatpush.msra.mxu2 %v371_v56 }
  0x5e   :  { %2478 = vmatmul.msk.f32.gmra.mxu3 %vm408_vm0, %v2867_v19 }
  0x5f   :  { %2494 = vmatmul.msk.f32.gmra.mxu2 %vm408_vm0, %v383_v48  ;;  %852 = vmatpush.msrb.mxu3 %v202_v14 }
  0x60   :  { %2430 = vmatmul.msk.f32.gmra.mxu0 %vm408_vm0, %v383_v48  ;;  %1636 = vmatpush.msra.mxu2 %v368_v5  ;;  %v362_v5 = vld [vmem:[#allocation5 + $0x5a8] sm:$0xff] }
  0x61   :  { %853 = vmatpush.msrb.mxu3 %v199_v18  ;;  %v56_v18 = vld [vmem:[#allocation2 + $0x18] sm:$0xff] }
  0x62   :  { %2462 = vmatmul.msk.f32.gmra.mxu1 %vm408_vm0, %v383_v48  ;;  %v181_v48 = vld [vmem:[#allocation5] sm:$0xff]  ;;  %1637 = vmatpush.msra.mxu2 %v365_v30  ;;  %v67_v30 = vld [vmem:[#allocation2 + $0x70] sm:$0xff] }
  0x63   :  { %854 = vmatpush.msrb.mxu3 %v196_v25  ;;  %v55_v25 = vld [vmem:[#allocation2 + $0x10] sm:$0xff] }
  0x64   :  { %1638 = vmatpush.msra.mxu2 %v362_v5 }
  0x65   :  { %855 = vmatpush.msrb.mxu3 %v193_v29 }
  0x66   :  { %2479 = vmatmul.msk.f32.gmra.mxu3 %vm408_vm0, %v2880_v22 }
  0x67   :  { %2495 = vmatmul.msk.f32.gmra.mxu2 %vm408_vm0, %v384_v52  ;;  %856 = vmatpush.msrb.mxu3 %v190_v35  ;;  %v57_v35 = vld [vmem:[#allocation2 + $0x20] sm:$0xff] }
  0x68   :  { %2431 = vmatmul.msk.f32.gmra.mxu0 %vm408_vm0, %v384_v52 }
  0x69   :  { %857 = vmatpush.msrb.mxu3 %v187_v41  ;;  %v58_v41 = vld [vmem:[#allocation2 + $0x28] sm:$0xff] }
  0x6a   :  { %2463 = vmatmul.msk.f32.gmra.mxu1 %vm408_vm0, %v384_v52 }
  0x6b   :  { %858 = vmatpush.msrb.mxu3 %v184_v44  ;;  %v317_v44 = vld [vmem:[#allocation5 + $0x440] sm:$0xff] }
  0x6d   :  { %859 = vmatpush.msrb.mxu3 %v181_v48  ;;  %v59_v48 = vld [vmem:[#allocation2 + $0x30] sm:$0xff] }
  0x6e   :  { %2480 = vmatmul.msk.f32.gmra.mxu3 %vm408_vm0, %v2893_v26 }
  0x6f   :  { %2496 = vmatmul.msk.f32.gmra.mxu2 %vm408_vm0, %v385_v54 }
  0x70   :  { %2432 = vmatmul.msk.f32.gmra.mxu0 %vm408_vm0, %v385_v54 }
  0x72   :  { %2464 = vmatmul.msk.f32.gmra.mxu1 %vm408_vm0, %v385_v54 }
  0x76   :  { %2481 = vmatmul.msk.f32.gmra.mxu3 %vm408_vm0, %v2906_v31 }
  0x77   :  { %2497 = vmatmul.msk.f32.gmra.mxu2 %vm408_vm0, %v386_v59 }
  0x78   :  { %2433 = vmatmul.msk.f32.gmra.mxu0 %vm408_vm0, %v386_v59 }
  0x7a   :  { %2465 = vmatmul.msk.f32.gmra.mxu1 %vm408_vm0, %v386_v59  ;;  %v275_v59 = vld [vmem:[#allocation5 + $0x2f0] sm:$0xff] }
  0x7b   :  { %1409 = vmatpush.msra.mxu0 %v275_v59  ;;  %v218_v59 = vld [vmem:[#allocation5 + $0x128] sm:$0xff] }
  0x7d   :  { %1410 = vmatpush.msra.mxu0 %v272_v8  ;;  %v65_v8 = vld [vmem:[#allocation2 + $0x60] sm:$0xff] }
  0x7e   :  { %2482 = vmatmul.msk.f32.gmra.mxu3 %vm408_vm0, %v2919_v34 }
  0x7f   :  { %2498 = vmatmul.msk.f32.gmra.mxu2 %vm408_vm0, %v387_v2 }
  0x80   :  { %2434 = vmatmul.msk.f32.gmra.mxu0 %vm408_vm0, %v387_v2 }
  0x82   :  { %2466 = vmatmul.msk.f32.gmra.mxu1 %vm408_vm0, %v387_v2  ;;  %v224_v2 = vld [vmem:[#allocation5 + $0x158] sm:$0xff] }
  0x86   :  { %2483 = vmatmul.msk.f32.gmra.mxu3 %vm408_vm0, %v2932_v38 }
  0x87   :  { %2499 = vmatmul.msk.f32.gmra.mxu2 %vm408_vm0, %v388_v6 }
  0x88   :  { %2435 = vmatmul.msk.f32.gmra.mxu0 %vm408_vm0, %v388_v6 }
  0x8a   :  { %2467 = vmatmul.msk.f32.gmra.mxu1 %vm408_vm0, %v388_v6 }
  0x8d   :  { %v3009_v12 = vpop.f32.mrf.mxu0 }
  0x8e   :  { %2508 = vmatmul.msk.f32.vlgmr.msra.gmra.mxu3 %vm408_vm0, %v2835_v1  ;;  %v283_v1 = vld [vmem:[#allocation5 + $0x330] sm:$0xff] }
  0x8f   :  { %2500 = vmatmul.msk.f32.gmra.mxu2 %vm408_vm0, %v389_v11  ;;  %v3014_v16 = vpop.f32.mrf.mxu1  ;;  %1083 = vmatpush.msrb.mxu1 %v283_v1  ;;  %v221_v1 = vld [vmem:[#allocation5 + $0x140] sm:$0xff] }
  0x90   :  { %2436 = vmatmul.msk.f32.gmra.mxu0 %vm408_vm0, %v389_v11  ;;  %1296 = vmatpush.msra.mxu3 %v227_v53  ;;  %v64_v53 = vld [vmem:[#allocation2 + $0x58] sm:$0xff] }
  0x91   :  { %v3017_v17 = vpop.f32.mrf.mxu3  ;;  %1084 = vmatpush.msrb.mxu1 %v280_v37 }
  0x92   :  { %v3019_v21 = vpop.f32.mrf.mxu2  ;;  %2468 = vmatmul.msk.f32.gmra.mxu1 %vm408_vm0, %v389_v11  ;;  %1297 = vmatpush.msra.mxu3 %v224_v2 }
  0x93   :  { %3830 = vst [vmem:[#allocation11_spill] sm:$0xff] %v3019_v21  ;;  %v94_v21 = vld [vmem:[#allocation2 + $0x148] sm:$0xff] }
  0x94   :  { %1298 = vmatpush.msra.mxu3 %v221_v1  ;;  %v314_v1 = vld [vmem:[#allocation5 + $0x428] sm:$0xff] }
  0x95   :  { %v3025_v24 = vpop.f32.mrf.mxu0 }
  0x96   :  { %2509 = vmatmul.msk.f32.gmra.mxu3 %vm408_vm0, %v2854_v13  ;;  %v391_v13 = vld [vmem:[%s3789_s1 + $0x90] sm:$0xff] }
  0x97   :  { %2501 = vmatmul.msk.f32.gmra.mxu2 %vm408_vm0, %v390_v23  ;;  %v3030_v27 = vpop.f32.mrf.mxu1  ;;  %1299 = vmatpush.msra.mxu3 %v218_v59 }
  0x98   :  { %2437 = vmatmul.msk.f32.gmra.mxu0 %vm408_vm0, %v390_v23 }
  0x99   :  { %v3033_v28 = vpop.f32.mrf.mxu3 }
  0x9a   :  { %v3035_v32 = vpop.f32.mrf.mxu2  ;;  %2469 = vmatmul.msk.f32.gmra.mxu1 %vm408_vm0, %v390_v23 }
  0x9b   :  { %3831 = vst [vmem:[#allocation12_spill] sm:$0xff] %v3035_v32 }
  0x9d   :  { %v3041_v33 = vpop.f32.mrf.mxu0 }
  0x9e   :  { %2510 = vmatmul.msk.f32.gmra.mxu3 %vm408_vm0, %v2867_v19  ;;  %v392_v19 = vld [vmem:[%s3789_s1 + $0x98] sm:$0xff] }
  0x9f   :  { %2502 = vmatmul.msk.f32.gmra.mxu2 %vm408_vm0, %v391_v13  ;;  %v3046_v39 = vpop.f32.mrf.mxu1 }
  0xa0   :  { %2438 = vmatmul.msk.f32.gmra.mxu0 %vm408_vm0, %v391_v13 }
  0xa1   :  { %v3049_v40 = vpop.f32.mrf.mxu3 }
  0xa2   :  { %v3051_v42 = vpop.f32.mrf.mxu2  ;;  %2470 = vmatmul.msk.f32.gmra.mxu1 %vm408_vm0, %v391_v13 }
  0xa3   :  { %3832 = vst [vmem:[#allocation13_spill] sm:$0xff] %v3051_v42  ;;  %v90_v42 = vld [vmem:[#allocation2 + $0x128] sm:$0xff] }
  0xa5   :  { %v3057_v43 = vpop.f32.mrf.mxu0 }
  0xa6   :  { %2511 = vmatmul.msk.f32.gmra.mxu3 %vm408_vm0, %v2880_v22  ;;  %v277_v22 = vld [vmem:[#allocation5 + $0x300] sm:$0xff] }
  0xa7   :  { %2503 = vmatmul.msk.f32.gmra.mxu2 %vm408_vm0, %v392_v19  ;;  %v3062_v46 = vpop.f32.mrf.mxu1  ;;  %1085 = vmatpush.msrb.mxu1 %v277_v22 }
  0xa8   :  { %2439 = vmatmul.msk.f32.gmra.mxu0 %vm408_vm0, %v392_v19 }
  0xa9   :  { %v3065_v47 = vpop.f32.mrf.mxu3  ;;  %1522 = vmatpush.msra.mxu1 %v323_v60 }
  0xaa   :  { %v3067_v50 = vpop.f32.mrf.mxu2  ;;  %2471 = vmatmul.msk.f32.gmra.mxu1 %vm408_vm0, %v392_v19  ;;  %v269_v19 = vld [vmem:[#allocation5 + $0x2c0] sm:$0xff] }
  0xab   :  { %3833 = vst [vmem:[#allocation14_spill] sm:$0xff] %v3067_v50  ;;  %1523 = vmatpush.msra.mxu1 %v320_v9  ;;  %1411 = vmatpush.msra.mxu0 %v269_v19  ;;  %v68_v9 = vld [vmem:[#allocation2 + $0x78] sm:$0xff] }
  0xac   :  { %v72_v19 = vld [vmem:[#allocation2 + $0x98] sm:$0xff] }
  0xad   :  { %v3073_v52 = vpop.f32.mrf.mxu0  ;;  %1524 = vmatpush.msra.mxu1 %v317_v44 }
  0xae   :  { %2512 = vmatmul.msk.f32.gmra.mxu3 %vm408_vm0, %v2893_v26  ;;  %v394_v26 = vld [vmem:[%s3789_s1 + $0xa8] sm:$0xff] }
  0xaf   :  { %2504 = vmatmul.msk.f32.gmra.mxu2 %vm408_vm0, %v393_v51  ;;  %v3078_v54 = vpop.f32.mrf.mxu1  ;;  %1525 = vmatpush.msra.mxu1 %v314_v1  ;;  %v263_v1 = vld [vmem:[#allocation5 + $0x290] sm:$0xff] }
  0xb0   :  { %2440 = vmatmul.msk.f32.gmra.mxu0 %vm408_vm0, %v393_v51 }
  0xb1   :  { %v3081_v55 = vpop.f32.mrf.mxu3 }
  0xb2   :  { %v3083_v57 = vpop.f32.mrf.mxu2  ;;  %2472 = vmatmul.msk.f32.gmra.mxu1 %vm408_vm0, %v393_v51  ;;  %v61_v51 = vld [vmem:[#allocation2 + $0x40] sm:$0xff] }
  0xb3   :  { %3834 = vst [vmem:[#allocation15_spill] sm:$0xff] %v3083_v57  ;;  %v87_v57 = vld [vmem:[#allocation2 + $0x110] sm:$0xff] }
  0xb5   :  { %v3089_v58 = vpop.f32.mrf.mxu0 }
  0xb6   :  { %2513 = vmatmul.msk.f32.gmra.mxu3 %vm408_vm0, %v2906_v31  ;;  %v395_v31 = vld [vmem:[%s3789_s1 + $0xb0] sm:$0xff] }
  0xb7   :  { %2505 = vmatmul.msk.f32.gmra.mxu2 %vm408_vm0, %v394_v26  ;;  %v3094_v61 = vpop.f32.mrf.mxu1 }
  0xb8   :  { %2441 = vmatmul.msk.f32.gmra.mxu0 %vm408_vm0, %v394_v26 }
  0xb9   :  { %v3097_v62 = vpop.f32.mrf.mxu3 }
  0xba   :  { %v3099_v63 = vpop.f32.mrf.mxu2  ;;  %2473 = vmatmul.msk.f32.gmra.mxu1 %vm408_vm0, %v394_v26  ;;  %v62_v26 = vld [vmem:[#allocation2 + $0x48] sm:$0xff] }
  0xbb   :  { %3835 = vst [vmem:[#allocation16_spill] sm:$0xff] %v3099_v63  ;;  %v86_v63 = vld [vmem:[#allocation2 + $0x108] sm:$0xff] }
  0xbd   :  { %v3105_v0 = vpop.f32.mrf.mxu0 }
  0xbe   :  { %2514 = vmatmul.msk.f32.gmra.mxu3 %vm408_vm0, %v2919_v34  ;;  %v396_v34 = vld [vmem:[%s3789_s1 + $0xb8] sm:$0xff] }
  0xbf   :  { %2506 = vmatmul.msk.f32.gmra.mxu2 %vm408_vm0, %v395_v31  ;;  %v3110_v3 = vpop.f32.mrf.mxu1 }
  0xc0   :  { %2442 = vmatmul.msk.f32.gmra.mxu0 %vm408_vm0, %v395_v31 }
  0xc1   :  { %v3113_v4 = vpop.f32.mrf.mxu3 }
  0xc2   :  { %v3115_v6 = vpop.f32.mrf.mxu2  ;;  %2474 = vmatmul.msk.f32.gmra.mxu1 %vm408_vm0, %v395_v31  ;;  %v63_v31 = vld [vmem:[#allocation2 + $0x50] sm:$0xff] }
  0xc3   :  { %3836 = vst [vmem:[#allocation17_spill] sm:$0xff] %v3115_v6 }
  0xc5   :  { %v3121_v7 = vpop.f32.mrf.mxu0 }
  0xc6   :  { %2515 = vmatmul.msk.f32.gmra.mxu3 %vm408_vm0, %v2932_v38  ;;  %v54_v38 = vld [vmem:[#allocation2 + $0x8] sm:$0xff] }
  0xc7   :  { %2507 = vmatmul.msk.f32.gmra.mxu2 %vm408_vm0, %v396_v34  ;;  %v3126_v10 = vpop.f32.mrf.mxu1 }
  0xc8   :  { %2443 = vmatmul.msk.f32.gmra.mxu0 %vm408_vm0, %v396_v34 }
  0xc9   :  { %v3129_v11 = vpop.f32.mrf.mxu3 }
  0xca   :  { %v3131_v14 = vpop.f32.mrf.mxu2  ;;  %2475 = vmatmul.msk.f32.gmra.mxu1 %vm408_vm0, %v396_v34 }
  0xcb   :  { %3837 = vst [vmem:[#allocation18_spill] sm:$0xff] %v3131_v14 }
  0xcd   :  { %v3134_v20 = vpop.f32.mrf.mxu0 }
  0xce   :  { %860 = vmatmul.f32.vlgmr.msrb.gmra.mxu3 %v53_v15 }
  0xcf   :  { %1199 = vmatmul.f32.vlgmr.msrb.gmra.mxu2 %v56_v18  ;;  %v3136_v23 = vpop.f32.mrf.mxu1  ;;  %v66_v18 = vld [vmem:[#allocation2 + $0x68] sm:$0xff] }
  0xd0   :  { %973 = vmatmul.f32.vlgmr.msrb.gmra.mxu0 %v54_v38  ;;  %v266_v38 = vld [vmem:[#allocation5 + $0x2a8] sm:$0xff] }
  0xd1   :  { %v3138_v29 = vpop.f32.mrf.mxu3  ;;  %1412 = vmatpush.msra.mxu0 %v266_v38  ;;  %v74_v38 = vld [vmem:[#allocation2 + $0xa8] sm:$0xff] }
  0xd2   :  { %3838 = vst [vmem:[#allocation19_spill] sm:$0xff] %v3138_v29  ;;  %v3140_v13 = vpop.f32.mrf.mxu2  ;;  %1086 = vmatmul.f32.vlgmr.msrb.gmra.mxu1 %v55_v25 }
  0xd3   :  { %3839 = vst [vmem:[#allocation20_spill] sm:$0xff] %v3140_v13  ;;  %1413 = vmatpush.msra.mxu0 %v263_v1  ;;  %v356_v1 = vld [vmem:[#allocation5 + $0x578] sm:$0xff]  ;;  %v82_v13 = vld [vmem:[#allocation2 + $0xe8] sm:$0xff] }
  0xd5   :  { %v3142_v37 = vpop.f32.mrf.mxu0 }
  0xd6   :  { %863 = vmatmul.f32.gmra.mxu3 %v57_v35 }
  0xd7   :  { %1202 = vmatmul.f32.gmra.mxu2 %v60_v36  ;;  %v3144_v45 = vpop.f32.mrf.mxu1 }
  0xd8   :  { %976 = vmatmul.f32.gmra.mxu0 %v58_v41  ;;  %v69_v41 = vld [vmem:[#allocation2 + $0x80] sm:$0xff] }
  0xd9   :  { %v3146_v49 = vpop.f32.mrf.mxu3 }
  0xda   :  { %3840 = vst [vmem:[#allocation21_spill] sm:$0xff] %v3146_v49  ;;  %v3148_v22 = vpop.f32.mrf.mxu2  ;;  %1089 = vmatmul.f32.gmra.mxu1 %v59_v48  ;;  %v70_v48 = vld [vmem:[#allocation2 + $0x88] sm:$0xff]  ;;  %v107_v49 = vld [vmem:[#allocation2 + $0x1b0] sm:$0xff] }
  0xdb   :  { %3841 = vst [vmem:[#allocation22_spill] sm:$0xff] %v3148_v22 }
  0xdd   :  { %v3150_v56 = vpop.f32.mrf.mxu0 }
  0xde   :  { %866 = vmatmul.f32.gmra.mxu3 %v61_v51  ;;  %v215_v51 = vld [vmem:[#allocation5 + $0x110] sm:$0xff] }
  0xdf   :  { %1205 = vmatmul.f32.gmra.mxu2 %v64_v53  ;;  %v3152_v60 = vpop.f32.mrf.mxu1  ;;  %1300 = vmatpush.msra.mxu3 %v215_v51 }
  0xe0   :  { %979 = vmatmul.f32.gmra.mxu0 %v62_v26  ;;  %v71_v26 = vld [vmem:[#allocation2 + $0x90] sm:$0xff] }
  0xe1   :  { %v3154_v2 = vpop.f32.mrf.mxu3 }
  0xe2   :  { %3842 = vst [vmem:[#allocation23_spill] sm:$0xff] %v3154_v2  ;;  %v3156_v34 = vpop.f32.mrf.mxu2  ;;  %1092 = vmatmul.f32.gmra.mxu1 %v63_v31  ;;  %v359_v31 = vld [vmem:[#allocation5 + $0x590] sm:$0xff]  ;;  %v106_v2 = vld [vmem:[#allocation2 + $0x1a8] sm:$0xff] }
  0xe3   :  { %3843 = vst [vmem:[#allocation24_spill] sm:$0xff] %v3156_v34  ;;  %1639 = vmatpush.msra.mxu2 %v359_v31  ;;  %v80_v31 = vld [vmem:[#allocation2 + $0xd8] sm:$0xff]  ;;  %v79_v34 = vld [vmem:[#allocation2 + $0xd0] sm:$0xff] }
  0xe5   :  { %v3158_v15 = vpop.f32.mrf.mxu0  ;;  %1640 = vmatpush.msra.mxu2 %v356_v1  ;;  %v88_v1 = vld [vmem:[#allocation2 + $0x118] sm:$0xff] }
  0xe6   :  { %869 = vmatmul.f32.gmra.mxu3 %v65_v8  ;;  %v73_v8 = vld [vmem:[#allocation2 + $0xa0] sm:$0xff] }
  0xe7   :  { %1208 = vmatmul.f32.gmra.mxu2 %v68_v9  ;;  %v3160_v25 = vpop.f32.mrf.mxu1  ;;  %v76_v9 = vld [vmem:[#allocation2 + $0xb8] sm:$0xff] }
  0xe8   :  { %982 = vmatmul.f32.gmra.mxu0 %v66_v18 }
  0xe9   :  { %v3162_v35 = vpop.f32.mrf.mxu3 }
  0xea   :  { %3844 = vst [vmem:[#allocation25_spill] sm:$0xff] %v3162_v35  ;;  %v3164_v36 = vpop.f32.mrf.mxu2  ;;  %1095 = vmatmul.f32.gmra.mxu1 %v67_v30  ;;  %v311_v30 = vld [vmem:[#allocation5 + $0x410] sm:$0xff] }
  0xeb   :  { %3845 = vst [vmem:[#allocation26_spill] sm:$0xff] %v3164_v36  ;;  %1526 = vmatpush.msra.mxu1 %v311_v30  ;;  %v78_v36 = vld [vmem:[#allocation2 + $0xc8] sm:$0xff]  ;;  %v103_v35 = vld [vmem:[#allocation2 + $0x190] sm:$0xff] }
  0xed   :  { %v3166_v44 = vpop.f32.mrf.mxu0 }
  0xee   :  { %872 = vmatmul.f32.gmra.mxu3 %v69_v41 }
  0xef   :  { %1211 = vmatmul.f32.gmra.mxu2 %v72_v19  ;;  %v3168_v53 = vpop.f32.mrf.mxu1  ;;  %v75_v19 = vld [vmem:[#allocation2 + $0xb0] sm:$0xff] }
  0xf0   :  { %985 = vmatmul.f32.gmra.mxu0 %v70_v48 }
  0xf1   :  { %v3170_v59 = vpop.f32.mrf.mxu3 }
  0xf2   :  { %3846 = vst [vmem:[#allocation27_spill] sm:$0xff] %v3170_v59  ;;  %v3172_v5 = vpop.f32.mrf.mxu2  ;;  %1098 = vmatmul.f32.gmra.mxu1 %v71_v26  ;;  %v77_v26 = vld [vmem:[#allocation2 + $0xc0] sm:$0xff]  ;;  %v102_v59 = vld [vmem:[#allocation2 + $0x188] sm:$0xff] }
  0xf3   :  { %3847 = vst [vmem:[#allocation28_spill] sm:$0xff] %v3172_v5 }
  0xf5   :  { %v3174_v18 = vpop.f32.mrf.mxu0 }
  0xf6   :  { %875 = vmatmul.f32.gmra.mxu3 %v73_v8  ;;  %v212_v8 = vld [vmem:[#allocation5 + $0xf8] sm:$0xff] }
  0xf7   :  { %1214 = vmatmul.f32.gmra.mxu2 %v76_v9  ;;  %v3176_v41 = vpop.f32.mrf.mxu1  ;;  %1301 = vmatpush.msra.mxu3 %v212_v8  ;;  %v83_v8 = vld [vmem:[#allocation2 + $0xf0] sm:$0xff] }
  0xf8   :  { %3848 = vst [vmem:[#allocation29_spill] sm:$0xff] %v3176_v41  ;;  %988 = vmatmul.f32.gmra.mxu0 %v74_v38  ;;  %v125_v41 = vld [vmem:[#allocation2 + $0x240] sm:$0xff] }
  0xf9   :  { %v3178_v48 = vpop.f32.mrf.mxu3 }
  0xfa   :  { %3849 = vst [vmem:[#allocation30_spill] sm:$0xff] %v3178_v48  ;;  %v3180_v51 = vpop.f32.mrf.mxu2  ;;  %1101 = vmatmul.f32.gmra.mxu1 %v75_v19  ;;  %v81_v19 = vld [vmem:[#allocation2 + $0xe0] sm:$0xff] }
  0xfb   :  { %3850 = vst [vmem:[#allocation31_spill] sm:$0xff] %v3180_v51  ;;  %v84_v51 = vld [vmem:[#allocation2 + $0xf8] sm:$0xff] }
  0xfd   :  { %v3182_v5 = vpop.f32.mrf.mxu0 }
  0xfe   :  { %878 = vmatmul.f32.gmra.mxu3 %v77_v26  ;;  %v260_v26 = vld [vmem:[#allocation5 + $0x278] sm:$0xff] }
  0xff   :  { %1217 = vmatmul.f32.gmra.mxu2 %v80_v31  ;;  %v3184_v9 = vpop.f32.mrf.mxu1  ;;  %v308_v31 = vld [vmem:[#allocation5 + $0x3f8] sm:$0xff]  ;;  %1414 = vmatpush.msra.mxu0 %v260_v26  ;;  %v353_v26 = vld [vmem:[#allocation5 + $0x560] sm:$0xff] }
 0x100   :  { %3851 = vst [vmem:[#allocation32_spill] sm:$0xff] %v3184_v9  ;;  %991 = vmatmul.f32.gmra.mxu0 %v78_v36  ;;  %1527 = vmatpush.msra.mxu1 %v308_v31 }
 0x101   :  { %v3186_v38 = vpop.f32.mrf.mxu3  ;;  %1641 = vmatpush.msra.mxu2 %v353_v26  ;;  %v96_v26 = vld [vmem:[#allocation2 + $0x158] sm:$0xff] }
 0x102   :  { %3852 = vst [vmem:[#allocation33_spill] sm:$0xff] %v3186_v38  ;;  %v3188_v30 = vpop.f32.mrf.mxu2  ;;  %1104 = vmatmul.f32.gmra.mxu1 %v79_v34  ;;  %v85_v34 = vld [vmem:[#allocation2 + $0x100] sm:$0xff]  ;;  %v98_v38 = vld [vmem:[#allocation2 + $0x168] sm:$0xff] }
 0x103   :  { %3853 = vst [vmem:[#allocation34_spill] sm:$0xff] %v3188_v30 }
 0x105   :  { %v3190_v22 = vpop.f32.mrf.mxu0 }
 0x106   :  { %881 = vmatmul.f32.gmra.mxu3 %v81_v19  ;;  %v209_v19 = vld [vmem:[#allocation5 + $0xe0] sm:$0xff] }
 0x107   :  { %1220 = vmatmul.f32.gmra.mxu2 %v84_v51  ;;  %v3192_v14 = vpop.f32.mrf.mxu1  ;;  %1302 = vmatpush.msra.mxu3 %v209_v19  ;;  %v91_v19 = vld [vmem:[#allocation2 + $0x130] sm:$0xff] }
 0x108   :  { %3854 = vst [vmem:[#allocation35_spill] sm:$0xff] %v3192_v14  ;;  %994 = vmatmul.f32.gmra.mxu0 %v82_v13 }
 0x109   :  { %v3194_v36 = vpop.f32.mrf.mxu3 }
 0x10a   :  { %3855 = vst [vmem:[#allocation36_spill] sm:$0xff] %v3194_v36  ;;  %v3196_v30 = vpop.f32.mrf.mxu2  ;;  %1107 = vmatmul.f32.gmra.mxu1 %v83_v8  ;;  %v89_v8 = vld [vmem:[#allocation2 + $0x120] sm:$0xff]  ;;  %v95_v36 = vld [vmem:[#allocation2 + $0x150] sm:$0xff] }
 0x10b   :  { %3856 = vst [vmem:[#allocation37_spill] sm:$0xff] %v3196_v30  ;;  %v92_v30 = vld [vmem:[#allocation2 + $0x138] sm:$0xff] }
 0x10d   :  { %v3198_v6 = vpop.f32.mrf.mxu0 }
 0x10e   :  { %884 = vmatmul.f32.gmra.mxu3 %v85_v34  ;;  %v257_v34 = vld [vmem:[#allocation5 + $0x260] sm:$0xff] }
 0x10f   :  { %1223 = vmatmul.f32.gmra.mxu2 %v88_v1  ;;  %v3200_v51 = vpop.f32.mrf.mxu1  ;;  %v305_v1 = vld [vmem:[#allocation5 + $0x3e0] sm:$0xff]  ;;  %1415 = vmatpush.msra.mxu0 %v257_v34  ;;  %v350_v34 = vld [vmem:[#allocation5 + $0x548] sm:$0xff] }
 0x110   :  { %3857 = vst [vmem:[#allocation38_spill] sm:$0xff] %v3200_v51  ;;  %997 = vmatmul.f32.gmra.mxu0 %v86_v63  ;;  %1528 = vmatpush.msra.mxu1 %v305_v1  ;;  %v122_v51 = vld [vmem:[#allocation2 + $0x228] sm:$0xff] }
 0x111   :  { %v3202_v13 = vpop.f32.mrf.mxu3  ;;  %1642 = vmatpush.msra.mxu2 %v350_v34  ;;  %v104_v34 = vld [vmem:[#allocation2 + $0x198] sm:$0xff] }
 0x112   :  { %3858 = vst [vmem:[#allocation39_spill] sm:$0xff] %v3202_v13  ;;  %v3204_v31 = vpop.f32.mrf.mxu2  ;;  %1110 = vmatmul.f32.gmra.mxu1 %v87_v57  ;;  %v93_v57 = vld [vmem:[#allocation2 + $0x140] sm:$0xff] }
 0x113   :  { %3859 = vst [vmem:[#allocation40_spill] sm:$0xff] %v3204_v31 }
 0x115   :  { %v3206_v50 = vpop.f32.mrf.mxu0 }
 0x116   :  { %887 = vmatmul.f32.gmra.mxu3 %v89_v8  ;;  %v206_v8 = vld [vmem:[#allocation5 + $0xc8] sm:$0xff] }
 0x117   :  { %1226 = vmatmul.f32.gmra.mxu2 %v92_v30  ;;  %v3208_v32 = vpop.f32.mrf.mxu1  ;;  %1303 = vmatpush.msra.mxu3 %v206_v8  ;;  %v99_v8 = vld [vmem:[#allocation2 + $0x170] sm:$0xff] }
 0x118   :  { %3860 = vst [vmem:[#allocation41_spill] sm:$0xff] %v3208_v32  ;;  %1000 = vmatmul.f32.gmra.mxu0 %v90_v42  ;;  %v124_v32 = vld [vmem:[#allocation2 + $0x238] sm:$0xff] }
 0x119   :  { %v3210_v63 = vpop.f32.mrf.mxu3 }
 0x11a   :  { %3861 = vst [vmem:[#allocation42_spill] sm:$0xff] %v3210_v63  ;;  %v3212_v13 = vpop.f32.mrf.mxu2  ;;  %1113 = vmatmul.f32.gmra.mxu1 %v91_v19  ;;  %v97_v19 = vld [vmem:[#allocation2 + $0x160] sm:$0xff]  ;;  %v100_v63 = vld [vmem:[#allocation2 + $0x178] sm:$0xff] }
 0x11b   :  { %3862 = vst [vmem:[#allocation43_spill] sm:$0xff] %v3212_v13 }
 0x11d   :  { %v3214_v31 = vpop.f32.mrf.mxu0 }
 0x11e   :  { %890 = vmatmul.f32.gmra.mxu3 %v93_v57  ;;  %v254_v57 = vld [vmem:[#allocation5 + $0x248] sm:$0xff] }
 0x11f   :  { %1229 = vmatmul.f32.gmra.mxu2 %v96_v26  ;;  %v3216_v30 = vpop.f32.mrf.mxu1  ;;  %v302_v26 = vld [vmem:[#allocation5 + $0x3c8] sm:$0xff]  ;;  %1416 = vmatpush.msra.mxu0 %v254_v57 }
 0x120   :  { %3863 = vst [vmem:[#allocation44_spill] sm:$0xff] %v3216_v30  ;;  %1003 = vmatmul.f32.gmra.mxu0 %v94_v21  ;;  %1529 = vmatpush.msra.mxu1 %v302_v26  ;;  %v105_v26 = vld [vmem:[#allocation2 + $0x1a0] sm:$0xff]  ;;  %v118_v30 = vld [vmem:[#allocation2 + $0x208] sm:$0xff] }
 0x121   :  { %v3218_v42 = vpop.f32.mrf.mxu3 }
 0x122   :  { %3864 = vst [vmem:[#allocation45_spill] sm:$0xff] %v3218_v42  ;;  %v3220_v1 = vpop.f32.mrf.mxu2  ;;  %1116 = vmatmul.f32.gmra.mxu1 %v95_v36  ;;  %v101_v36 = vld [vmem:[#allocation2 + $0x180] sm:$0xff] }
 0x123   :  { %3865 = vst [vmem:[#allocation46_spill] sm:$0xff] %v3220_v1 }
 0x125   :  { %v3222_v13 = vpop.f32.mrf.mxu0 }
 0x126   :  { %893 = vmatmul.f32.gmra.mxu3 %v97_v19  ;;  %v203_v19 = vld [vmem:[#allocation5 + $0xb0] sm:$0xff] }
 0x127   :  { %1232 = vmatmul.f32.gmra.mxu2 %v100_v63  ;;  %v3224_v48 = vpop.f32.mrf.mxu1  ;;  %1304 = vmatpush.msra.mxu3 %v203_v19 }
 0x128   :  { %3866 = vst [vmem:[#allocation47_spill] sm:$0xff] %v3224_v48  ;;  %1006 = vmatmul.f32.gmra.mxu0 %v98_v38  ;;  %v114_v48 = vld [vmem:[#allocation2 + $0x1e8] sm:$0xff] }
 0x129   :  { %v3226_v21 = vpop.f32.mrf.mxu3 }
 0x12a   :  { %3867 = vst [vmem:[#allocation48_spill] sm:$0xff] %v3226_v21  ;;  %v3228_v42 = vpop.f32.mrf.mxu2  ;;  %1119 = vmatmul.f32.gmra.mxu1 %v99_v8  ;;  %v108_v8 = vld [vmem:[#allocation2 + $0x1b8] sm:$0xff]  ;;  %v347_v21 = vld [vmem:[#allocation5 + $0x530] sm:$0xff] }
 0x12b   :  { %3868 = vst [vmem:[#allocation49_spill] sm:$0xff] %v3228_v42  ;;  %1643 = vmatpush.msra.mxu2 %v347_v21  ;;  %v200_v21 = vld [vmem:[#allocation5 + $0x98] sm:$0xff] }
 0x12c   :  { %1305 = vmatpush.msra.mxu3 %v200_v21 }
 0x12d   :  { %v3230_v1 = vpop.f32.mrf.mxu0 }
 0x12e   :  { %896 = vmatmul.f32.gmra.mxu3 %v101_v36  ;;  %v251_v36 = vld [vmem:[#allocation5 + $0x230] sm:$0xff] }
 0x12f   :  { %1235 = vmatmul.f32.gmra.mxu2 %v104_v34  ;;  %v3232_v63 = vpop.f32.mrf.mxu1  ;;  %1417 = vmatpush.msra.mxu0 %v251_v36 }
 0x130   :  { %3869 = vst [vmem:[#allocation50_spill] sm:$0xff] %v3232_v63  ;;  %1009 = vmatmul.f32.gmra.mxu0 %v102_v59  ;;  %v110_v63 = vld [vmem:[#allocation2 + $0x1c8] sm:$0xff] }
 0x131   :  { %v3234_v38 = vpop.f32.mrf.mxu3 }
 0x132   :  { %3870 = vst [vmem:[#allocation51_spill] sm:$0xff] %v3234_v38  ;;  %v3236_v57 = vpop.f32.mrf.mxu2  ;;  %1122 = vmatmul.f32.gmra.mxu1 %v103_v35  ;;  %v109_v35 = vld [vmem:[#allocation2 + $0x1c0] sm:$0xff]  ;;  %v112_v38 = vld [vmem:[#allocation2 + $0x1d8] sm:$0xff] }
 0x133   :  { %3871 = vst [vmem:[#allocation52_spill] sm:$0xff] %v3236_v57  ;;  %v299_v57 = vld [vmem:[#allocation5 + $0x3b0] sm:$0xff] }
 0x134   :  { %1530 = vmatpush.msra.mxu1 %v299_v57  ;;  %v248_v57 = vld [vmem:[#allocation5 + $0x218] sm:$0xff] }
 0x135   :  { %v3238_v42 = vpop.f32.mrf.mxu0  ;;  %1418 = vmatpush.msra.mxu0 %v248_v57 }
 0x136   :  { %899 = vmatmul.f32.gmra.mxu3 %v105_v26 }
 0x137   :  { %1238 = vmatmul.f32.gmra.mxu2 %v108_v8  ;;  %v3240_v34 = vpop.f32.mrf.mxu1  ;;  %v111_v8 = vld [vmem:[#allocation2 + $0x1d0] sm:$0xff] }
 0x138   :  { %3872 = vst [vmem:[#allocation53_spill] sm:$0xff] %v3240_v34  ;;  %1012 = vmatmul.f32.gmra.mxu0 %v106_v2 }
 0x139   :  { %v3242_v59 = vpop.f32.mrf.mxu3 }
 0x13a   :  { %3873 = vst [vmem:[#allocation54_spill] sm:$0xff] %v3242_v59  ;;  %v3244_v19 = vpop.f32.mrf.mxu2  ;;  %1125 = vmatmul.f32.gmra.mxu1 %v107_v49  ;;  %v113_v49 = vld [vmem:[#allocation2 + $0x1e0] sm:$0xff]  ;;  %v116_v59 = vld [vmem:[#allocation2 + $0x1f8] sm:$0xff] }
 0x13b   :  { %3874 = vst [vmem:[#allocation55_spill] sm:$0xff] %v3244_v19  ;;  %v344_v19 = vld [vmem:[#allocation5 + $0x518] sm:$0xff] }
 0x13c   :  { %1644 = vmatpush.msra.mxu2 %v344_v19  ;;  %v197_v19 = vld [vmem:[#allocation5 + $0x80] sm:$0xff] }
 0x13d   :  { %v3246_v29 = vpop.f32.mrf.mxu0  ;;  %1306 = vmatpush.msra.mxu3 %v197_v19 }
 0x13e   :  { %902 = vmatmul.f32.gmra.mxu3 %v109_v35  ;;  %v115_v35 = vld [vmem:[#allocation2 + $0x1f0] sm:$0xff] }
 0x13f   :  { %1241 = vmatmul.f32.gmra.mxu2 %v112_v38  ;;  %v3248_v26 = vpop.f32.mrf.mxu1 }
 0x140   :  { %3875 = vst [vmem:[#allocation56_spill] sm:$0xff] %v3248_v26  ;;  %1015 = vmatmul.f32.gmra.mxu0 %v110_v63 }
 0x141   :  { %v3250_v2 = vpop.f32.mrf.mxu3 }
 0x142   :  { %3876 = vst [vmem:[#allocation57_spill] sm:$0xff] %v3250_v2  ;;  %v3252_v36 = vpop.f32.mrf.mxu2  ;;  %1128 = vmatmul.f32.gmra.mxu1 %v111_v8  ;;  %v117_v8 = vld [vmem:[#allocation2 + $0x200] sm:$0xff]  ;;  %v120_v2 = vld [vmem:[#allocation2 + $0x218] sm:$0xff] }
 0x143   :  { %3877 = vst [vmem:[#allocation58_spill] sm:$0xff] %v3252_v36  ;;  %v296_v36 = vld [vmem:[#allocation5 + $0x398] sm:$0xff] }
 0x144   :  { %1531 = vmatpush.msra.mxu1 %v296_v36  ;;  %v341_v36 = vld [vmem:[#allocation5 + $0x500] sm:$0xff] }
 0x145   :  { %v3254_v34 = vpop.f32.mrf.mxu0  ;;  %1645 = vmatpush.msra.mxu2 %v341_v36  ;;  %v126_v36 = vld [vmem:[#allocation2 + $0x248] sm:$0xff] }
 0x146   :  { %905 = vmatmul.f32.gmra.mxu3 %v113_v49  ;;  %v119_v49 = vld [vmem:[#allocation2 + $0x210] sm:$0xff] }
 0x147   :  { %1244 = vmatmul.f32.gmra.mxu2 %v116_v59  ;;  %v3256_v38 = vpop.f32.mrf.mxu1 }
 0x148   :  { %3878 = vst [vmem:[#allocation59_spill] sm:$0xff] %v3256_v38  ;;  %1018 = vmatmul.f32.gmra.mxu0 %v114_v48 }
 0x149   :  { %v3258_v63 = vpop.f32.mrf.mxu3 }
 0x14a   :  { %3879 = vst [vmem:[#allocation60_spill] sm:$0xff] %v3258_v63  ;;  %v3260_v21 = vpop.f32.mrf.mxu2  ;;  %1131 = vmatmul.f32.gmra.mxu1 %v115_v35  ;;  %v2200_v35 = vld [vmem:[%s3792_s4] sm:$0x7] }
 0x14b   :  { %3880 = vst [vmem:[#allocation61_spill] sm:$0xff] %v3260_v21  ;;  %v121_v21 = vld [vmem:[#allocation2 + $0x220] sm:$0xff]  ;;  %v3266_v19 = vperm.slane %v2200_v35, 0 }
 0x14d   :  { %v974_v26 = vpop.f32.mrf.mxu0 }
 0x14e   :  { %908 = vmatmul.f32.gmra.mxu3 %v117_v8 }
 0x14f   :  { %1247 = vmatmul.f32.gmra.mxu2 %v120_v2  ;;  %v1087_v59 = vpop.f32.mrf.mxu1 }
 0x150   :  { %1021 = vmatmul.f32.gmra.mxu0 %v118_v30  ;;  %v245_v30 = vld [vmem:[#allocation5 + $0x200] sm:$0xff] }
 0x151   :  { %v861_v57 = vpop.f32.mrf.mxu3  ;;  %1419 = vmatpush.msra.mxu0 %v245_v30  ;;  %v194_v30 = vld [vmem:[#allocation5 + $0x68] sm:$0xff] }
 0x152   :  { %v862_v48 = vadd.f32 %v861_v57, %v3009_v12  ;;  %v1200_v63 = vpop.f32.mrf.mxu2  ;;  %1134 = vmatmul.f32.gmra.mxu1 %v119_v49  ;;  %v123_v57 = vld [vmem:[#allocation2 + $0x230] sm:$0xff]  ;;  %1307 = vmatpush.msra.mxu3 %v194_v30 }
 0x154   :  { %v975_v38 = vadd.f32 %v974_v26, %v862_v48 }
 0x155   :  { %v977_v8 = vpop.f32.mrf.mxu0 }
 0x156   :  { %v1088_v2 = vadd.f32 %v1087_v59, %v975_v38  ;;  %911 = vmatmul.f32.gmra.mxu3 %v121_v21  ;;  %v128_v21 = vld [vmem:[#allocation2 + $0x258] sm:$0xff]  ;;  %v293_v59 = vld [vmem:[#allocation5 + $0x380] sm:$0xff] }
 0x157   :  { %1250 = vmatmul.f32.gmra.mxu2 %v124_v32  ;;  %v1090_v12 = vpop.f32.mrf.mxu1  ;;  %1532 = vmatpush.msra.mxu1 %v293_v59  ;;  %v242_v59 = vld [vmem:[#allocation5 + $0x1e8] sm:$0xff] }
 0x158   :  { %v1201_v49 = vadd.f32 %v1200_v63, %v1088_v2  ;;  %1024 = vmatmul.f32.gmra.mxu0 %v122_v51  ;;  %v127_v63 = vld [vmem:[#allocation2 + $0x250] sm:$0xff] }
 0x159   :  { %v864_v14 = vpop.f32.mrf.mxu3  ;;  %1420 = vmatpush.msra.mxu0 %v242_v59 }
 0x15a   :  { %v2208_v9 = vadd.f32 %v3266_v19, %v1201_v49  ;;  %v865_v26 = vadd.f32 %v864_v14, %v3025_v24  ;;  %v1203_v48 = vpop.f32.mrf.mxu2  ;;  %1137 = vmatmul.f32.gmra.mxu1 %v123_v57  ;;  %v129_v57 = vld [vmem:[#allocation2 + $0x260] sm:$0xff] }
 0x15c   :  { %2304 = vst [vmem:[#allocation7] sm:$0xff] %v2208_v9  ;;  %v978_v38 = vadd.f32 %v977_v8, %v865_v26  ;;  %v132_v26 = vld [vmem:[#allocation2 + $0x278] sm:$0xff] }
 0x15d   :  { %v980_v35 = vpop.f32.mrf.mxu0 }
 0x15e   :  { %v1091_v32 = vadd.f32 %v1090_v12, %v978_v38  ;;  %914 = vmatmul.f32.gmra.mxu3 %v125_v41  ;;  %v338_v12 = vld [vmem:[#allocation5 + $0x4e8] sm:$0xff] }
 0x15f   :  { %1253 = vmatmul.f32.gmra.mxu2 %v128_v21  ;;  %v1093_v51 = vpop.f32.mrf.mxu1  ;;  %v130_v38 = vld [vmem:[#allocation2 + $0x268] sm:$0xff] }
 0x160   :  { %v1204_v2 = vadd.f32 %v1203_v48, %v1091_v32  ;;  %1027 = vmatmul.f32.gmra.mxu0 %v126_v36  ;;  %1646 = vmatpush.msra.mxu2 %v338_v12  ;;  %v131_v36 = vld [vmem:[#allocation2 + $0x270] sm:$0xff] }
 0x161   :  { %v867_v24 = vpop.f32.mrf.mxu3  ;;  %v135_v12 = vld [vmem:[#allocation2 + $0x290] sm:$0xff] }
 0x162   :  { %v2211_v14 = vadd.f32 %v3266_v19, %v1204_v2  ;;  %v868_v9 = vadd.f32 %v867_v24, %v3041_v33  ;;  %v1206_v8 = vpop.f32.mrf.mxu2  ;;  %1140 = vmatmul.f32.gmra.mxu1 %v127_v63  ;;  %v133_v2 = vld [vmem:[#allocation2 + $0x280] sm:$0xff] }
 0x164   :  { %2307 = vst [vmem:[#allocation7 + $0x18] sm:$0xff] %v2211_v14  ;;  %v981_v49 = vadd.f32 %v980_v35, %v868_v9  ;;  %v136_v14 = vld [vmem:[#allocation2 + $0x298] sm:$0xff] }
 0x165   :  { %v983_v41 = vpop.f32.mrf.mxu0 }
 0x166   :  { %v1094_v21 = vadd.f32 %v1093_v51, %v981_v49  ;;  %917 = vmatmul.f32.gmra.mxu3 %v129_v57  ;;  %v290_v51 = vld [vmem:[#allocation5 + $0x368] sm:$0xff] }
 0x167   :  { %1256 = vmatmul.f32.gmra.mxu2 %v132_v26  ;;  %v1096_v48 = vpop.f32.mrf.mxu1  ;;  %v134_v57 = vld [vmem:[#allocation2 + $0x288] sm:$0xff]  ;;  %1533 = vmatpush.msra.mxu1 %v290_v51  ;;  %v191_v26 = vld [vmem:[#allocation5 + $0x50] sm:$0xff] }
 0x168   :  { %v1207_v32 = vadd.f32 %v1206_v8, %v1094_v21  ;;  %1030 = vmatmul.f32.gmra.mxu0 %v130_v38  ;;  %1308 = vmatpush.msra.mxu3 %v191_v26  ;;  %v141_v26 = vld [vmem:[#allocation2 + $0x2c0] sm:$0xff] }
 0x169   :  { %v870_v33 = vpop.f32.mrf.mxu3 }
 0x16a   :  { %v2214_v30 = vadd.f32 %v3266_v19, %v1207_v32  ;;  %v871_v63 = vadd.f32 %v870_v33, %v3057_v43  ;;  %v1209_v35 = vpop.f32.mrf.mxu2  ;;  %1143 = vmatmul.f32.gmra.mxu1 %v131_v36  ;;  %v137_v36 = vld [vmem:[#allocation2 + $0x2a0] sm:$0xff]  ;;  %v140_v33 = vld [vmem:[#allocation2 + $0x2b8] sm:$0xff] }
 0x16c   :  { %2310 = vst [vmem:[#allocation7 + $0x30] sm:$0xff] %v2214_v30  ;;  %v984_v24 = vadd.f32 %v983_v41, %v871_v63  ;;  %v138_v63 = vld [vmem:[#allocation2 + $0x2a8] sm:$0xff] }
 0x16d   :  { %v986_v9 = vpop.f32.mrf.mxu0 }
 0x16e   :  { %v1097_v49 = vadd.f32 %v1096_v48, %v984_v24  ;;  %920 = vmatmul.f32.gmra.mxu3 %v133_v2  ;;  %v335_v48 = vld [vmem:[#allocation5 + $0x4d0] sm:$0xff] }
 0x16f   :  { %1259 = vmatmul.f32.gmra.mxu2 %v136_v14  ;;  %v1099_v8 = vpop.f32.mrf.mxu1  ;;  %v239_v24 = vld [vmem:[#allocation5 + $0x1d0] sm:$0xff] }
 0x170   :  { %v1210_v38 = vadd.f32 %v1209_v35, %v1097_v49  ;;  %1033 = vmatmul.f32.gmra.mxu0 %v134_v57  ;;  %1647 = vmatpush.msra.mxu2 %v335_v48  ;;  %v139_v14 = vld [vmem:[#allocation2 + $0x2b0] sm:$0xff] }
 0x171   :  { %v873_v43 = vpop.f32.mrf.mxu3  ;;  %1421 = vmatpush.msra.mxu0 %v239_v24 }
 0x172   :  { %v2217_v21 = vadd.f32 %v3266_v19, %v1210_v38  ;;  %v874_v59 = vadd.f32 %v873_v43, %v3073_v52  ;;  %v1212_v41 = vpop.f32.mrf.mxu2  ;;  %1146 = vmatmul.f32.gmra.mxu1 %v135_v12  ;;  %v144_v38 = vld [vmem:[#allocation2 + $0x2d8] sm:$0xff] }
 0x174   :  { %2313 = vst [vmem:[#allocation7 + $0x48] sm:$0xff] %v2217_v21  ;;  %v987_v32 = vadd.f32 %v986_v9, %v874_v59  ;;  %v142_v21 = vld [vmem:[#allocation2 + $0x2c8] sm:$0xff] }
 0x175   :  { %v989_v30 = vpop.f32.mrf.mxu0 }
 0x176   :  { %v1100_v2 = vadd.f32 %v1099_v8, %v987_v32  ;;  %923 = vmatmul.f32.gmra.mxu3 %v137_v36  ;;  %v287_v8 = vld [vmem:[#allocation5 + $0x350] sm:$0xff]  ;;  %v188_v36 = vld [vmem:[#allocation5 + $0x38] sm:$0xff] }
 0x177   :  { %1262 = vmatmul.f32.gmra.mxu2 %v140_v33  ;;  %v1102_v35 = vpop.f32.mrf.mxu1  ;;  %1534 = vmatpush.msra.mxu1 %v287_v8  ;;  %v143_v32 = vld [vmem:[#allocation2 + $0x2d0] sm:$0xff] }
 0x178   :  { %v1213_v51 = vadd.f32 %v1212_v41, %v1100_v2  ;;  %1036 = vmatmul.f32.gmra.mxu0 %v138_v63  ;;  %1309 = vmatpush.msra.mxu3 %v188_v36  ;;  %v145_v2 = vld [vmem:[#allocation2 + $0x2e0] sm:$0xff]  ;;  %v152_v36 = vld [vmem:[#allocation2 + $0x318] sm:$0xff] }
 0x179   :  { %v876_v52 = vpop.f32.mrf.mxu3 }
 0x17a   :  { %v2220_v57 = vadd.f32 %v3266_v19, %v1213_v51  ;;  %v877_v49 = vadd.f32 %v876_v52, %v3089_v58  ;;  %v1215_v9 = vpop.f32.mrf.mxu2  ;;  %1149 = vmatmul.f32.gmra.mxu1 %v139_v14  ;;  %v148_v14 = vld [vmem:[#allocation2 + $0x2f8] sm:$0xff]  ;;  %v146_v52 = vld [vmem:[#allocation2 + $0x2e8] sm:$0xff] }
 0x17c   :  { %2316 = vst [vmem:[#allocation7 + $0x60] sm:$0xff] %v2220_v57  ;;  %v990_v12 = vadd.f32 %v989_v30, %v877_v49  ;;  %v236_v49 = vld [vmem:[#allocation5 + $0x1b8] sm:$0xff] }
 0x17d   :  { %v992_v43 = vpop.f32.mrf.mxu0  ;;  %1422 = vmatpush.msra.mxu0 %v236_v49  ;;  %v329_v49 = vld [vmem:[#allocation5 + $0x4a0] sm:$0xff] }
 0x17e   :  { %v1103_v59 = vadd.f32 %v1102_v35, %v990_v12  ;;  %926 = vmatmul.f32.gmra.mxu3 %v141_v26  ;;  %v332_v35 = vld [vmem:[#allocation5 + $0x4b8] sm:$0xff]  ;;  %v147_v26 = vld [vmem:[#allocation2 + $0x2f0] sm:$0xff] }
 0x17f   :  { %1265 = vmatmul.f32.gmra.mxu2 %v144_v38  ;;  %v1105_v41 = vpop.f32.mrf.mxu1 }
 0x180   :  { %v1216_v33 = vadd.f32 %v1215_v9, %v1103_v59  ;;  %1039 = vmatmul.f32.gmra.mxu0 %v142_v21  ;;  %1648 = vmatpush.msra.mxu2 %v332_v35  ;;  %v149_v21 = vld [vmem:[#allocation2 + $0x300] sm:$0xff] }
 0x181   :  { %v879_v58 = vpop.f32.mrf.mxu3 }
 0x182   :  { %v2223_v48 = vadd.f32 %v3266_v19, %v1216_v33  ;;  %v880_v63 = vadd.f32 %v879_v58, %v3105_v0  ;;  %v1218_v30 = vpop.f32.mrf.mxu2  ;;  %1152 = vmatmul.f32.gmra.mxu1 %v143_v32  ;;  %v150_v33 = vld [vmem:[#allocation2 + $0x308] sm:$0xff]  ;;  %1649 = vmatpush.msra.mxu2 %v329_v49 }
 0x184   :  { %2319 = vst [vmem:[#allocation7 + $0x78] sm:$0xff] %v2223_v48  ;;  %v993_v24 = vadd.f32 %v992_v43, %v880_v63  ;;  %v185_v48 = vld [vmem:[#allocation5 + $0x20] sm:$0xff] }
 0x185   :  { %v995_v51 = vpop.f32.mrf.mxu0  ;;  %1310 = vmatpush.msra.mxu3 %v185_v48 }
 0x186   :  { %v1106_v57 = vadd.f32 %v1105_v41, %v993_v24  ;;  %929 = vmatmul.f32.gmra.mxu3 %v145_v2  ;;  %v284_v41 = vld [vmem:[#allocation5 + $0x338] sm:$0xff] }
 0x187   :  { %1268 = vmatmul.f32.gmra.mxu2 %v148_v14  ;;  %v1108_v9 = vpop.f32.mrf.mxu1  ;;  %1535 = vmatpush.msra.mxu1 %v284_v41  ;;  %v157_v41 = vld [vmem:[#allocation2 + $0x340] sm:$0xff] }
 0x188   :  { %v1219_v12 = vadd.f32 %v1218_v30, %v1106_v57  ;;  %1042 = vmatmul.f32.gmra.mxu0 %v146_v52  ;;  %v151_v30 = vld [vmem:[#allocation2 + $0x310] sm:$0xff]  ;;  %v156_v57 = vld [vmem:[#allocation2 + $0x338] sm:$0xff] }
 0x189   :  { %v882_v0 = vpop.f32.mrf.mxu3 }
 0x18a   :  { %v2226_v38 = vadd.f32 %v3266_v19, %v1219_v12  ;;  %v883_v8 = vadd.f32 %v882_v0, %v3121_v7  ;;  %v1221_v43 = vpop.f32.mrf.mxu2  ;;  %1155 = vmatmul.f32.gmra.mxu1 %v147_v26  ;;  %v154_v26 = vld [vmem:[#allocation2 + $0x328] sm:$0xff]  ;;  %v233_v0 = vld [vmem:[#allocation5 + $0x1a0] sm:$0xff] }
 0x18b   :  { %1423 = vmatpush.msra.mxu0 %v233_v0  ;;  %v162_v0 = vld [vmem:[#allocation2 + $0x368] sm:$0xff] }
 0x18c   :  { %2322 = vst [vmem:[#allocation7 + $0x90] sm:$0xff] %v2226_v38  ;;  %v996_v59 = vadd.f32 %v995_v51, %v883_v8  ;;  %v153_v51 = vld [vmem:[#allocation2 + $0x320] sm:$0xff]  ;;  %v155_v8 = vld [vmem:[#allocation2 + $0x330] sm:$0xff] }
 0x18d   :  { %v998_v32 = vpop.f32.mrf.mxu0 }
 0x18e   :  { %v1109_v58 = vadd.f32 %v1108_v9, %v996_v59  ;;  %932 = vmatmul.f32.gmra.mxu3 %v149_v21 }
 0x18f   :  { %1271 = vmatmul.f32.gmra.mxu2 %v152_v36  ;;  %v1111_v63 = vpop.f32.mrf.mxu1 }
 0x190   :  { %v1222_v2 = vadd.f32 %v1221_v43, %v1109_v58  ;;  %1045 = vmatmul.f32.gmra.mxu0 %v150_v33  ;;  %v160_v33 = vld [vmem:[#allocation2 + $0x358] sm:$0xff]  ;;  %v281_v58 = vld [vmem:[#allocation5 + $0x320] sm:$0xff] }
 0x191   :  { %v885_v7 = vpop.f32.mrf.mxu3  ;;  %1536 = vmatpush.msra.mxu1 %v281_v58  ;;  %v168_v58 = vld [vmem:[#allocation2 + $0x398] sm:$0xff] }
 0x192   :  { %v2229_v24 = vadd.f32 %v3266_v19, %v1222_v2  ;;  %v886_v14 = vadd.f32 %v885_v7, %v3134_v20  ;;  %v1224_v35 = vpop.f32.mrf.mxu2  ;;  %1158 = vmatmul.f32.gmra.mxu1 %v151_v30  ;;  %v182_v2 = vld [vmem:[#allocation5 + $0x8] sm:$0xff] }
 0x193   :  { %1311 = vmatpush.msra.mxu3 %v182_v2 }
 0x194   :  { %2325 = vst [vmem:[#allocation7 + $0xa8] sm:$0xff] %v2229_v24  ;;  %v999_v52 = vadd.f32 %v998_v32, %v886_v14  ;;  %v159_v24 = vld [vmem:[#allocation2 + $0x350] sm:$0xff] }
 0x195   :  { %v1001_v9 = vpop.f32.mrf.mxu0 }
 0x196   :  { %v1112_v12 = vadd.f32 %v1111_v63, %v999_v52  ;;  %935 = vmatmul.f32.gmra.mxu3 %v153_v51  ;;  %v158_v63 = vld [vmem:[#allocation2 + $0x348] sm:$0xff] }
 0x197   :  { %1274 = vmatmul.f32.gmra.mxu2 %v156_v57  ;;  %v1114_v38 = vpop.f32.mrf.mxu1  ;;  %v161_v57 = vld [vmem:[#allocation2 + $0x360] sm:$0xff] }
 0x198   :  { %v1225_v43 = vadd.f32 %v1224_v35, %v1112_v12  ;;  %1048 = vmatmul.f32.gmra.mxu0 %v154_v26  ;;  %v326_v26 = vld [vmem:[#allocation5 + $0x488] sm:$0xff] }
 0x199   :  { %v888_v20 = vpop.f32.mrf.mxu3  ;;  %1650 = vmatpush.msra.mxu2 %v326_v26  ;;  %v372_v26 = vld [vmem:[#allocation5 + $0x5f8] sm:$0xff] }
 0x19a   :  { %v2232_v21 = vadd.f32 %v3266_v19, %v1225_v43  ;;  %v889_v59 = vadd.f32 %v888_v20, %v3142_v37  ;;  %v1227_v36 = vpop.f32.mrf.mxu2  ;;  %1161 = vmatmul.f32.gmra.mxu1 %v155_v8  ;;  %v230_v8 = vld [vmem:[#allocation5 + $0x188] sm:$0xff]  ;;  %v163_v20 = vld [vmem:[#allocation2 + $0x370] sm:$0xff] }
 0x19b   :  { %1424 = vmatpush.msra.mxu0 %v230_v8  ;;  %2087 = vmatpush.msrb.mxu2 %v372_v26  ;;  %v276_v8 = vld [vmem:[#allocation5 + $0x2f8] sm:$0xff]  ;;  %v178_v26 = vld [vmem:[#allocation2 + $0x3e8] sm:$0xff] }
 0x19c   :  { %2328 = vst [vmem:[#allocation7 + $0xc0] sm:$0xff] %v2232_v21  ;;  %v1002_v32 = vadd.f32 %v1001_v9, %v889_v59  ;;  %v164_v9 = vld [vmem:[#allocation2 + $0x378] sm:$0xff] }
 0x19d   :  { %v1004_v48 = vpop.f32.mrf.mxu0  ;;  %1861 = vmatpush.msrb.mxu0 %v276_v8  ;;  %v179_v8 = vld [vmem:[#allocation2 + $0x3f0] sm:$0xff] }
 0x19e   :  { %v1115_v30 = vadd.f32 %v1114_v38, %v1002_v32  ;;  %938 = vmatmul.f32.gmra.mxu3 %v157_v41  ;;  %v165_v32 = vld [vmem:[#allocation2 + $0x380] sm:$0xff] }
 0x19f   :  { %1277 = vmatmul.f32.gmra.mxu2 %v160_v33  ;;  %v1117_v7 = vpop.f32.mrf.mxu1 }
 0x1a0   :  { %v1228_v14 = vadd.f32 %v1227_v36, %v1115_v30  ;;  %1051 = vmatmul.f32.gmra.mxu0 %v158_v63  ;;  %v166_v30 = vld [vmem:[#allocation2 + $0x388] sm:$0xff] }
 0x1a1   :  { %v891_v37 = vpop.f32.mrf.mxu3 }
 0x1a2   :  { %v2235_v35 = vadd.f32 %v3266_v19, %v1228_v14  ;;  %v892_v51 = vadd.f32 %v891_v37, %v3150_v56  ;;  %v1230_v52 = vpop.f32.mrf.mxu2  ;;  %1164 = vmatmul.f32.gmra.mxu1 %v159_v24  ;;  %v167_v14 = vld [vmem:[#allocation2 + $0x390] sm:$0xff] }
 0x1a4   :  { %2331 = vst [vmem:[#allocation7 + $0xd8] sm:$0xff] %v2235_v35  ;;  %v1005_v49 = vadd.f32 %v1004_v48, %v892_v51  ;;  %v278_v48 = vld [vmem:[#allocation5 + $0x308] sm:$0xff] }
 0x1a5   :  { %v1007_v12 = vpop.f32.mrf.mxu0  ;;  %1537 = vmatpush.msra.mxu1 %v278_v48 }
 0x1a6   :  { %v1118_v38 = vadd.f32 %v1117_v7, %v1005_v49  ;;  %941 = vmatmul.f32.gmra.mxu3 %v161_v57  ;;  %v228_v7 = vld [vmem:[#allocation5 + $0x178] sm:$0xff]  ;;  %v169_v57 = vld [vmem:[#allocation2 + $0x3a0] sm:$0xff] }
 0x1a7   :  { %1280 = vmatmul.f32.gmra.mxu2 %v164_v9  ;;  %v1120_v43 = vpop.f32.mrf.mxu1  ;;  %1748 = vmatpush.msrb.mxu3 %v228_v7  ;;  %v172_v9 = vld [vmem:[#allocation2 + $0x3b8] sm:$0xff] }
 0x1a8   :  { %v1231_v21 = vadd.f32 %v1230_v52, %v1118_v38  ;;  %1054 = vmatmul.f32.gmra.mxu0 %v162_v0  ;;  %v170_v0 = vld [vmem:[#allocation2 + $0x3a8] sm:$0xff] }
 0x1a9   :  { %v894_v56 = vpop.f32.mrf.mxu3 }
 0x1aa   :  { %v2238_v59 = vadd.f32 %v3266_v19, %v1231_v21  ;;  %v895_v36 = vadd.f32 %v894_v56, %v3158_v15  ;;  %v1233_v41 = vpop.f32.mrf.mxu2  ;;  %1167 = vmatmul.f32.gmra.mxu1 %v163_v20  ;;  %v171_v20 = vld [vmem:[#allocation2 + $0x3b0] sm:$0xff] }
 0x1ac   :  { %2334 = vst [vmem:[#allocation7 + $0xf0] sm:$0xff] %v2238_v59  ;;  %v1008_v33 = vadd.f32 %v1007_v12, %v895_v36 }
 0x1ad   :  { %v1010_v63 = vpop.f32.mrf.mxu0 }
 0x1ae   :  { %v1121_v2 = vadd.f32 %v1120_v43, %v1008_v33  ;;  %944 = vmatmul.f32.gmra.mxu3 %v165_v32  ;;  %v176_v33 = vld [vmem:[#allocation2 + $0x3d8] sm:$0xff] }
 0x1af   :  { %1283 = vmatmul.f32.gmra.mxu2 %v168_v58  ;;  %v1123_v24 = vpop.f32.mrf.mxu1  ;;  %v324_v58 = vld [vmem:[#allocation5 + $0x478] sm:$0xff] }
 0x1b0   :  { %v1234_v37 = vadd.f32 %v1233_v41, %v1121_v2  ;;  %1057 = vmatmul.f32.gmra.mxu0 %v166_v30  ;;  %v173_v41 = vld [vmem:[#allocation2 + $0x3c0] sm:$0xff]  ;;  %1974 = vmatpush.msrb.mxu1 %v324_v58  ;;  %v2527_v58 = vld [vmem:[#allocation2 + $0x18] sm:$0xff] }
 0x1b1   :  { %v897_v15 = vpop.f32.mrf.mxu3  ;;  %v225_v2 = vld [vmem:[#allocation5 + $0x160] sm:$0xff] }
 0x1b2   :  { %v2241_v35 = vadd.f32 %v3266_v19, %v1234_v37  ;;  %v898_v51 = vadd.f32 %v897_v15, %v3166_v44  ;;  %v1236_v52 = vpop.f32.mrf.mxu2  ;;  %1170 = vmatmul.f32.gmra.mxu1 %v167_v14  ;;  %1749 = vmatpush.msrb.mxu3 %v225_v2 }
 0x1b4   :  { %2337 = vst [vmem:[#allocation7 + $0x108] sm:$0xff] %v2241_v35  ;;  %v1011_v49 = vadd.f32 %v1010_v63, %v898_v51  ;;  %v174_v63 = vld [vmem:[#allocation2 + $0x3c8] sm:$0xff]  ;;  %v177_v51 = vld [vmem:[#allocation2 + $0x3e0] sm:$0xff] }
 0x1b5   :  { %v1013_v12 = vpop.f32.mrf.mxu0 }
 0x1b6   :  { %v1124_v38 = vadd.f32 %v1123_v24, %v1011_v49  ;;  %947 = vmatmul.f32.gmra.mxu3 %v169_v57  ;;  %v175_v24 = vld [vmem:[#allocation2 + $0x3d0] sm:$0xff]  ;;  %v180_v57 = vld [vmem:[#allocation2 + $0x3f8] sm:$0xff]  ;;  %v369_v49 = vld [vmem:[#allocation5 + $0x5e0] sm:$0xff] }
 0x1b7   :  { %1286 = vmatmul.f32.gmra.mxu2 %v172_v9  ;;  %v1126_v43 = vpop.f32.mrf.mxu1 }
 0x1b8   :  { %v1237_v21 = vadd.f32 %v1236_v52, %v1124_v38  ;;  %1060 = vmatmul.f32.gmra.mxu0 %v170_v0  ;;  %2088 = vmatpush.msrb.mxu2 %v369_v49  ;;  %v273_v0 = vld [vmem:[#allocation5 + $0x2e0] sm:$0xff] }
 0x1b9   :  { %v900_v44 = vpop.f32.mrf.mxu3  ;;  %1862 = vmatpush.msrb.mxu0 %v273_v0 }
 0x1ba   :  { %v2244_v56 = vadd.f32 %v3266_v19, %v1237_v21  ;;  %v901_v59 = vadd.f32 %v900_v44, %v3174_v18  ;;  %v1239_v36 = vpop.f32.mrf.mxu2  ;;  %1173 = vmatmul.f32.gmra.mxu1 %v171_v20 }
 0x1bc   :  { %2340 = vst [vmem:[#allocation7 + $0x120] sm:$0xff] %v2244_v56  ;;  %v1014_v32 = vadd.f32 %v1013_v12, %v901_v59  ;;  %v321_v59 = vld [vmem:[#allocation5 + $0x460] sm:$0xff] }
 0x1bd   :  { %v1016_v48 = vpop.f32.mrf.mxu0  ;;  %1975 = vmatpush.msrb.mxu1 %v321_v59  ;;  %v2535_v59 = vld [vmem:[#allocation2 + $0x58] sm:$0xff] }
 0x1be   :  { %v1127_v30 = vadd.f32 %v1126_v43, %v1014_v32  ;;  %950 = vmatmul.f32.gmra.mxu3 %v173_v41  ;;  %v2526_v32 = vld [vmem:[#allocation2] sm:$0xff] }
 0x1bf   :  { %1289 = vmatmul.f32.gmra.mxu2 %v176_v33  ;;  %v1129_v7 = vpop.f32.mrf.mxu1  ;;  %v222_v33 = vld [vmem:[#allocation5 + $0x148] sm:$0xff] }
 0x1c0   :  { %v1240_v14 = vadd.f32 %v1239_v36, %v1127_v30  ;;  %1063 = vmatmul.f32.gmra.mxu0 %v174_v63  ;;  %1750 = vmatpush.msrb.mxu3 %v222_v33  ;;  %v2528_v30 = vld [vmem:[#allocation2 + $0x8] sm:$0xff] }
 0x1c1   :  { %v903_v18 = vpop.f32.mrf.mxu3 }
 0x1c2   :  { %v2247_v37 = vadd.f32 %v3266_v19, %v1240_v14  ;;  %v904_v15 = vadd.f32 %v903_v18, %v3182_v5  ;;  %v1242_v35 = vpop.f32.mrf.mxu2  ;;  %1176 = vmatmul.f32.gmra.mxu1 %v175_v24  ;;  %v2529_v14 = vld [vmem:[#allocation2 + $0x10] sm:$0xff] }
 0x1c4   :  { %2343 = vst [vmem:[#allocation7 + $0x138] sm:$0xff] %v2247_v37  ;;  %v1017_v52 = vadd.f32 %v1016_v48, %v904_v15  ;;  %v366_v37 = vld [vmem:[#allocation5 + $0x5c8] sm:$0xff] }
 0x1c5   :  { %v1019_v9 = vpop.f32.mrf.mxu0  ;;  %2089 = vmatpush.msrb.mxu2 %v366_v37 }
 0x1c6   :  { %v1130_v12 = vadd.f32 %v1129_v7, %v1017_v52  ;;  %953 = vmatmul.f32.gmra.mxu3 %v177_v51  ;;  %v2530_v51 = vld [vmem:[#allocation2 + $0x20] sm:$0xff]  ;;  %v270_v52 = vld [vmem:[#allocation5 + $0x2c8] sm:$0xff] }
 0x1c7   :  { %1292 = vmatmul.f32.gmra.mxu2 %v180_v57  ;;  %v1132_v38 = vpop.f32.mrf.mxu1  ;;  %v2531_v57 = vld [vmem:[#allocation2 + $0x38] sm:$0xff]  ;;  %1863 = vmatpush.msrb.mxu0 %v270_v52 }
 0x1c8   :  { %v1243_v43 = vadd.f32 %v1242_v35, %v1130_v12  ;;  %1066 = vmatmul.f32.gmra.mxu0 %v178_v26  ;;  %v2532_v26 = vld [vmem:[#allocation2 + $0x28] sm:$0xff] }
 0x1c9   :  { %v906_v5 = vpop.f32.mrf.mxu3 }
 0x1ca   :  { %v2250_v20 = vadd.f32 %v3266_v19, %v1243_v43  ;;  %v907_v21 = vadd.f32 %v906_v5, %v3190_v22  ;;  %v1245_v44 = vpop.f32.mrf.mxu2  ;;  %1179 = vmatmul.f32.gmra.mxu1 %v179_v8  ;;  %v2533_v8 = vld [vmem:[#allocation2 + $0x30] sm:$0xff]  ;;  %v318_v5 = vld [vmem:[#allocation5 + $0x448] sm:$0xff] }
 0x1cb   :  { %1976 = vmatpush.msrb.mxu1 %v318_v5 }
 0x1cc   :  { %2346 = vst [vmem:[#allocation7 + $0x150] sm:$0xff] %v2250_v20  ;;  %v1020_v56 = vadd.f32 %v1019_v9, %v907_v21 }
 0x1cd   :  { %v1022_v36 = vpop.f32.mrf.mxu0 }
 0x1ce   :  { %v1133_v41 = vadd.f32 %v1132_v38, %v1020_v56  ;;  %1312 = vmatmul.f32.vlgmr.msra.gmra.mxu3 %v2526_v32  ;;  %v219_v56 = vld [vmem:[#allocation5 + $0x130] sm:$0xff]  ;;  %v2536_v32 = vld [vmem:[#allocation2 + $0x48] sm:$0xff] }
 0x1cf   :  { %1651 = vmatmul.f32.vlgmr.msra.gmra.mxu2 %v2527_v58  ;;  %v1135_v48 = vpop.f32.mrf.mxu1  ;;  %1751 = vmatpush.msrb.mxu3 %v219_v56 }
 0x1d0   :  { %v1246_v63 = vadd.f32 %v1245_v44, %v1133_v41  ;;  %1425 = vmatmul.f32.vlgmr.msra.gmra.mxu0 %v2528_v30  ;;  %v2534_v44 = vld [vmem:[#allocation2 + $0x40] sm:$0xff] }
 0x1d1   :  { %v909_v2 = vpop.f32.mrf.mxu3 }
 0x1d2   :  { %v2253_v22 = vadd.f32 %v3266_v19, %v1246_v63  ;;  %v910_v7 = vadd.f32 %v909_v2, %v3198_v6  ;;  %v1248_v24 = vpop.f32.mrf.mxu2  ;;  %1538 = vmatmul.f32.vlgmr.msra.gmra.mxu1 %v2529_v14  ;;  %v2537_v63 = vld [vmem:[#allocation2 + $0x50] sm:$0xff] }
 0x1d3   :  { %v363_v2 = vld [vmem:[#allocation5 + $0x5b0] sm:$0xff] }
 0x1d4   :  { %2349 = vst [vmem:[#allocation7 + $0x168] sm:$0xff] %v2253_v22  ;;  %v1023_v18 = vadd.f32 %v1022_v36, %v910_v7  ;;  %2090 = vmatpush.msrb.mxu2 %v363_v2  ;;  %v267_v14 = vld [vmem:[#allocation5 + $0x2b0] sm:$0xff]  ;;  %v2548_v2 = vld [vmem:[#allocation2 + $0xa8] sm:$0xff] }
 0x1d5   :  { %v1025_v15 = vpop.f32.mrf.mxu0  ;;  %1864 = vmatpush.msrb.mxu0 %v267_v14  ;;  %v2549_v14 = vld [vmem:[#allocation2 + $0xb0] sm:$0xff] }
 0x1d6   :  { %v1136_v35 = vadd.f32 %v1135_v48, %v1023_v18  ;;  %1315 = vmatmul.f32.gmra.mxu3 %v2530_v51  ;;  %v2539_v18 = vld [vmem:[#allocation2 + $0x78] sm:$0xff] }
 0x1d7   :  { %1654 = vmatmul.f32.gmra.mxu2 %v2531_v57  ;;  %v1138_v49 = vpop.f32.mrf.mxu1 }
 0x1d8   :  { %v1249_v9 = vadd.f32 %v1248_v24, %v1136_v35  ;;  %1428 = vmatmul.f32.gmra.mxu0 %v2532_v26  ;;  %v2538_v24 = vld [vmem:[#allocation2 + $0x60] sm:$0xff]  ;;  %v2540_v35 = vld [vmem:[#allocation2 + $0x68] sm:$0xff]  ;;  %v315_v26 = vld [vmem:[#allocation5 + $0x430] sm:$0xff] }
 0x1d9   :  { %v912_v6 = vpop.f32.mrf.mxu3  ;;  %1977 = vmatpush.msrb.mxu1 %v315_v26 }
 0x1da   :  { %v2256_v12 = vadd.f32 %v3266_v19, %v1249_v9  ;;  %v913_v0 = vadd.f32 %v912_v6, %v3206_v50  ;;  %v1251_v38 = vpop.f32.mrf.mxu2  ;;  %1541 = vmatmul.f32.gmra.mxu1 %v2533_v8  ;;  %v2543_v8 = vld [vmem:[#allocation2 + $0x98] sm:$0xff] }
 0x1dc   :  { %2352 = vst [vmem:[#allocation7 + $0x180] sm:$0xff] %v2256_v12  ;;  %v1026_v43 = vadd.f32 %v1025_v15, %v913_v0  ;;  %v2542_v0 = vld [vmem:[#allocation2 + $0x80] sm:$0xff] }
 0x1dd   :  { %v1028_v20 = vpop.f32.mrf.mxu0 }
 0x1de   :  { %v1139_v21 = vadd.f32 %v1138_v49, %v1026_v43  ;;  %1318 = vmatmul.f32.gmra.mxu3 %v2534_v44  ;;  %v2541_v49 = vld [vmem:[#allocation2 + $0x70] sm:$0xff] }
 0x1df   :  { %1657 = vmatmul.f32.gmra.mxu2 %v2535_v59  ;;  %v1141_v36 = vpop.f32.mrf.mxu1  ;;  %v2545_v59 = vld [vmem:[#allocation2 + $0x90] sm:$0xff] }
 0x1e0   :  { %v1252_v41 = vadd.f32 %v1251_v38, %v1139_v21  ;;  %1431 = vmatmul.f32.gmra.mxu0 %v2536_v32  ;;  %v216_v38 = vld [vmem:[#allocation5 + $0x118] sm:$0xff] }
 0x1e1   :  { %v915_v50 = vpop.f32.mrf.mxu3  ;;  %1752 = vmatpush.msrb.mxu3 %v216_v38 }
 0x1e2   :  { %v2259_v33 = vadd.f32 %v3266_v19, %v1252_v41  ;;  %v916_v58 = vadd.f32 %v915_v50, %v3214_v31  ;;  %v1254_v48 = vpop.f32.mrf.mxu2  ;;  %1544 = vmatmul.f32.gmra.mxu1 %v2537_v63  ;;  %v360_v41 = vld [vmem:[#allocation5 + $0x598] sm:$0xff] }
 0x1e3   :  { %2091 = vmatpush.msrb.mxu2 %v360_v41 }
 0x1e4   :  { %2355 = vst [vmem:[#allocation7 + $0x198] sm:$0xff] %v2259_v33  ;;  %v1029_v30 = vadd.f32 %v1028_v20, %v916_v58  ;;  %v2544_v20 = vld [vmem:[#allocation2 + $0x88] sm:$0xff]  ;;  %v2546_v33 = vld [vmem:[#allocation2 + $0xa0] sm:$0xff]  ;;  %v264_v58 = vld [vmem:[#allocation5 + $0x298] sm:$0xff] }
 0x1e5   :  { %v1031_v22 = vpop.f32.mrf.mxu0  ;;  %1865 = vmatpush.msrb.mxu0 %v264_v58  ;;  %v309_v58 = vld [vmem:[#allocation5 + $0x400] sm:$0xff] }
 0x1e6   :  { %v1142_v7 = vadd.f32 %v1141_v36, %v1029_v30  ;;  %1321 = vmatmul.f32.gmra.mxu3 %v2538_v24 }
 0x1e7   :  { %1660 = vmatmul.f32.gmra.mxu2 %v2539_v18  ;;  %v1144_v37 = vpop.f32.mrf.mxu1 }
 0x1e8   :  { %v1255_v15 = vadd.f32 %v1254_v48, %v1142_v7  ;;  %1434 = vmatmul.f32.gmra.mxu0 %v2540_v35  ;;  %v2547_v48 = vld [vmem:[#allocation2 + $0xb8] sm:$0xff] }
 0x1e9   :  { %v918_v31 = vpop.f32.mrf.mxu3 }
 0x1ea   :  { %v2262_v51 = vadd.f32 %v3266_v19, %v1255_v15  ;;  %v919_v52 = vadd.f32 %v918_v31, %v3222_v13  ;;  %v1257_v57 = vpop.f32.mrf.mxu2  ;;  %1547 = vmatmul.f32.gmra.mxu1 %v2541_v49  ;;  %v2550_v31 = vld [vmem:[#allocation2 + $0xc0] sm:$0xff] }
 0x1ec   :  { %2358 = vst [vmem:[#allocation7 + $0x1b0] sm:$0xff] %v2262_v51  ;;  %v1032_v9 = vadd.f32 %v1031_v22, %v919_v52  ;;  %v213_v51 = vld [vmem:[#allocation5 + $0x100] sm:$0xff]  ;;  %v2551_v52 = vld [vmem:[#allocation2 + $0xd8] sm:$0xff] }
 0x1ed   :  { %v1034_v6 = vpop.f32.mrf.mxu0  ;;  %1753 = vmatpush.msrb.mxu3 %v213_v51 }
 0x1ee   :  { %v1145_v12 = vadd.f32 %v1144_v37, %v1032_v9  ;;  %1324 = vmatmul.f32.gmra.mxu3 %v2542_v0  ;;  %v312_v37 = vld [vmem:[#allocation5 + $0x418] sm:$0xff]  ;;  %v2552_v9 = vld [vmem:[#allocation2 + $0xc8] sm:$0xff]  ;;  %v2553_v0 = vld [vmem:[#allocation2 + $0xd0] sm:$0xff] }
 0x1ef   :  { %1663 = vmatmul.f32.gmra.mxu2 %v2543_v8  ;;  %v1147_v43 = vpop.f32.mrf.mxu1  ;;  %1978 = vmatpush.msrb.mxu1 %v312_v37  ;;  %v357_v8 = vld [vmem:[#allocation5 + $0x580] sm:$0xff] }
 0x1f0   :  { %v1258_v5 = vadd.f32 %v1257_v57, %v1145_v12  ;;  %1437 = vmatmul.f32.gmra.mxu0 %v2544_v20  ;;  %2092 = vmatpush.msrb.mxu2 %v357_v8  ;;  %v2554_v20 = vld [vmem:[#allocation2 + $0xe0] sm:$0xff]  ;;  %v2565_v8 = vld [vmem:[#allocation2 + $0x130] sm:$0xff] }
 0x1f1   :  { %v921_v13 = vpop.f32.mrf.mxu3  ;;  %1979 = vmatpush.msrb.mxu1 %v309_v58 }
 0x1f2   :  { %v2265_v21 = vadd.f32 %v3266_v19, %v1258_v5  ;;  %v922_v44 = vadd.f32 %v921_v13, %v3230_v1  ;;  %v1260_v56 = vpop.f32.mrf.mxu2  ;;  %1550 = vmatmul.f32.gmra.mxu1 %v2545_v59  ;;  %v261_v13 = vld [vmem:[#allocation5 + $0x280] sm:$0xff]  ;;  %v2556_v59 = vld [vmem:[#allocation2 + $0xe8] sm:$0xff] }
 0x1f3   :  { %1866 = vmatpush.msrb.mxu0 %v261_v13 }
 0x1f4   :  { %2361 = vst [vmem:[#allocation7 + $0x1c8] sm:$0xff] %v2265_v21  ;;  %v1035_v36 = vadd.f32 %v1034_v6, %v922_v44  ;;  %v2555_v21 = vld [vmem:[#allocation2 + $0xf8] sm:$0xff] }
 0x1f5   :  { %v1037_v32 = vpop.f32.mrf.mxu0 }
 0x1f6   :  { %v1148_v50 = vadd.f32 %v1147_v43, %v1035_v36  ;;  %1327 = vmatmul.f32.gmra.mxu3 %v2546_v33 }
 0x1f7   :  { %1666 = vmatmul.f32.gmra.mxu2 %v2547_v48  ;;  %v1150_v63 = vpop.f32.mrf.mxu1 }
 0x1f8   :  { %v1261_v30 = vadd.f32 %v1260_v56, %v1148_v50  ;;  %1440 = vmatmul.f32.gmra.mxu0 %v2548_v2  ;;  %v2557_v50 = vld [vmem:[#allocation2 + $0xf0] sm:$0xff]  ;;  %v210_v2 = vld [vmem:[#allocation5 + $0xe8] sm:$0xff] }
 0x1f9   :  { %v924_v1 = vpop.f32.mrf.mxu3  ;;  %1754 = vmatpush.msrb.mxu3 %v210_v2  ;;  %v2570_v2 = vld [vmem:[#allocation2 + $0x160] sm:$0xff] }
 0x1fa   :  { %v2268_v22 = vadd.f32 %v3266_v19, %v1261_v30  ;;  %v925_v7 = vadd.f32 %v924_v1, %v3238_v42  ;;  %v1263_v24 = vpop.f32.mrf.mxu2  ;;  %1553 = vmatmul.f32.gmra.mxu1 %v2549_v14  ;;  %v2558_v30 = vld [vmem:[#allocation2 + $0x100] sm:$0xff]  ;;  %v2559_v1 = vld [vmem:[#allocation2 + $0x118] sm:$0xff] }
 0x1fc   :  { %2364 = vst [vmem:[#allocation7 + $0x1e0] sm:$0xff] %v2268_v22  ;;  %v1038_v18 = vadd.f32 %v1037_v32, %v925_v7 }
 0x1fd   :  { %v1040_v15 = vpop.f32.mrf.mxu0 }
 0x1fe   :  { %v1151_v35 = vadd.f32 %v1150_v63, %v1038_v18  ;;  %1330 = vmatmul.f32.gmra.mxu3 %v2550_v31  ;;  %v354_v31 = vld [vmem:[#allocation5 + $0x568] sm:$0xff] }
 0x1ff   :  { %1669 = vmatmul.f32.gmra.mxu2 %v2551_v52  ;;  %v1153_v57 = vpop.f32.mrf.mxu1 }
 0x200   :  { %v1264_v49 = vadd.f32 %v1263_v24, %v1151_v35  ;;  %1443 = vmatmul.f32.gmra.mxu0 %v2552_v9  ;;  %v2560_v24 = vld [vmem:[#allocation2 + $0x108] sm:$0xff]  ;;  %2093 = vmatpush.msrb.mxu2 %v354_v31  ;;  %v2563_v9 = vld [vmem:[#allocation2 + $0x138] sm:$0xff]  ;;  %v303_v31 = vld [vmem:[#allocation5 + $0x3d0] sm:$0xff] }
 0x201   :  { %v927_v42 = vpop.f32.mrf.mxu3 }
 0x202   :  { %v2271_v26 = vadd.f32 %v3266_v19, %v1264_v49  ;;  %v928_v6 = vadd.f32 %v927_v42, %v3246_v29  ;;  %v1266_v12 = vpop.f32.mrf.mxu2  ;;  %1556 = vmatmul.f32.gmra.mxu1 %v2553_v0  ;;  %v258_v49 = vld [vmem:[#allocation5 + $0x268] sm:$0xff] }
 0x203   :  { %1867 = vmatpush.msrb.mxu0 %v258_v49  ;;  %v204_v49 = vld [vmem:[#allocation5 + $0xb8] sm:$0xff] }
 0x204   :  { %2367 = vst [vmem:[#allocation7 + $0x1f8] sm:$0xff] %v2271_v26  ;;  %v1041_v38 = vadd.f32 %v1040_v15, %v928_v6  ;;  %v2561_v15 = vld [vmem:[#allocation2 + $0x110] sm:$0xff]  ;;  %v2564_v6 = vld [vmem:[#allocation2 + $0x128] sm:$0xff] }
 0x205   :  { %v1043_v43 = vpop.f32.mrf.mxu0 }
 0x206   :  { %v1154_v5 = vadd.f32 %v1153_v57, %v1041_v38  ;;  %1333 = vmatmul.f32.gmra.mxu3 %v2554_v20  ;;  %v2562_v57 = vld [vmem:[#allocation2 + $0x120] sm:$0xff] }
 0x207   :  { %1672 = vmatmul.f32.gmra.mxu2 %v2555_v21  ;;  %v1156_v44 = vpop.f32.mrf.mxu1  ;;  %v2566_v21 = vld [vmem:[#allocation2 + $0x140] sm:$0xff] }
 0x208   :  { %v1267_v56 = vadd.f32 %v1266_v12, %v1154_v5  ;;  %1446 = vmatmul.f32.gmra.mxu0 %v2556_v59  ;;  %v306_v5 = vld [vmem:[#allocation5 + $0x3e8] sm:$0xff] }
 0x209   :  { %v930_v29 = vpop.f32.mrf.mxu3  ;;  %1980 = vmatpush.msrb.mxu1 %v306_v5 }
 0x20a   :  { %v2274_v36 = vadd.f32 %v3266_v19, %v1267_v56  ;;  %v931_v41 = vadd.f32 %v930_v29, %v3254_v34  ;;  %v1269_v32 = vpop.f32.mrf.mxu2  ;;  %1559 = vmatmul.f32.gmra.mxu1 %v2557_v50  ;;  %v2567_v56 = vld [vmem:[#allocation2 + $0x158] sm:$0xff] }
 0x20b   :  { %1981 = vmatpush.msrb.mxu1 %v303_v31  ;;  %v3358_v31 = vld [vmem:[#allocation2 + $0x1e0] sm:$0xff] }
 0x20c   :  { %2370 = vst [vmem:[#allocation7 + $0x210] sm:$0xff] %v2274_v36  ;;  %v1044_v33 = vadd.f32 %v1043_v43, %v931_v41  ;;  %v2568_v36 = vld [vmem:[#allocation2 + $0x148] sm:$0xff] }
 0x20d   :  { %v1046_v48 = vpop.f32.mrf.mxu0 }
 0x20e   :  { %v1157_v63 = vadd.f32 %v1156_v44, %v1044_v33  ;;  %1336 = vmatmul.f32.gmra.mxu3 %v2558_v30  ;;  %v207_v44 = vld [vmem:[#allocation5 + $0xd0] sm:$0xff] }
 0x20f   :  { %1675 = vmatmul.f32.gmra.mxu2 %v2559_v1  ;;  %v1159_v22 = vpop.f32.mrf.mxu1  ;;  %1755 = vmatpush.msrb.mxu3 %v207_v44  ;;  %v2569_v33 = vld [vmem:[#allocation2 + $0x150] sm:$0xff]  ;;  %v3333_v44 = vld [vmem:[#allocation2 + $0x1b8] sm:$0xff] }
 0x210   :  { %v1270_v7 = vadd.f32 %v1269_v32, %v1157_v63  ;;  %1449 = vmatmul.f32.gmra.mxu0 %v2560_v24  ;;  %v255_v1 = vld [vmem:[#allocation5 + $0x250] sm:$0xff] }
 0x211   :  { %v933_v34 = vpop.f32.mrf.mxu3  ;;  %1868 = vmatpush.msrb.mxu0 %v255_v1  ;;  %1756 = vmatpush.msrb.mxu3 %v204_v49  ;;  %v3364_v49 = vld [vmem:[#allocation2 + $0x1e8] sm:$0xff] }
 0x212   :  { %v2277_v14 = vadd.f32 %v3266_v19, %v1270_v7  ;;  %v934_v18 = vadd.f32 %v933_v34, %v3017_v17  ;;  %v1272_v37 = vpop.f32.mrf.mxu2  ;;  %1562 = vmatmul.f32.gmra.mxu1 %v2561_v15  ;;  %v2572_v34 = vld [vmem:[#allocation2 + $0x168] sm:$0xff]  ;;  %v2573_v15 = vld [vmem:[#allocation2 + $0x170] sm:$0xff] }
 0x214   :  { %2373 = vst [vmem:[#allocation7 + $0x228] sm:$0xff] %v2277_v14  ;;  %v1047_v35 = vadd.f32 %v1046_v48, %v934_v18  ;;  %v351_v48 = vld [vmem:[#allocation5 + $0x550] sm:$0xff] }
 0x215   :  { %v1049_v51 = vpop.f32.mrf.mxu0  ;;  %2094 = vmatpush.msrb.mxu2 %v351_v48 }
 0x216   :  { %v1160_v52 = vadd.f32 %v1159_v22, %v1047_v35  ;;  %1339 = vmatmul.f32.gmra.mxu3 %v2562_v57  ;;  %v2571_v22 = vld [vmem:[#allocation2 + $0x178] sm:$0xff]  ;;  %v2574_v57 = vld [vmem:[#allocation2 + $0x180] sm:$0xff] }
 0x217   :  { %1678 = vmatmul.f32.gmra.mxu2 %v2563_v9  ;;  %v1162_v42 = vpop.f32.mrf.mxu1  ;;  %v2575_v9 = vld [vmem:[#allocation2 + $0x198] sm:$0xff] }
 0x218   :  { %v1273_v26 = vadd.f32 %v1272_v37, %v1160_v52  ;;  %1452 = vmatmul.f32.gmra.mxu0 %v2564_v6  ;;  %v3322_v6 = vld [vmem:[#allocation2 + $0x188] sm:$0xff] }
 0x219   :  { %v936_v17 = vpop.f32.mrf.mxu3 }
 0x21a   :  { %v2280_v12 = vadd.f32 %v3266_v19, %v1273_v26  ;;  %v937_v0 = vadd.f32 %v936_v17, %v3033_v28  ;;  %v1275_v38 = vpop.f32.mrf.mxu2  ;;  %1565 = vmatmul.f32.gmra.mxu1 %v2565_v8 }
 0x21c   :  { %2376 = vst [vmem:[#allocation7 + $0x240] sm:$0xff] %v2280_v12  ;;  %v1050_v43 = vadd.f32 %v1049_v51, %v937_v0 }
 0x21d   :  { %v1052_v20 = vpop.f32.mrf.mxu0 }
 0x21e   :  { %v1163_v13 = vadd.f32 %v1162_v42, %v1050_v43  ;;  %1342 = vmatmul.f32.gmra.mxu3 %v2566_v21  ;;  %v348_v43 = vld [vmem:[#allocation5 + $0x538] sm:$0xff] }
 0x21f   :  { %1681 = vmatmul.f32.gmra.mxu2 %v2567_v56  ;;  %v1165_v59 = vpop.f32.mrf.mxu1  ;;  %v252_v21 = vld [vmem:[#allocation5 + $0x238] sm:$0xff] }
 0x220   :  { %v1276_v29 = vadd.f32 %v1275_v38, %v1163_v13  ;;  %1455 = vmatmul.f32.gmra.mxu0 %v2568_v36  ;;  %v3327_v38 = vld [vmem:[#allocation2 + $0x190] sm:$0xff]  ;;  %2095 = vmatpush.msrb.mxu2 %v348_v43  ;;  %v3330_v13 = vld [vmem:[#allocation2 + $0x1a0] sm:$0xff] }
 0x221   :  { %v939_v28 = vpop.f32.mrf.mxu3  ;;  %1869 = vmatpush.msrb.mxu0 %v252_v21  ;;  %v3375_v21 = vld [vmem:[#allocation2 + $0x218] sm:$0xff] }
 0x222   :  { %v2283_v41 = vadd.f32 %v3266_v19, %v1276_v29  ;;  %v940_v32 = vadd.f32 %v939_v28, %v3049_v40  ;;  %v1278_v50 = vpop.f32.mrf.mxu2  ;;  %1568 = vmatmul.f32.gmra.mxu1 %v2569_v33  ;;  %v300_v33 = vld [vmem:[#allocation5 + $0x3b8] sm:$0xff] }
 0x223   :  { %1982 = vmatpush.msrb.mxu1 %v300_v33 }
 0x224   :  { %2379 = vst [vmem:[#allocation7 + $0x258] sm:$0xff] %v2283_v41  ;;  %v1053_v58 = vadd.f32 %v1052_v20, %v940_v32  ;;  %v3341_v32 = vld [vmem:[#allocation2 + $0x1b0] sm:$0xff] }
 0x225   :  { %v1055_v63 = vpop.f32.mrf.mxu0 }
 0x226   :  { %v1166_v30 = vadd.f32 %v1165_v59, %v1053_v58  ;;  %1345 = vmatmul.f32.gmra.mxu3 %v2570_v2  ;;  %v3336_v59 = vld [vmem:[#allocation2 + $0x1a8] sm:$0xff]  ;;  %v3347_v2 = vld [vmem:[#allocation2 + $0x1d8] sm:$0xff] }
 0x227   :  { %1684 = vmatmul.f32.gmra.mxu2 %v2571_v22  ;;  %v1168_v7 = vpop.f32.mrf.mxu1  ;;  %v3350_v22 = vld [vmem:[#allocation2 + $0x1c8] sm:$0xff] }
 0x228   :  { %v1279_v24 = vadd.f32 %v1278_v50, %v1166_v30  ;;  %1458 = vmatmul.f32.gmra.mxu0 %v2572_v34  ;;  %v201_v30 = vld [vmem:[#allocation5 + $0xa0] sm:$0xff] }
 0x229   :  { %v942_v40 = vpop.f32.mrf.mxu3  ;;  %1757 = vmatpush.msrb.mxu3 %v201_v30 }
 0x22a   :  { %v2286_v14 = vadd.f32 %v3266_v19, %v1279_v24  ;;  %v943_v18 = vadd.f32 %v942_v40, %v3065_v47  ;;  %v1281_v37 = vpop.f32.mrf.mxu2  ;;  %1571 = vmatmul.f32.gmra.mxu1 %v2573_v15 }
 0x22c   :  { %2382 = vst [vmem:[#allocation7 + $0x270] sm:$0xff] %v2286_v14  ;;  %v1056_v35 = vadd.f32 %v1055_v63, %v943_v18  ;;  %v3344_v63 = vld [vmem:[#allocation2 + $0x1c0] sm:$0xff]  ;;  %v3355_v14 = vld [vmem:[#allocation2 + $0x1d0] sm:$0xff] }
 0x22d   :  { %v1058_v51 = vpop.f32.mrf.mxu0 }
 0x22e   :  { %v1169_v52 = vadd.f32 %v1168_v7, %v1056_v35  ;;  %1348 = vmatmul.f32.gmra.mxu3 %v2574_v57 }
 0x22f   :  { %1687 = vmatmul.f32.gmra.mxu2 %v2575_v9  ;;  %v1171_v42 = vpop.f32.mrf.mxu1 }
 0x230   :  { %v1282_v26 = vadd.f32 %v1281_v37, %v1169_v52  ;;  %1461 = vmatmul.f32.gmra.mxu0 %v3322_v6  ;;  %v345_v37 = vld [vmem:[#allocation5 + $0x520] sm:$0xff]  ;;  %v3361_v52 = vld [vmem:[#allocation2 + $0x1f8] sm:$0xff] }
 0x231   :  { %v945_v47 = vpop.f32.mrf.mxu3  ;;  %2096 = vmatpush.msrb.mxu2 %v345_v37 }
 0x232   :  { %v2289_v17 = vadd.f32 %v3266_v19, %v1282_v26  ;;  %v946_v12 = vadd.f32 %v945_v47, %v3081_v55  ;;  %v1284_v0 = vpop.f32.mrf.mxu2  ;;  %1574 = vmatmul.f32.gmra.mxu1 %v3327_v38 }
 0x234   :  { %2385 = vst [vmem:[#allocation7 + $0x288] sm:$0xff] %v2289_v17  ;;  %v1059_v8 = vadd.f32 %v1058_v51, %v946_v12  ;;  %v249_v51 = vld [vmem:[#allocation5 + $0x220] sm:$0xff]  ;;  %v3369_v17 = vld [vmem:[#allocation2 + $0x1f0] sm:$0xff] }
 0x235   :  { %v1061_v5 = vpop.f32.mrf.mxu0  ;;  %1870 = vmatpush.msrb.mxu0 %v249_v51  ;;  %v3405_v51 = vld [vmem:[#allocation2 + $0x230] sm:$0xff] }
 0x236   :  { %v1172_v20 = vadd.f32 %v1171_v42, %v1059_v8  ;;  %1351 = vmatmul.f32.gmra.mxu3 %v3330_v13 }
 0x237   :  { %1690 = vmatmul.f32.gmra.mxu2 %v3333_v44  ;;  %v1174_v55 = vpop.f32.mrf.mxu1 }
 0x238   :  { %v1285_v56 = vadd.f32 %v1284_v0, %v1172_v20  ;;  %1464 = vmatmul.f32.gmra.mxu0 %v3336_v59  ;;  %v297_v0 = vld [vmem:[#allocation5 + $0x3a0] sm:$0xff]  ;;  %v198_v20 = vld [vmem:[#allocation5 + $0x88] sm:$0xff] }
 0x239   :  { %v948_v29 = vpop.f32.mrf.mxu3  ;;  %1983 = vmatpush.msrb.mxu1 %v297_v0  ;;  %1758 = vmatpush.msrb.mxu3 %v198_v20 }
 0x23a   :  { %v2292_v36 = vadd.f32 %v3266_v19, %v1285_v56  ;;  %v949_v28 = vadd.f32 %v948_v29, %v3097_v62  ;;  %v1287_v41 = vpop.f32.mrf.mxu2  ;;  %1577 = vmatmul.f32.gmra.mxu1 %v3341_v32  ;;  %v3378_v56 = vld [vmem:[#allocation2 + $0x208] sm:$0xff] }
 0x23c   :  { %2388 = vst [vmem:[#allocation7 + $0x2a0] sm:$0xff] %v2292_v36  ;;  %v1062_v50 = vadd.f32 %v1061_v5, %v949_v28  ;;  %v3372_v5 = vld [vmem:[#allocation2 + $0x200] sm:$0xff] }
 0x23d   :  { %v1064_v58 = vpop.f32.mrf.mxu0 }
 0x23e   :  { %v1175_v48 = vadd.f32 %v1174_v55, %v1062_v50  ;;  %1354 = vmatmul.f32.gmra.mxu3 %v3344_v63  ;;  %v3383_v50 = vld [vmem:[#allocation2 + $0x210] sm:$0xff] }
 0x23f   :  { %1693 = vmatmul.f32.gmra.mxu2 %v3347_v2  ;;  %v1177_v62 = vpop.f32.mrf.mxu1 }
 0x240   :  { %v1288_v1 = vadd.f32 %v1287_v41, %v1175_v48  ;;  %1467 = vmatmul.f32.gmra.mxu0 %v3350_v22 }
 0x241   :  { %v951_v7 = vpop.f32.mrf.mxu3 }
 0x242   :  { %v2295_v24 = vadd.f32 %v3266_v19, %v1288_v1  ;;  %v952_v34 = vadd.f32 %v951_v7, %v3113_v4  ;;  %v1290_v40 = vpop.f32.mrf.mxu2  ;;  %1580 = vmatmul.f32.gmra.mxu1 %v3355_v14  ;;  %v246_v1 = vld [vmem:[#allocation5 + $0x208] sm:$0xff]  ;;  %v3397_v7 = vld [vmem:[#allocation2 + $0x238] sm:$0xff] }
 0x243   :  { %1871 = vmatpush.msrb.mxu0 %v246_v1 }
 0x244   :  { %2391 = vst [vmem:[#allocation7 + $0x2b8] sm:$0xff] %v2295_v24  ;;  %v1065_v18 = vadd.f32 %v1064_v58, %v952_v34  ;;  %v342_v58 = vld [vmem:[#allocation5 + $0x508] sm:$0xff] }
 0x245   :  { %v1067_v15 = vpop.f32.mrf.mxu0  ;;  %2097 = vmatpush.msrb.mxu2 %v342_v58  ;;  %v3422_v58 = vld [vmem:[#allocation2 + $0x260] sm:$0xff] }
 0x246   :  { %v1178_v35 = vadd.f32 %v1177_v62, %v1065_v18  ;;  %1357 = vmatmul.f32.gmra.mxu3 %v3358_v31  ;;  %v3386_v62 = vld [vmem:[#allocation2 + $0x220] sm:$0xff] }
 0x247   :  { %1696 = vmatmul.f32.gmra.mxu2 %v3361_v52  ;;  %v1180_v4 = vpop.f32.mrf.mxu1 }
 0x248   :  { %v1291_v57 = vadd.f32 %v1290_v40, %v1178_v35  ;;  %1470 = vmatmul.f32.gmra.mxu0 %v3364_v49  ;;  %v3400_v40 = vld [vmem:[#allocation2 + $0x228] sm:$0xff] }
 0x249   :  { %v954_v9 = vpop.f32.mrf.mxu3 }
 0x24a   :  { %v2298_v42 = vadd.f32 %v3266_v19, %v1291_v57  ;;  %v955_v26 = vadd.f32 %v954_v9, %v3129_v11  ;;  %v1293_v47 = vpop.f32.mrf.mxu2  ;;  %1583 = vmatmul.f32.gmra.mxu1 %v3369_v17  ;;  %v294_v57 = vld [vmem:[#allocation5 + $0x388] sm:$0xff] }
 0x24b   :  { %1984 = vmatpush.msrb.mxu1 %v294_v57  ;;  %v291_v57 = vld [vmem:[#allocation5 + $0x370] sm:$0xff] }
 0x24c   :  { %2394 = vst [vmem:[#allocation7 + $0x2d0] sm:$0xff] %v2298_v42  ;;  %v1068_v12 = vadd.f32 %v1067_v15, %v955_v26  ;;  %v3408_v26 = vld [vmem:[#allocation2 + $0x240] sm:$0xff] }
 0x24d   :  { %v1426_v8 = vpop.f32.mrf.mxu0  ;;  %1985 = vmatpush.msrb.mxu1 %v291_v57 }
 0x24e   :  { %v1181_v43 = vadd.f32 %v1180_v4, %v1068_v12  ;;  %1360 = vmatmul.f32.gmra.mxu3 %v3372_v5  ;;  %v3411_v12 = vld [vmem:[#allocation2 + $0x258] sm:$0xff] }
 0x24f   :  { %1699 = vmatmul.f32.gmra.mxu2 %v3375_v21  ;;  %v1539_v11 = vpop.f32.mrf.mxu1 }
 0x250   :  { %v1294_v55 = vadd.f32 %v1293_v47, %v1181_v43  ;;  %1473 = vmatmul.f32.gmra.mxu0 %v3378_v56  ;;  %v195_v47 = vld [vmem:[#allocation5 + $0x70] sm:$0xff] }
 0x251   :  { %v1313_v29 = vpop.f32.mrf.mxu3  ;;  %1759 = vmatpush.msrb.mxu3 %v195_v47  ;;  %v3436_v47 = vld [vmem:[#allocation2 + $0x280] sm:$0xff] }
 0x252   :  { %v2301_v36 = vadd.f32 %v3266_v19, %v1294_v55  ;;  %v1314_v28 = vadd.f32 %v1313_v29, %v3014_v16  ;;  %v1652_v41 = vpop.f32.mrf.mxu2  ;;  %1586 = vmatmul.f32.gmra.mxu1 %v3383_v50  ;;  %v3392_v19 = vld [vmem:[%s3792_s4] sm:$0x7]  ;;  %v3419_v29 = vld [vmem:[#allocation2 + $0x250] sm:$0xff]  ;;  %s2789_s4 = smov [#allocation7]  }
 0x253   :  { %v3395_v16 = vperm.slane %v3392_v19, 1  ;;  %s2404_s25 = sshll.u32 %s2789_s4, 4  ;;  %s2405_s25 = int_to_ptr.vmem [resolvable:$true] %s2404_s25 }
 0x254   :  { %2397 = vst [vmem:[#allocation7 + $0x2e8] sm:$0xff] %v2301_v36  ;;  %v1427_v33 = vadd.f32 %v1426_v8, %v1314_v28  ;;  %v3414_v8 = vld [vmem:[#allocation2 + $0x248] sm:$0xff]  ;;  %v339_v28 = vld [vmem:[#allocation5 + $0x4f0] sm:$0xff] }
 0x255   :  { %v1429_v48 = vpop.f32.mrf.mxu0  ;;  %2098 = vmatpush.msrb.mxu2 %v339_v28 }
 0x256   :  { %v1540_v30 = vadd.f32 %v1539_v11, %v1427_v33  ;;  %1363 = vmatmul.f32.gmra.mxu3 %v3386_v62 }
 0x257   :  { %1702 = vmatmul.f32.gmra.mxu2 %v3397_v7  ;;  %v1542_v24 = vpop.f32.mrf.mxu1 }
 0x258   :  { %v1653_v34 = vadd.f32 %v1652_v41, %v1540_v30  ;;  %1476 = vmatmul.f32.gmra.mxu0 %v3400_v40  ;;  %v3425_v30 = vld [vmem:[#allocation2 + $0x278] sm:$0xff] }
 0x259   :  { %v1316_v18 = vpop.f32.mrf.mxu3 }
 0x25a   :  { %v2209_v37 = vadd.f32 %v3395_v16, %v1653_v34  ;;  %v1317_v15 = vadd.f32 %v1316_v18, %v3030_v27  ;;  %v1655_v35 = vpop.f32.mrf.mxu2  ;;  %1589 = vmatmul.f32.gmra.mxu1 %v3405_v51 }
 0x25c   :  { %2305 = vst [vmem:[#allocation7 + $0x8] sm:$0xff] %v2209_v37  ;;  %v1430_v4 = vadd.f32 %v1429_v48, %v1317_v15  ;;  %v243_v48 = vld [vmem:[#allocation5 + $0x1f0] sm:$0xff] }
 0x25d   :  { %v1432_v9 = vpop.f32.mrf.mxu0  ;;  %1872 = vmatpush.msrb.mxu0 %v243_v48  ;;  %v336_v48 = vld [vmem:[#allocation5 + $0x4d8] sm:$0xff] }
 0x25e   :  { %v1543_v42 = vadd.f32 %v1542_v24, %v1430_v4  ;;  %1366 = vmatmul.f32.gmra.mxu3 %v3408_v26  ;;  %v3428_v24 = vld [vmem:[#allocation2 + $0x268] sm:$0xff]  ;;  %2099 = vmatpush.msrb.mxu2 %v336_v48  ;;  %v3467_v48 = vld [vmem:[#allocation2 + $0x2d8] sm:$0xff] }
 0x25f   :  { %1705 = vmatmul.f32.gmra.mxu2 %v3411_v12  ;;  %v1545_v27 = vpop.f32.mrf.mxu1 }
 0x260   :  { %v1656_v0 = vadd.f32 %v1655_v35, %v1543_v42  ;;  %1479 = vmatmul.f32.gmra.mxu0 %v3414_v8  ;;  %v3433_v35 = vld [vmem:[#allocation2 + $0x270] sm:$0xff] }
 0x261   :  { %v1319_v43 = vpop.f32.mrf.mxu3 }
 0x262   :  { %v2212_v20 = vadd.f32 %v3395_v16, %v1656_v0  ;;  %v1320_v11 = vadd.f32 %v1319_v43, %v3046_v39  ;;  %v1658_v55 = vpop.f32.mrf.mxu2  ;;  %1592 = vmatmul.f32.gmra.mxu1 %v3419_v29  ;;  %v3439_v0 = vld [vmem:[#allocation2 + $0x298] sm:$0xff] }
 0x264   :  { %2308 = vst [vmem:[#allocation7 + $0x20] sm:$0xff] %v2212_v20  ;;  %v1433_v36 = vadd.f32 %v1432_v9, %v1320_v11  ;;  %v3442_v20 = vld [vmem:[#allocation2 + $0x288] sm:$0xff] }
 0x265   :  { %v1435_v41 = vpop.f32.mrf.mxu0 }
 0x266   :  { %v1546_v33 = vadd.f32 %v1545_v27, %v1433_v36  ;;  %1369 = vmatmul.f32.gmra.mxu3 %v3422_v58  ;;  %v192_v27 = vld [vmem:[#allocation5 + $0x58] sm:$0xff] }
 0x267   :  { %1708 = vmatmul.f32.gmra.mxu2 %v3425_v30  ;;  %v1548_v39 = vpop.f32.mrf.mxu1  ;;  %1760 = vmatpush.msrb.mxu3 %v192_v27 }
 0x268   :  { %v1659_v1 = vadd.f32 %v1658_v55, %v1546_v33  ;;  %1482 = vmatmul.f32.gmra.mxu0 %v3428_v24 }
 0x269   :  { %v1322_v34 = vpop.f32.mrf.mxu3 }
 0x26a   :  { %v2215_v18 = vadd.f32 %v3395_v16, %v1659_v1  ;;  %v1323_v37 = vadd.f32 %v1322_v34, %v3062_v46  ;;  %v1661_v15 = vpop.f32.mrf.mxu2  ;;  %1595 = vmatmul.f32.gmra.mxu1 %v3433_v35  ;;  %v3450_v34 = vld [vmem:[#allocation2 + $0x2a0] sm:$0xff] }
 0x26c   :  { %2311 = vst [vmem:[#allocation7 + $0x38] sm:$0xff] %v2215_v18  ;;  %v1436_v4 = vadd.f32 %v1435_v41, %v1323_v37  ;;  %v3447_v41 = vld [vmem:[#allocation2 + $0x290] sm:$0xff]  ;;  %v240_v18 = vld [vmem:[#allocation5 + $0x1d8] sm:$0xff] }
 0x26d   :  { %v1438_v9 = vpop.f32.mrf.mxu0  ;;  %v3453_v37 = vld [vmem:[#allocation2 + $0x2b8] sm:$0xff]  ;;  %1873 = vmatpush.msrb.mxu0 %v240_v18  ;;  %v3470_v18 = vld [vmem:[#allocation2 + $0x2c8] sm:$0xff] }
 0x26e   :  { %v1549_v42 = vadd.f32 %v1548_v39, %v1436_v4  ;;  %1372 = vmatmul.f32.gmra.mxu3 %v3436_v47  ;;  %v3456_v4 = vld [vmem:[#allocation2 + $0x2a8] sm:$0xff]  ;;  %3881 = vst [vmem:[#allocation62_spill] sm:$0xff] %v3470_v18 }
 0x26f   :  { %1711 = vmatmul.f32.gmra.mxu2 %v3439_v0  ;;  %v1551_v46 = vpop.f32.mrf.mxu1 }
 0x270   :  { %v1662_v43 = vadd.f32 %v1661_v15, %v1549_v42  ;;  %1485 = vmatmul.f32.gmra.mxu0 %v3442_v20 }
 0x271   :  { %v1325_v11 = vpop.f32.mrf.mxu3 }
 0x272   :  { %v2218_v55 = vadd.f32 %v3395_v16, %v1662_v43  ;;  %v1326_v36 = vadd.f32 %v1325_v11, %v3078_v54  ;;  %v1664_v28 = vpop.f32.mrf.mxu2  ;;  %1598 = vmatmul.f32.gmra.mxu1 %v3447_v41  ;;  %v288_v11 = vld [vmem:[#allocation5 + $0x358] sm:$0xff] }
 0x273   :  { %1986 = vmatpush.msrb.mxu1 %v288_v11 }
 0x274   :  { %2314 = vst [vmem:[#allocation7 + $0x50] sm:$0xff] %v2218_v55  ;;  %v1439_v33 = vadd.f32 %v1438_v9, %v1326_v36 }
 0x275   :  { %v1441_v39 = vpop.f32.mrf.mxu0 }
 0x276   :  { %v1552_v1 = vadd.f32 %v1551_v46, %v1439_v33  ;;  %1375 = vmatmul.f32.gmra.mxu3 %v3450_v34  ;;  %v3461_v46 = vld [vmem:[#allocation2 + $0x2b0] sm:$0xff]  ;;  %v189_v33 = vld [vmem:[#allocation5 + $0x40] sm:$0xff] }
 0x277   :  { %1714 = vmatmul.f32.gmra.mxu2 %v3453_v37  ;;  %v1554_v54 = vpop.f32.mrf.mxu1  ;;  %1761 = vmatpush.msrb.mxu3 %v189_v33  ;;  %v237_v33 = vld [vmem:[#allocation5 + $0x1c0] sm:$0xff] }
 0x278   :  { %v1665_v15 = vadd.f32 %v1664_v28, %v1552_v1  ;;  %1488 = vmatmul.f32.gmra.mxu0 %v3456_v4  ;;  %v3464_v28 = vld [vmem:[#allocation2 + $0x2c0] sm:$0xff] }
 0x279   :  { %v1328_v57 = vpop.f32.mrf.mxu3  ;;  %1874 = vmatpush.msrb.mxu0 %v237_v33  ;;  %v186_v33 = vld [vmem:[#allocation5 + $0x28] sm:$0xff] }
 0x27a   :  { %v2221_v9 = vadd.f32 %v3395_v16, %v1665_v15  ;;  %v1329_v42 = vadd.f32 %v1328_v57, %v3094_v61  ;;  %v1667_v27 = vpop.f32.mrf.mxu2  ;;  %1601 = vmatmul.f32.gmra.mxu1 %v3461_v46  ;;  %1762 = vmatpush.msrb.mxu3 %v186_v33  ;;  %v234_v33 = vld [vmem:[#allocation5 + $0x1a8] sm:$0xff] }
 0x27b   :  { %1875 = vmatpush.msrb.mxu0 %v234_v33  ;;  %v183_v33 = vld [vmem:[#allocation5 + $0x10] sm:$0xff] }
 0x27c   :  { %2317 = vst [vmem:[#allocation7 + $0x68] sm:$0xff] %v2221_v9  ;;  %v1442_v43 = vadd.f32 %v1441_v39, %v1329_v42  ;;  %v3475_v9 = vld [vmem:[#allocation2 + $0x2d0] sm:$0xff]  ;;  %1763 = vmatpush.msrb.mxu3 %v183_v33 }
 0x27d   :  { %v1444_v55 = vpop.f32.mrf.mxu0  ;;  %v231_v33 = vld [vmem:[#allocation5 + $0x190] sm:$0xff] }
 0x27e   :  { %v1555_v36 = vadd.f32 %v1554_v54, %v1442_v43  ;;  %1378 = vmatmul.f32.gmra.mxu3 %v3464_v28  ;;  %v333_v43 = vld [vmem:[#allocation5 + $0x4c0] sm:$0xff]  ;;  %1876 = vmatpush.msrb.mxu0 %v231_v33  ;;  %v3551_v33 = vld [vmem:[#allocation2 + $0x398] sm:$0xff] }
 0x27f   :  { %1717 = vmatmul.f32.gmra.mxu2 %v3467_v48  ;;  %v1557_v61 = vpop.f32.mrf.mxu1  ;;  %3902 = vst [vmem:[#allocation83_spill] sm:$0xff] %v3551_v33 }
 0x280   :  { %v1668_v1 = vadd.f32 %v1667_v27, %v1555_v36  ;;  %1491 = vmatmul.f32.gmra.mxu0 %v3470_v18  ;;  %2100 = vmatpush.msrb.mxu2 %v333_v43  ;;  %v3478_v36 = vld [vmem:[#allocation2 + $0x2e0] sm:$0xff]  ;;  %v3481_v18 = vld [vmem:[#allocation2 + $0x2f8] sm:$0xff] }
 0x281   :  { %v1331_v39 = vpop.f32.mrf.mxu3  ;;  %3882 = vst [vmem:[#allocation63_spill] sm:$0xff] %v3478_v36 }
 0x282   :  { %v2224_v15 = vadd.f32 %v3395_v16, %v1668_v1  ;;  %v1332_v54 = vadd.f32 %v1331_v39, %v3110_v3  ;;  %v1670_v57 = vpop.f32.mrf.mxu2  ;;  %1604 = vmatmul.f32.gmra.mxu1 %v3475_v9  ;;  %3883 = vst [vmem:[#allocation64_spill] sm:$0xff] %v3481_v18  ;;  %v3484_v39 = vld [vmem:[#allocation2 + $0x2e8] sm:$0xff] }
 0x283   :  { %3884 = vst [vmem:[#allocation65_spill] sm:$0xff] %v3484_v39 }
 0x284   :  { %2320 = vst [vmem:[#allocation7 + $0x80] sm:$0xff] %v2224_v15  ;;  %v1445_v42 = vadd.f32 %v1444_v55, %v1332_v54 }
 0x285   :  { %v1447_v11 = vpop.f32.mrf.mxu0 }
 0x286   :  { %v1558_v27 = vadd.f32 %v1557_v61, %v1445_v42  ;;  %1381 = vmatmul.f32.gmra.mxu3 %v3478_v36  ;;  %v3489_v42 = vld [vmem:[#allocation2 + $0x2f0] sm:$0xff] }
 0x287   :  { %1720 = vmatmul.f32.gmra.mxu2 %v3481_v18  ;;  %v1560_v3 = vpop.f32.mrf.mxu1  ;;  %v285_v18 = vld [vmem:[#allocation5 + $0x340] sm:$0xff] }
 0x288   :  { %v1671_v1 = vadd.f32 %v1670_v57, %v1558_v27  ;;  %1494 = vmatmul.f32.gmra.mxu0 %v3484_v39  ;;  %1987 = vmatpush.msrb.mxu1 %v285_v18  ;;  %v3492_v27 = vld [vmem:[#allocation2 + $0x300] sm:$0xff]  ;;  %v3495_v39 = vld [vmem:[#allocation2 + $0x318] sm:$0xff] }
 0x289   :  { %v1334_v55 = vpop.f32.mrf.mxu3  ;;  %3885 = vst [vmem:[#allocation66_spill] sm:$0xff] %v3492_v27 }
 0x28a   :  { %v2227_v15 = vadd.f32 %v3395_v16, %v1671_v1  ;;  %v1335_v61 = vadd.f32 %v1334_v55, %v3126_v10  ;;  %v1673_v54 = vpop.f32.mrf.mxu2  ;;  %1607 = vmatmul.f32.gmra.mxu1 %v3489_v42  ;;  %3886 = vst [vmem:[#allocation67_spill] sm:$0xff] %v3495_v39  ;;  %v3498_v55 = vld [vmem:[#allocation2 + $0x308] sm:$0xff] }
 0x28b   :  { %3887 = vst [vmem:[#allocation68_spill] sm:$0xff] %v3498_v55 }
 0x28c   :  { %2323 = vst [vmem:[#allocation7 + $0x98] sm:$0xff] %v2227_v15  ;;  %v1448_v43 = vadd.f32 %v1447_v11, %v1335_v61  ;;  %v3503_v61 = vld [vmem:[#allocation2 + $0x310] sm:$0xff] }
 0x28d   :  { %v1450_v36 = vpop.f32.mrf.mxu0  ;;  %3888 = vst [vmem:[#allocation69_spill] sm:$0xff] %v3503_v61 }
 0x28e   :  { %v1561_v57 = vadd.f32 %v1560_v3, %v1448_v43  ;;  %1384 = vmatmul.f32.gmra.mxu3 %v3492_v27 }
 0x28f   :  { %1723 = vmatmul.f32.gmra.mxu2 %v3495_v39  ;;  %v1563_v10 = vpop.f32.mrf.mxu1  ;;  %v330_v39 = vld [vmem:[#allocation5 + $0x4a8] sm:$0xff] }
 0x290   :  { %v1674_v1 = vadd.f32 %v1673_v54, %v1561_v57  ;;  %1497 = vmatmul.f32.gmra.mxu0 %v3498_v55  ;;  %2101 = vmatpush.msrb.mxu2 %v330_v39  ;;  %v3506_v57 = vld [vmem:[#allocation2 + $0x320] sm:$0xff]  ;;  %v3509_v55 = vld [vmem:[#allocation2 + $0x338] sm:$0xff] }
 0x291   :  { %v1337_v11 = vpop.f32.mrf.mxu3  ;;  %3889 = vst [vmem:[#allocation70_spill] sm:$0xff] %v3506_v57 }
 0x292   :  { %v2230_v18 = vadd.f32 %v3395_v16, %v1674_v1  ;;  %v1338_v3 = vadd.f32 %v1337_v11, %v3136_v23  ;;  %v1676_v15 = vpop.f32.mrf.mxu2  ;;  %1610 = vmatmul.f32.gmra.mxu1 %v3503_v61  ;;  %3890 = vst [vmem:[#allocation71_spill] sm:$0xff] %v3509_v55  ;;  %v3512_v11 = vld [vmem:[#allocation2 + $0x328] sm:$0xff]  ;;  %v2658_v61 = vld [vmem:[#allocation2 + $0x10] sm:$0xff] }
 0x293   :  { %3891 = vst [vmem:[#allocation72_spill] sm:$0xff] %v3512_v11 }
 0x294   :  { %2326 = vst [vmem:[#allocation7 + $0xb0] sm:$0xff] %v2230_v18  ;;  %v1451_v43 = vadd.f32 %v1450_v36, %v1338_v3  ;;  %v3517_v3 = vld [vmem:[#allocation2 + $0x330] sm:$0xff] }
 0x295   :  { %v1453_v27 = vpop.f32.mrf.mxu0  ;;  %3892 = vst [vmem:[#allocation73_spill] sm:$0xff] %v3517_v3 }
 0x296   :  { %v1564_v54 = vadd.f32 %v1563_v10, %v1451_v43  ;;  %1387 = vmatmul.f32.gmra.mxu3 %v3506_v57 }
 0x297   :  { %1726 = vmatmul.f32.gmra.mxu2 %v3509_v55  ;;  %v1566_v23 = vpop.f32.mrf.mxu1  ;;  %v282_v55 = vld [vmem:[#allocation5 + $0x328] sm:$0xff] }
 0x298   :  { %v1677_v1 = vadd.f32 %v1676_v15, %v1564_v54  ;;  %1500 = vmatmul.f32.gmra.mxu0 %v3512_v11  ;;  %1988 = vmatpush.msrb.mxu1 %v282_v55  ;;  %v3520_v54 = vld [vmem:[#allocation2 + $0x340] sm:$0xff]  ;;  %v3523_v11 = vld [vmem:[#allocation2 + $0x358] sm:$0xff] }
 0x299   :  { %v1340_v36 = vpop.f32.mrf.mxu3  ;;  %3893 = vst [vmem:[#allocation74_spill] sm:$0xff] %v3520_v54 }
 0x29a   :  { %v2233_v39 = vadd.f32 %v3395_v16, %v1677_v1  ;;  %v1341_v10 = vadd.f32 %v1340_v36, %v3144_v45  ;;  %v1679_v18 = vpop.f32.mrf.mxu2  ;;  %1613 = vmatmul.f32.gmra.mxu1 %v3517_v3  ;;  %3894 = vst [vmem:[#allocation75_spill] sm:$0xff] %v3523_v11  ;;  %v3526_v36 = vld [vmem:[#allocation2 + $0x348] sm:$0xff] }
 0x29b   :  { %3895 = vst [vmem:[#allocation76_spill] sm:$0xff] %v3526_v36 }
 0x29c   :  { %2329 = vst [vmem:[#allocation7 + $0xc8] sm:$0xff] %v2233_v39  ;;  %v1454_v43 = vadd.f32 %v1453_v27, %v1341_v10  ;;  %v3531_v10 = vld [vmem:[#allocation2 + $0x350] sm:$0xff] }
 0x29d   :  { %v1456_v57 = vpop.f32.mrf.mxu0  ;;  %3896 = vst [vmem:[#allocation77_spill] sm:$0xff] %v3531_v10 }
 0x29e   :  { %v1567_v15 = vadd.f32 %v1566_v23, %v1454_v43  ;;  %1390 = vmatmul.f32.gmra.mxu3 %v3520_v54 }
 0x29f   :  { %1729 = vmatmul.f32.gmra.mxu2 %v3523_v11  ;;  %v1569_v45 = vpop.f32.mrf.mxu1  ;;  %v327_v11 = vld [vmem:[#allocation5 + $0x490] sm:$0xff] }
 0x2a0   :  { %v1680_v1 = vadd.f32 %v1679_v18, %v1567_v15  ;;  %1503 = vmatmul.f32.gmra.mxu0 %v3526_v36  ;;  %2102 = vmatpush.msrb.mxu2 %v327_v11  ;;  %v3534_v15 = vld [vmem:[#allocation2 + $0x360] sm:$0xff]  ;;  %v3537_v36 = vld [vmem:[#allocation2 + $0x378] sm:$0xff] }
 0x2a1   :  { %v1343_v27 = vpop.f32.mrf.mxu3  ;;  %3897 = vst [vmem:[#allocation78_spill] sm:$0xff] %v3534_v15 }
 0x2a2   :  { %v2236_v55 = vadd.f32 %v3395_v16, %v1680_v1  ;;  %v1344_v23 = vadd.f32 %v1343_v27, %v3152_v60  ;;  %v1682_v39 = vpop.f32.mrf.mxu2  ;;  %1616 = vmatmul.f32.gmra.mxu1 %v3531_v10  ;;  %3898 = vst [vmem:[#allocation79_spill] sm:$0xff] %v3537_v36  ;;  %v3540_v27 = vld [vmem:[#allocation2 + $0x368] sm:$0xff] }
 0x2a3   :  { %3899 = vst [vmem:[#allocation80_spill] sm:$0xff] %v3540_v27 }
 0x2a4   :  { %2332 = vst [vmem:[#allocation7 + $0xe0] sm:$0xff] %v2236_v55  ;;  %v1457_v43 = vadd.f32 %v1456_v57, %v1344_v23  ;;  %v3545_v23 = vld [vmem:[#allocation2 + $0x370] sm:$0xff] }
 0x2a5   :  { %v1459_v54 = vpop.f32.mrf.mxu0  ;;  %3900 = vst [vmem:[#allocation81_spill] sm:$0xff] %v3545_v23 }
 0x2a6   :  { %v1570_v18 = vadd.f32 %v1569_v45, %v1457_v43  ;;  %1393 = vmatmul.f32.gmra.mxu3 %v3534_v15 }
 0x2a7   :  { %1732 = vmatmul.f32.gmra.mxu2 %v3537_v36  ;;  %v1572_v60 = vpop.f32.mrf.mxu1  ;;  %v279_v36 = vld [vmem:[#allocation5 + $0x310] sm:$0xff] }
 0x2a8   :  { %v1683_v1 = vadd.f32 %v1682_v39, %v1570_v18  ;;  %1506 = vmatmul.f32.gmra.mxu0 %v3540_v27  ;;  %1989 = vmatpush.msrb.mxu1 %v279_v36  ;;  %v3548_v18 = vld [vmem:[#allocation2 + $0x380] sm:$0xff]  ;;  %v2657_v27 = vld [vmem:[#allocation2 + $0x8] sm:$0xff] }
 0x2a9   :  { %v1346_v57 = vpop.f32.mrf.mxu3  ;;  %3901 = vst [vmem:[#allocation82_spill] sm:$0xff] %v3548_v18 }
 0x2aa   :  { %v2239_v11 = vadd.f32 %v3395_v16, %v1683_v1  ;;  %v1347_v45 = vadd.f32 %v1346_v57, %v3160_v25  ;;  %v1685_v55 = vpop.f32.mrf.mxu2  ;;  %1619 = vmatmul.f32.gmra.mxu1 %v3545_v23  ;;  %v3554_v57 = vld [vmem:[#allocation2 + $0x388] sm:$0xff]  ;;  %v3562_v23 = vld [vmem:[#allocation2 + $0x3a0] sm:$0xff] }
 0x2ab   :  { %3903 = vst [vmem:[#allocation84_spill] sm:$0xff] %v3554_v57 }
 0x2ac   :  { %2335 = vst [vmem:[#allocation7 + $0xf8] sm:$0xff] %v2239_v11  ;;  %v1460_v43 = vadd.f32 %v1459_v54, %v1347_v45  ;;  %v3559_v45 = vld [vmem:[#allocation2 + $0x390] sm:$0xff] }
 0x2ad   :  { %v1462_v15 = vpop.f32.mrf.mxu0  ;;  %3904 = vst [vmem:[#allocation85_spill] sm:$0xff] %v3559_v45 }
 0x2ae   :  { %v1573_v39 = vadd.f32 %v1572_v60, %v1460_v43  ;;  %1396 = vmatmul.f32.gmra.mxu3 %v3548_v18  ;;  %3905 = vst [vmem:[#allocation86_spill] sm:$0xff] %v3562_v23 }
 0x2af   :  { %1735 = vmatmul.f32.gmra.mxu2 %v3551_v33  ;;  %v1575_v25 = vpop.f32.mrf.mxu1 }
 0x2b0   :  { %v1686_v1 = vadd.f32 %v1685_v55, %v1573_v39  ;;  %1509 = vmatmul.f32.gmra.mxu0 %v3554_v57  ;;  %v3565_v55 = vld [vmem:[#allocation2 + $0x3b8] sm:$0xff]  ;;  %v3576_v57 = vld [vmem:[#allocation2 + $0x3c0] sm:$0xff] }
 0x2b1   :  { %v1349_v11 = vpop.f32.mrf.mxu3  ;;  %3906 = vst [vmem:[#allocation87_spill] sm:$0xff] %v3565_v55 }
 0x2b2   :  { %v2242_v54 = vadd.f32 %v3395_v16, %v1686_v1  ;;  %v1350_v36 = vadd.f32 %v1349_v11, %v3168_v53  ;;  %v1688_v60 = vpop.f32.mrf.mxu2  ;;  %1622 = vmatmul.f32.gmra.mxu1 %v3559_v45  ;;  %v3568_v53 = vld [vmem:[#allocation2 + $0x3a8] sm:$0xff]  ;;  %3910 = vst [vmem:[#allocation89_spill] sm:$0xff] %v3576_v57 }
 0x2b3   :  { %3907 = vst [vmem:[#allocation88_spill] sm:$0xff] %v3568_v53 }
 0x2b4   :  { %2338 = vst [vmem:[#allocation7 + $0x110] sm:$0xff] %v2242_v54  ;;  %v1463_v43 = vadd.f32 %v1462_v15, %v1350_v36  ;;  %v3908_v15 = vld [vmem:[#allocation29_spill] sm:$0xff] }
 0x2b5   :  { %v1465_v18 = vpop.f32.mrf.mxu0 }
 0x2b6   :  { %v1576_v33 = vadd.f32 %v1575_v25, %v1463_v43  ;;  %1399 = vmatmul.f32.gmra.mxu3 %v3562_v23  ;;  %v3573_v43 = vld [vmem:[#allocation2 + $0x3b0] sm:$0xff] }
 0x2b7   :  { %1738 = vmatmul.f32.gmra.mxu2 %v3565_v55  ;;  %v1578_v39 = vpop.f32.mrf.mxu1  ;;  %3909 = vst [vmem:[#allocation29_spill] sm:$0xff] %v3573_v43 }
 0x2b8   :  { %v1689_v1 = vadd.f32 %v1688_v60, %v1576_v33  ;;  %1512 = vmatmul.f32.gmra.mxu0 %v3568_v53  ;;  %v3579_v33 = vld [vmem:[#allocation2 + $0x3d8] sm:$0xff]  ;;  %v3590_v53 = vld [vmem:[#allocation2 + $0x3e0] sm:$0xff] }
 0x2b9   :  { %v1352_v11 = vpop.f32.mrf.mxu3  ;;  %3911 = vst [vmem:[#allocation90_spill] sm:$0xff] %v3579_v33 }
 0x2ba   :  { %v2245_v54 = vadd.f32 %v3395_v16, %v1689_v1  ;;  %v1353_v36 = vadd.f32 %v1352_v11, %v3908_v15  ;;  %v1691_v25 = vpop.f32.mrf.mxu2  ;;  %1625 = vmatmul.f32.gmra.mxu1 %v3573_v43  ;;  %v3582_v11 = vld [vmem:[#allocation2 + $0x3c8] sm:$0xff]  ;;  %3915 = vst [vmem:[#allocation92_spill] sm:$0xff] %v3590_v53 }
 0x2bb   :  { %3912 = vst [vmem:[#allocation91_spill] sm:$0xff] %v3582_v11 }
 0x2bc   :  { %2341 = vst [vmem:[#allocation7 + $0x128] sm:$0xff] %v2245_v54  ;;  %v1466_v23 = vadd.f32 %v1465_v18, %v1353_v36  ;;  %v3913_v18 = vld [vmem:[#allocation32_spill] sm:$0xff] }
 0x2bd   :  { %v1468_v45 = vpop.f32.mrf.mxu0 }
 0x2be   :  { %v1579_v55 = vadd.f32 %v1578_v39, %v1466_v23  ;;  %1402 = vmatmul.f32.gmra.mxu3 %v3576_v57  ;;  %v3587_v39 = vld [vmem:[#allocation2 + $0x3d0] sm:$0xff] }
 0x2bf   :  { %1741 = vmatmul.f32.gmra.mxu2 %v3579_v33  ;;  %v1581_v60 = vpop.f32.mrf.mxu1  ;;  %3914 = vst [vmem:[#allocation32_spill] sm:$0xff] %v3587_v39 }
 0x2c0   :  { %v1692_v1 = vadd.f32 %v1691_v25, %v1579_v55  ;;  %1515 = vmatmul.f32.gmra.mxu0 %v3582_v11  ;;  %v3593_v55 = vld [vmem:[#allocation2 + $0x3f8] sm:$0xff]  ;;  %v2655_v11 = vld [vmem:[#allocation2] sm:$0xff] }
 0x2c1   :  { %v1355_v15 = vpop.f32.mrf.mxu3  ;;  %3916 = vst [vmem:[#allocation93_spill] sm:$0xff] %v3593_v55 }
 0x2c2   :  { %v2248_v54 = vadd.f32 %v3395_v16, %v1692_v1  ;;  %v1356_v36 = vadd.f32 %v1355_v15, %v3913_v18  ;;  %v1694_v23 = vpop.f32.mrf.mxu2  ;;  %1628 = vmatmul.f32.gmra.mxu1 %v3587_v39  ;;  %v3596_v15 = vld [vmem:[#allocation2 + $0x3e8] sm:$0xff] }
 0x2c3   :  { %3917 = vst [vmem:[#allocation94_spill] sm:$0xff] %v3596_v15 }
 0x2c4   :  { %2344 = vst [vmem:[#allocation7 + $0x140] sm:$0xff] %v2248_v54  ;;  %v1469_v57 = vadd.f32 %v1468_v45, %v1356_v36  ;;  %v3918_v45 = vld [vmem:[#allocation35_spill] sm:$0xff] }
 0x2c5   :  { %v1471_v43 = vpop.f32.mrf.mxu0 }
 0x2c6   :  { %v1582_v33 = vadd.f32 %v1581_v60, %v1469_v57  ;;  %1405 = vmatmul.f32.gmra.mxu3 %v3590_v53  ;;  %v3601_v60 = vld [vmem:[#allocation2 + $0x3f0] sm:$0xff] }
 0x2c7   :  { %1744 = vmatmul.f32.gmra.mxu2 %v3593_v55  ;;  %v1584_v25 = vpop.f32.mrf.mxu1  ;;  %3919 = vst [vmem:[#allocation35_spill] sm:$0xff] %v3601_v60 }
 0x2c8   :  { %v1695_v1 = vadd.f32 %v1694_v23, %v1582_v33  ;;  %1518 = vmatmul.f32.gmra.mxu0 %v3596_v15  ;;  %v2656_v33 = vld [vmem:[#allocation2 + $0x18] sm:$0xff] }
 0x2c9   :  { %v1358_v18 = vpop.f32.mrf.mxu3 }
 0x2ca   :  { %v2251_v54 = vadd.f32 %v3395_v16, %v1695_v1  ;;  %v1359_v36 = vadd.f32 %v1358_v18, %v3918_v45  ;;  %v1697_v57 = vpop.f32.mrf.mxu2  ;;  %1631 = vmatmul.f32.gmra.mxu1 %v3601_v60  ;;  %v3920_v45 = vld [vmem:[#allocation38_spill] sm:$0xff]  ;;  %v2662_v60 = vld [vmem:[#allocation2 + $0x30] sm:$0xff] }
 0x2cc   :  { %2347 = vst [vmem:[#allocation7 + $0x158] sm:$0xff] %v2251_v54  ;;  %v1472_v53 = vadd.f32 %v1471_v43, %v1359_v36 }
 0x2cd   :  { %v1474_v39 = vpop.f32.mrf.mxu0 }
 0x2ce   :  { %v1585_v55 = vadd.f32 %v1584_v25, %v1472_v53  ;;  %1764 = vmatmul.f32.vlgmr.msrb.gmra.mxu3 %v2655_v11  ;;  %v2659_v25 = vld [vmem:[#allocation2 + $0x20] sm:$0xff]  ;;  %v2660_v11 = vld [vmem:[#allocation2 + $0x38] sm:$0xff] }
 0x2cf   :  { %2103 = vmatmul.f32.vlgmr.msrb.gmra.mxu2 %v2656_v33  ;;  %v1587_v23 = vpop.f32.mrf.mxu1  ;;  %v3921_v33 = vld [vmem:[#allocation41_spill] sm:$0xff] }
 0x2d0   :  { %v1698_v15 = vadd.f32 %v1697_v57, %v1585_v55  ;;  %1877 = vmatmul.f32.vlgmr.msrb.gmra.mxu0 %v2657_v27  ;;  %v2661_v57 = vld [vmem:[#allocation2 + $0x28] sm:$0xff] }
 0x2d1   :  { %v1361_v1 = vpop.f32.mrf.mxu3 }
 0x2d2   :  { %v2254_v18 = vadd.f32 %v3395_v16, %v1698_v15  ;;  %v1362_v10 = vadd.f32 %v1361_v1, %v3920_v45  ;;  %v1700_v3 = vpop.f32.mrf.mxu2  ;;  %1990 = vmatmul.f32.vlgmr.msrb.gmra.mxu1 %v2658_v61 }
 0x2d4   :  { %2350 = vst [vmem:[#allocation7 + $0x170] sm:$0xff] %v2254_v18  ;;  %v1475_v43 = vadd.f32 %v1474_v39, %v1362_v10  ;;  %v2664_v18 = vld [vmem:[#allocation2 + $0x58] sm:$0xff] }
 0x2d5   :  { %v1477_v54 = vpop.f32.mrf.mxu0 }
 0x2d6   :  { %v1588_v53 = vadd.f32 %v1587_v23, %v1475_v43  ;;  %1767 = vmatmul.f32.gmra.mxu3 %v2659_v25  ;;  %v2663_v23 = vld [vmem:[#allocation2 + $0x40] sm:$0xff] }
 0x2d7   :  { %2106 = vmatmul.f32.gmra.mxu2 %v2660_v11  ;;  %v1590_v36 = vpop.f32.mrf.mxu1 }
 0x2d8   :  { %v1701_v55 = vadd.f32 %v1700_v3, %v1588_v53  ;;  %1880 = vmatmul.f32.gmra.mxu0 %v2661_v57  ;;  %v2665_v53 = vld [vmem:[#allocation2 + $0x48] sm:$0xff] }
 0x2d9   :  { %v1364_v27 = vpop.f32.mrf.mxu3 }
 0x2da   :  { %v2257_v15 = vadd.f32 %v3395_v16, %v1701_v55  ;;  %v1365_v1 = vadd.f32 %v1364_v27, %v3921_v33  ;;  %v1703_v45 = vpop.f32.mrf.mxu2  ;;  %1993 = vmatmul.f32.gmra.mxu1 %v2662_v60  ;;  %v3922_v55 = vld [vmem:[#allocation44_spill] sm:$0xff]  ;;  %v2666_v33 = vld [vmem:[#allocation2 + $0x50] sm:$0xff] }
 0x2dc   :  { %2353 = vst [vmem:[#allocation7 + $0x188] sm:$0xff] %v2257_v15  ;;  %v1478_v61 = vadd.f32 %v1477_v54, %v1365_v1  ;;  %v2667_v15 = vld [vmem:[#allocation2 + $0x60] sm:$0xff]  ;;  %v2668_v1 = vld [vmem:[#allocation2 + $0x78] sm:$0xff] }
 0x2dd   :  { %v1480_v10 = vpop.f32.mrf.mxu0 }
 0x2de   :  { %v1591_v39 = vadd.f32 %v1590_v36, %v1478_v61  ;;  %1770 = vmatmul.f32.gmra.mxu3 %v2663_v23 }
 0x2df   :  { %2109 = vmatmul.f32.gmra.mxu2 %v2664_v18  ;;  %v1593_v43 = vpop.f32.mrf.mxu1 }
 0x2e0   :  { %v1704_v3 = vadd.f32 %v1703_v45, %v1591_v39  ;;  %1883 = vmatmul.f32.gmra.mxu0 %v2665_v53  ;;  %v2669_v39 = vld [vmem:[#allocation2 + $0x68] sm:$0xff] }
 0x2e1   :  { %v1367_v25 = vpop.f32.mrf.mxu3 }
 0x2e2   :  { %v2260_v11 = vadd.f32 %v3395_v16, %v1704_v3  ;;  %v1368_v57 = vadd.f32 %v1367_v25, %v3922_v55  ;;  %v1706_v27 = vpop.f32.mrf.mxu2  ;;  %1996 = vmatmul.f32.gmra.mxu1 %v2666_v33  ;;  %v3923_v3 = vld [vmem:[#allocation47_spill] sm:$0xff]  ;;  %v2670_v55 = vld [vmem:[#allocation2 + $0x70] sm:$0xff]  ;;  %v2672_v33 = vld [vmem:[#allocation2 + $0x98] sm:$0xff] }
 0x2e4   :  { %2356 = vst [vmem:[#allocation7 + $0x1a0] sm:$0xff] %v2260_v11  ;;  %v1481_v60 = vadd.f32 %v1480_v10, %v1368_v57  ;;  %v2671_v57 = vld [vmem:[#allocation2 + $0x80] sm:$0xff] }
 0x2e5   :  { %v1483_v54 = vpop.f32.mrf.mxu0 }
 0x2e6   :  { %v1594_v36 = vadd.f32 %v1593_v43, %v1481_v60  ;;  %1773 = vmatmul.f32.gmra.mxu3 %v2667_v15 }
 0x2e7   :  { %2112 = vmatmul.f32.gmra.mxu2 %v2668_v1  ;;  %v1596_v61 = vpop.f32.mrf.mxu1 }
 0x2e8   :  { %v1707_v45 = vadd.f32 %v1706_v27, %v1594_v36  ;;  %1886 = vmatmul.f32.gmra.mxu0 %v2669_v39  ;;  %v2673_v36 = vld [vmem:[#allocation2 + $0x88] sm:$0xff] }
 0x2e9   :  { %v1370_v23 = vpop.f32.mrf.mxu3 }
 0x2ea   :  { %v2263_v18 = vadd.f32 %v3395_v16, %v1707_v45  ;;  %v1371_v53 = vadd.f32 %v1370_v23, %v3923_v3  ;;  %v1709_v25 = vpop.f32.mrf.mxu2  ;;  %1999 = vmatmul.f32.gmra.mxu1 %v2670_v55  ;;  %v3924_v45 = vld [vmem:[#allocation50_spill] sm:$0xff]  ;;  %v2674_v3 = vld [vmem:[#allocation2 + $0x90] sm:$0xff] }
 0x2eb   :  { %v2676_v55 = vld [vmem:[#allocation2 + $0xb8] sm:$0xff] }
 0x2ec   :  { %2359 = vst [vmem:[#allocation7 + $0x1b8] sm:$0xff] %v2263_v18  ;;  %v1484_v10 = vadd.f32 %v1483_v54, %v1371_v53  ;;  %v2675_v53 = vld [vmem:[#allocation2 + $0xa0] sm:$0xff] }
 0x2ed   :  { %v1486_v11 = vpop.f32.mrf.mxu0 }
 0x2ee   :  { %v1597_v43 = vadd.f32 %v1596_v61, %v1484_v10  ;;  %1776 = vmatmul.f32.gmra.mxu3 %v2671_v57 }
 0x2ef   :  { %2115 = vmatmul.f32.gmra.mxu2 %v2672_v33  ;;  %v1599_v60 = vpop.f32.mrf.mxu1 }
 0x2f0   :  { %v1710_v27 = vadd.f32 %v1709_v25, %v1597_v43  ;;  %1889 = vmatmul.f32.gmra.mxu0 %v2673_v36  ;;  %v2677_v43 = vld [vmem:[#allocation2 + $0xa8] sm:$0xff] }
 0x2f1   :  { %v1373_v15 = vpop.f32.mrf.mxu3 }
 0x2f2   :  { %v2266_v1 = vadd.f32 %v3395_v16, %v1710_v27  ;;  %v1374_v39 = vadd.f32 %v1373_v15, %v3924_v45  ;;  %v1712_v23 = vpop.f32.mrf.mxu2  ;;  %2002 = vmatmul.f32.gmra.mxu1 %v2674_v3  ;;  %v3925_v27 = vld [vmem:[#allocation53_spill] sm:$0xff]  ;;  %v2680_v3 = vld [vmem:[#allocation2 + $0xd8] sm:$0xff] }
 0x2f3   :  { %v2678_v45 = vld [vmem:[#allocation2 + $0xb0] sm:$0xff] }
 0x2f4   :  { %2362 = vst [vmem:[#allocation7 + $0x1d0] sm:$0xff] %v2266_v1  ;;  %v1487_v54 = vadd.f32 %v1486_v11, %v1374_v39  ;;  %v2679_v39 = vld [vmem:[#allocation2 + $0xc0] sm:$0xff] }
 0x2f5   :  { %v1489_v18 = vpop.f32.mrf.mxu0 }
 0x2f6   :  { %v1600_v61 = vadd.f32 %v1599_v60, %v1487_v54  ;;  %1779 = vmatmul.f32.gmra.mxu3 %v2675_v53 }
 0x2f7   :  { %2118 = vmatmul.f32.gmra.mxu2 %v2676_v55  ;;  %v1602_v10 = vpop.f32.mrf.mxu1 }
 0x2f8   :  { %v1713_v25 = vadd.f32 %v1712_v23, %v1600_v61  ;;  %1892 = vmatmul.f32.gmra.mxu0 %v2677_v43  ;;  %v2681_v61 = vld [vmem:[#allocation2 + $0xc8] sm:$0xff] }
 0x2f9   :  { %v1376_v57 = vpop.f32.mrf.mxu3 }
 0x2fa   :  { %v2269_v33 = vadd.f32 %v3395_v16, %v1713_v25  ;;  %v1377_v36 = vadd.f32 %v1376_v57, %v3925_v27  ;;  %v1715_v15 = vpop.f32.mrf.mxu2  ;;  %2005 = vmatmul.f32.gmra.mxu1 %v2678_v45  ;;  %v3926_v25 = vld [vmem:[#allocation56_spill] sm:$0xff]  ;;  %v2682_v27 = vld [vmem:[#allocation2 + $0xd0] sm:$0xff]  ;;  %v2684_v45 = vld [vmem:[#allocation2 + $0xf8] sm:$0xff] }
 0x2fc   :  { %2365 = vst [vmem:[#allocation7 + $0x1e8] sm:$0xff] %v2269_v33  ;;  %v1490_v11 = vadd.f32 %v1489_v18, %v1377_v36  ;;  %v2683_v36 = vld [vmem:[#allocation2 + $0xe0] sm:$0xff] }
 0x2fd   :  { %v1492_v1 = vpop.f32.mrf.mxu0 }
 0x2fe   :  { %v1603_v60 = vadd.f32 %v1602_v10, %v1490_v11  ;;  %1782 = vmatmul.f32.gmra.mxu3 %v2679_v39 }
 0x2ff   :  { %2121 = vmatmul.f32.gmra.mxu2 %v2680_v3  ;;  %v1605_v54 = vpop.f32.mrf.mxu1 }
 0x300   :  { %v1716_v23 = vadd.f32 %v1715_v15, %v1603_v60  ;;  %1895 = vmatmul.f32.gmra.mxu0 %v2681_v61  ;;  %v2685_v60 = vld [vmem:[#allocation2 + $0xe8] sm:$0xff] }
 0x301   :  { %v1379_v53 = vpop.f32.mrf.mxu3 }
 0x302   :  { %v2272_v55 = vadd.f32 %v3395_v16, %v1716_v23  ;;  %v1380_v43 = vadd.f32 %v1379_v53, %v3926_v25  ;;  %v1718_v57 = vpop.f32.mrf.mxu2  ;;  %2008 = vmatmul.f32.gmra.mxu1 %v2682_v27  ;;  %v3927_v23 = vld [vmem:[#allocation59_spill] sm:$0xff]  ;;  %v2686_v25 = vld [vmem:[#allocation2 + $0xf0] sm:$0xff]  ;;  %v2688_v27 = vld [vmem:[#allocation2 + $0x118] sm:$0xff] }
 0x304   :  { %2368 = vst [vmem:[#allocation7 + $0x200] sm:$0xff] %v2272_v55  ;;  %v1493_v18 = vadd.f32 %v1492_v1, %v1380_v43  ;;  %v2687_v43 = vld [vmem:[#allocation2 + $0x100] sm:$0xff] }
 0x305   :  { %v1495_v33 = vpop.f32.mrf.mxu0 }
 0x306   :  { %v1606_v10 = vadd.f32 %v1605_v54, %v1493_v18  ;;  %1785 = vmatmul.f32.gmra.mxu3 %v2683_v36 }
 0x307   :  { %2124 = vmatmul.f32.gmra.mxu2 %v2684_v45  ;;  %v1608_v11 = vpop.f32.mrf.mxu1 }
 0x308   :  { %v1719_v15 = vadd.f32 %v1718_v57, %v1606_v10  ;;  %1898 = vmatmul.f32.gmra.mxu0 %v2685_v60  ;;  %v2689_v10 = vld [vmem:[#allocation2 + $0x108] sm:$0xff] }
 0x309   :  { %v1382_v39 = vpop.f32.mrf.mxu3 }
 0x30a   :  { %v2275_v3 = vadd.f32 %v3395_v16, %v1719_v15  ;;  %v1383_v61 = vadd.f32 %v1382_v39, %v3927_v23  ;;  %v1721_v53 = vpop.f32.mrf.mxu2  ;;  %2011 = vmatmul.f32.gmra.mxu1 %v2686_v25  ;;  %v3928_v15 = vld [vmem:[#allocation19_spill] sm:$0xff]  ;;  %v2690_v23 = vld [vmem:[#allocation2 + $0x110] sm:$0xff]  ;;  %v2692_v25 = vld [vmem:[#allocation2 + $0x138] sm:$0xff] }
 0x30c   :  { %2371 = vst [vmem:[#allocation7 + $0x218] sm:$0xff] %v2275_v3  ;;  %v1496_v1 = vadd.f32 %v1495_v33, %v1383_v61  ;;  %v2691_v61 = vld [vmem:[#allocation2 + $0x120] sm:$0xff] }
 0x30d   :  { %v1498_v55 = vpop.f32.mrf.mxu0 }
 0x30e   :  { %v1609_v54 = vadd.f32 %v1608_v11, %v1496_v1  ;;  %1788 = vmatmul.f32.gmra.mxu3 %v2687_v43 }
 0x30f   :  { %2127 = vmatmul.f32.gmra.mxu2 %v2688_v27  ;;  %v1611_v18 = vpop.f32.mrf.mxu1 }
 0x310   :  { %v1722_v57 = vadd.f32 %v1721_v53, %v1609_v54  ;;  %1901 = vmatmul.f32.gmra.mxu0 %v2689_v10  ;;  %v2693_v54 = vld [vmem:[#allocation2 + $0x128] sm:$0xff] }
 0x311   :  { %v1385_v36 = vpop.f32.mrf.mxu3 }
 0x312   :  { %v2278_v45 = vadd.f32 %v3395_v16, %v1722_v57  ;;  %v1386_v60 = vadd.f32 %v1385_v36, %v3928_v15  ;;  %v1724_v39 = vpop.f32.mrf.mxu2  ;;  %2014 = vmatmul.f32.gmra.mxu1 %v2690_v23  ;;  %v3929_v57 = vld [vmem:[#allocation21_spill] sm:$0xff]  ;;  %v2696_v23 = vld [vmem:[#allocation2 + $0x158] sm:$0xff] }
 0x313   :  { %v2694_v15 = vld [vmem:[#allocation2 + $0x130] sm:$0xff] }
 0x314   :  { %2374 = vst [vmem:[#allocation7 + $0x230] sm:$0xff] %v2278_v45  ;;  %v1499_v33 = vadd.f32 %v1498_v55, %v1386_v60  ;;  %v2695_v60 = vld [vmem:[#allocation2 + $0x140] sm:$0xff] }
 0x315   :  { %v1501_v3 = vpop.f32.mrf.mxu0 }
 0x316   :  { %v1612_v11 = vadd.f32 %v1611_v18, %v1499_v33  ;;  %1791 = vmatmul.f32.gmra.mxu3 %v2691_v61 }
 0x317   :  { %2130 = vmatmul.f32.gmra.mxu2 %v2692_v25  ;;  %v1614_v1 = vpop.f32.mrf.mxu1 }
 0x318   :  { %v1725_v53 = vadd.f32 %v1724_v39, %v1612_v11  ;;  %1904 = vmatmul.f32.gmra.mxu0 %v2693_v54  ;;  %v2697_v11 = vld [vmem:[#allocation2 + $0x148] sm:$0xff] }
 0x319   :  { %v1388_v43 = vpop.f32.mrf.mxu3 }
 0x31a   :  { %v2281_v27 = vadd.f32 %v3395_v16, %v1725_v53  ;;  %v1389_v10 = vadd.f32 %v1388_v43, %v3929_v57  ;;  %v1727_v36 = vpop.f32.mrf.mxu2  ;;  %2017 = vmatmul.f32.gmra.mxu1 %v2694_v15  ;;  %v3930_v53 = vld [vmem:[#allocation23_spill] sm:$0xff]  ;;  %v2698_v57 = vld [vmem:[#allocation2 + $0x150] sm:$0xff]  ;;  %v2700_v15 = vld [vmem:[#allocation2 + $0x178] sm:$0xff] }
 0x31c   :  { %2377 = vst [vmem:[#allocation7 + $0x248] sm:$0xff] %v2281_v27  ;;  %v1502_v55 = vadd.f32 %v1501_v3, %v1389_v10  ;;  %v2699_v10 = vld [vmem:[#allocation2 + $0x160] sm:$0xff] }
 0x31d   :  { %v1504_v45 = vpop.f32.mrf.mxu0 }
 0x31e   :  { %v1615_v18 = vadd.f32 %v1614_v1, %v1502_v55  ;;  %1794 = vmatmul.f32.gmra.mxu3 %v2695_v60 }
 0x31f   :  { %2133 = vmatmul.f32.gmra.mxu2 %v2696_v23  ;;  %v1617_v33 = vpop.f32.mrf.mxu1 }
 0x320   :  { %v1728_v39 = vadd.f32 %v1727_v36, %v1615_v18  ;;  %1907 = vmatmul.f32.gmra.mxu0 %v2697_v11  ;;  %v2701_v18 = vld [vmem:[#allocation2 + $0x168] sm:$0xff] }
 0x321   :  { %v1391_v61 = vpop.f32.mrf.mxu3 }
 0x322   :  { %v2284_v25 = vadd.f32 %v3395_v16, %v1728_v39  ;;  %v1392_v54 = vadd.f32 %v1391_v61, %v3930_v53  ;;  %v1730_v43 = vpop.f32.mrf.mxu2  ;;  %2020 = vmatmul.f32.gmra.mxu1 %v2698_v57  ;;  %v3931_v39 = vld [vmem:[#allocation25_spill] sm:$0xff]  ;;  %v2704_v57 = vld [vmem:[#allocation2 + $0x198] sm:$0xff] }
 0x323   :  { %v2702_v53 = vld [vmem:[#allocation2 + $0x170] sm:$0xff] }
 0x324   :  { %2380 = vst [vmem:[#allocation7 + $0x260] sm:$0xff] %v2284_v25  ;;  %v1505_v3 = vadd.f32 %v1504_v45, %v1392_v54  ;;  %v2703_v54 = vld [vmem:[#allocation2 + $0x180] sm:$0xff] }
 0x325   :  { %v1507_v27 = vpop.f32.mrf.mxu0 }
 0x326   :  { %v1618_v1 = vadd.f32 %v1617_v33, %v1505_v3  ;;  %1797 = vmatmul.f32.gmra.mxu3 %v2699_v10 }
 0x327   :  { %2136 = vmatmul.f32.gmra.mxu2 %v2700_v15  ;;  %v1620_v55 = vpop.f32.mrf.mxu1  ;;  %v3932_v15 = vld [vmem:[#allocation27_spill] sm:$0xff] }
 0x328   :  { %v1731_v36 = vadd.f32 %v1730_v43, %v1618_v1  ;;  %1910 = vmatmul.f32.gmra.mxu0 %v2701_v18 }
 0x329   :  { %v1394_v60 = vpop.f32.mrf.mxu3 }
 0x32a   :  { %v2287_v23 = vadd.f32 %v3395_v16, %v1731_v36  ;;  %v1395_v11 = vadd.f32 %v1394_v60, %v3931_v39  ;;  %v1733_v61 = vpop.f32.mrf.mxu2  ;;  %2023 = vmatmul.f32.gmra.mxu1 %v2702_v53 }
 0x32c   :  { %2383 = vst [vmem:[#allocation7 + $0x278] sm:$0xff] %v2287_v23  ;;  %v1508_v45 = vadd.f32 %v1507_v27, %v1395_v11 }
 0x32d   :  { %v1510_v25 = vpop.f32.mrf.mxu0 }
 0x32e   :  { %v1621_v33 = vadd.f32 %v1620_v55, %v1508_v45  ;;  %1800 = vmatmul.f32.gmra.mxu3 %v2703_v54 }
 0x32f   :  { %2139 = vmatmul.f32.gmra.mxu2 %v2704_v57  ;;  %v1623_v3 = vpop.f32.mrf.mxu1  ;;  %v3934_v57 = vld [vmem:[#allocation33_spill] sm:$0xff] }
 0x330   :  { %v1734_v43 = vadd.f32 %v1733_v61, %v1621_v33  ;;  %1913 = vmatmul.f32.gmra.mxu0 %v3322_v6  ;;  %v3933_v61 = vld [vmem:[#allocation30_spill] sm:$0xff] }
 0x331   :  { %v1397_v1 = vpop.f32.mrf.mxu3 }
 0x332   :  { %v2290_v10 = vadd.f32 %v3395_v16, %v1734_v43  ;;  %v1398_v36 = vadd.f32 %v1397_v1, %v3932_v15  ;;  %v1736_v18 = vpop.f32.mrf.mxu2  ;;  %2026 = vmatmul.f32.gmra.mxu1 %v3327_v38 }
 0x334   :  { %2386 = vst [vmem:[#allocation7 + $0x290] sm:$0xff] %v2290_v10  ;;  %v1511_v27 = vadd.f32 %v1510_v25, %v1398_v36  ;;  %v3935_v36 = vld [vmem:[#allocation36_spill] sm:$0xff] }
 0x335   :  { %v1513_v60 = vpop.f32.mrf.mxu0 }
 0x336   :  { %v1624_v55 = vadd.f32 %v1623_v3, %v1511_v27  ;;  %1803 = vmatmul.f32.gmra.mxu3 %v3330_v13 }
 0x337   :  { %2142 = vmatmul.f32.gmra.mxu2 %v3333_v44  ;;  %v1626_v23 = vpop.f32.mrf.mxu1 }
 0x338   :  { %v1737_v39 = vadd.f32 %v1736_v18, %v1624_v55  ;;  %1916 = vmatmul.f32.gmra.mxu0 %v3336_v59 }
 0x339   :  { %v1400_v6 = vpop.f32.mrf.mxu3 }
 0x33a   :  { %v2293_v11 = vadd.f32 %v3395_v16, %v1737_v39  ;;  %v1401_v53 = vadd.f32 %v1400_v6, %v3933_v61  ;;  %v1739_v45 = vpop.f32.mrf.mxu2  ;;  %2029 = vmatmul.f32.gmra.mxu1 %v3341_v32  ;;  %v3936_v39 = vld [vmem:[#allocation11_spill] sm:$0xff] }
 0x33c   :  { %2389 = vst [vmem:[#allocation7 + $0x2a8] sm:$0xff] %v2293_v11  ;;  %v1514_v38 = vadd.f32 %v1513_v60, %v1401_v53 }
 0x33d   :  { %v1516_v25 = vpop.f32.mrf.mxu0 }
 0x33e   :  { %v1627_v33 = vadd.f32 %v1626_v23, %v1514_v38  ;;  %1806 = vmatmul.f32.gmra.mxu3 %v3344_v63  ;;  %v3937_v38 = vld [vmem:[#allocation12_spill] sm:$0xff] }
 0x33f   :  { %2145 = vmatmul.f32.gmra.mxu2 %v3347_v2  ;;  %v1629_v13 = vpop.f32.mrf.mxu1 }
 0x340   :  { %v1740_v44 = vadd.f32 %v1739_v45, %v1627_v33  ;;  %1919 = vmatmul.f32.gmra.mxu0 %v3350_v22 }
 0x341   :  { %v1403_v59 = vpop.f32.mrf.mxu3 }
 0x342   :  { %v2296_v54 = vadd.f32 %v3395_v16, %v1740_v44  ;;  %v1404_v3 = vadd.f32 %v1403_v59, %v3934_v57  ;;  %v1742_v43 = vpop.f32.mrf.mxu2  ;;  %2032 = vmatmul.f32.gmra.mxu1 %v3355_v14  ;;  %v3938_v59 = vld [vmem:[#allocation13_spill] sm:$0xff] }
 0x344   :  { %2392 = vst [vmem:[#allocation7 + $0x2c0] sm:$0xff] %v2296_v54  ;;  %v1517_v32 = vadd.f32 %v1516_v25, %v1404_v3 }
 0x345   :  { %v1519_v1 = vpop.f32.mrf.mxu0 }
 0x346   :  { %v1630_v10 = vadd.f32 %v1629_v13, %v1517_v32  ;;  %1809 = vmatmul.f32.gmra.mxu3 %v3358_v31 }
 0x347   :  { %2148 = vmatmul.f32.gmra.mxu2 %v3361_v52  ;;  %v1632_v63 = vpop.f32.mrf.mxu1 }
 0x348   :  { %v1743_v2 = vadd.f32 %v1742_v43, %v1630_v10  ;;  %1922 = vmatmul.f32.gmra.mxu0 %v3364_v49 }
 0x349   :  { %v1406_v22 = vpop.f32.mrf.mxu3 }
 0x34a   :  { %v2299_v15 = vadd.f32 %v3395_v16, %v1743_v2  ;;  %v1407_v18 = vadd.f32 %v1406_v22, %v3935_v36  ;;  %v1745_v27 = vpop.f32.mrf.mxu2  ;;  %2035 = vmatmul.f32.gmra.mxu1 %v3369_v17  ;;  %v3940_v36 = vld [vmem:[#allocation15_spill] sm:$0xff] }
 0x34c   :  { %2395 = vst [vmem:[#allocation7 + $0x2d8] sm:$0xff] %v2299_v15  ;;  %v1520_v14 = vadd.f32 %v1519_v1, %v1407_v18  ;;  %v3939_v1 = vld [vmem:[#allocation14_spill] sm:$0xff] }
 0x34d   :  { %v1878_v60 = vpop.f32.mrf.mxu0 }
 0x34e   :  { %v1633_v55 = vadd.f32 %v1632_v63, %v1520_v14  ;;  %1812 = vmatmul.f32.gmra.mxu3 %v3372_v5  ;;  %v3658_v5 = vperm.slane %v3392_v19, 2 }
 0x34f   :  { %2151 = vmatmul.f32.gmra.mxu2 %v3375_v21  ;;  %v1991_v31 = vpop.f32.mrf.mxu1 }
 0x350   :  { %v1746_v52 = vadd.f32 %v1745_v27, %v1633_v55  ;;  %1925 = vmatmul.f32.gmra.mxu0 %v3378_v56 }
 0x351   :  { %v1765_v49 = vpop.f32.mrf.mxu3 }
 0x352   :  { %v2302_v23 = vadd.f32 %v3395_v16, %v1746_v52  ;;  %v1766_v6 = vadd.f32 %v1765_v49, %v3936_v39  ;;  %v2104_v11 = vpop.f32.mrf.mxu2  ;;  %2038 = vmatmul.f32.gmra.mxu1 %v3383_v50 }
 0x354   :  { %2398 = vst [vmem:[#allocation7 + $0x2f0] sm:$0xff] %v2302_v23  ;;  %v1879_v17 = vadd.f32 %v1878_v60, %v1766_v6  ;;  %v3942_v6 = vld [vmem:[#allocation62_spill] sm:$0xff] }
 0x355   :  { %v1881_v61 = vpop.f32.mrf.mxu0 }
 0x356   :  { %v1992_v53 = vadd.f32 %v1991_v31, %v1879_v17  ;;  %1815 = vmatmul.f32.gmra.mxu3 %v3386_v62  ;;  %v3941_v31 = vld [vmem:[#allocation16_spill] sm:$0xff]  ;;  %v3943_v17 = vld [vmem:[#allocation17_spill] sm:$0xff] }
 0x357   :  { %2154 = vmatmul.f32.gmra.mxu2 %v3397_v7  ;;  %v1994_v21 = vpop.f32.mrf.mxu1 }
 0x358   :  { %v2105_v56 = vadd.f32 %v2104_v11, %v1992_v53  ;;  %1928 = vmatmul.f32.gmra.mxu0 %v3400_v40 }
 0x359   :  { %v1768_v16 = vpop.f32.mrf.mxu3 }
 0x35a   :  { %v2210_v45 = vadd.f32 %v3658_v5, %v2105_v56  ;;  %v1769_v50 = vadd.f32 %v1768_v16, %v3937_v38  ;;  %v2107_v25 = vpop.f32.mrf.mxu2  ;;  %2041 = vmatmul.f32.gmra.mxu1 %v3405_v51  ;;  %v3944_v16 = vld [vmem:[#allocation63_spill] sm:$0xff]  ;;  %v3946_v38 = vld [vmem:[#allocation65_spill] sm:$0xff] }
 0x35c   :  { %2306 = vst [vmem:[#allocation7 + $0x10] sm:$0xff] %v2210_v45  ;;  %v1882_v33 = vadd.f32 %v1881_v61, %v1769_v50 }
 0x35d   :  { %v1884_v62 = vpop.f32.mrf.mxu0 }
 0x35e   :  { %v1995_v13 = vadd.f32 %v1994_v21, %v1882_v33  ;;  %1818 = vmatmul.f32.gmra.mxu3 %v3408_v26  ;;  %v3947_v33 = vld [vmem:[#allocation18_spill] sm:$0xff] }
 0x35f   :  { %2157 = vmatmul.f32.gmra.mxu2 %v3411_v12  ;;  %v1997_v19 = vpop.f32.mrf.mxu1 }
 0x360   :  { %v2108_v7 = vadd.f32 %v2107_v25, %v1995_v13  ;;  %1931 = vmatmul.f32.gmra.mxu0 %v3414_v8 }
 0x361   :  { %v1771_v40 = vpop.f32.mrf.mxu3 }
 0x362   :  { %v2213_v44 = vadd.f32 %v3658_v5, %v2108_v7  ;;  %v1772_v54 = vadd.f32 %v1771_v40, %v3938_v59  ;;  %v2110_v57 = vpop.f32.mrf.mxu2  ;;  %2044 = vmatmul.f32.gmra.mxu1 %v3419_v29  ;;  %v3948_v40 = vld [vmem:[#allocation66_spill] sm:$0xff] }
 0x364   :  { %2309 = vst [vmem:[#allocation7 + $0x28] sm:$0xff] %v2213_v44  ;;  %v1885_v51 = vadd.f32 %v1884_v62, %v1772_v54  ;;  %v3949_v44 = vld [vmem:[#allocation67_spill] sm:$0xff] }
 0x365   :  { %v1887_v3 = vpop.f32.mrf.mxu0 }
 0x366   :  { %v1998_v43 = vadd.f32 %v1997_v19, %v1885_v51  ;;  %1821 = vmatmul.f32.gmra.mxu3 %v3422_v58 }
 0x367   :  { %2160 = vmatmul.f32.gmra.mxu2 %v3425_v30  ;;  %v2000_v26 = vpop.f32.mrf.mxu1 }
 0x368   :  { %v2111_v12 = vadd.f32 %v2110_v57, %v1998_v43  ;;  %1934 = vmatmul.f32.gmra.mxu0 %v3428_v24  ;;  %v3950_v57 = vld [vmem:[#allocation68_spill] sm:$0xff] }
 0x369   :  { %v1774_v8 = vpop.f32.mrf.mxu3  ;;  %v3951_v43 = vld [vmem:[#allocation20_spill] sm:$0xff] }
 0x36a   :  { %v2216_v32 = vadd.f32 %v3658_v5, %v2111_v12  ;;  %v1775_v10 = vadd.f32 %v1774_v8, %v3939_v1  ;;  %v2113_v63 = vpop.f32.mrf.mxu2  ;;  %2047 = vmatmul.f32.gmra.mxu1 %v3433_v35  ;;  %v3952_v8 = vld [vmem:[#allocation69_spill] sm:$0xff] }
 0x36c   :  { %2312 = vst [vmem:[#allocation7 + $0x40] sm:$0xff] %v2216_v32  ;;  %v1888_v29 = vadd.f32 %v1887_v3, %v1775_v10  ;;  %v3953_v10 = vld [vmem:[#allocation70_spill] sm:$0xff] }
 0x36d   :  { %v1890_v2 = vpop.f32.mrf.mxu0 }
 0x36e   :  { %v2001_v22 = vadd.f32 %v2000_v26, %v1888_v29  ;;  %1824 = vmatmul.f32.gmra.mxu3 %v3436_v47 }
 0x36f   :  { %2163 = vmatmul.f32.gmra.mxu2 %v3439_v0  ;;  %v2003_v58 = vpop.f32.mrf.mxu1 }
 0x370   :  { %v2114_v30 = vadd.f32 %v2113_v63, %v2001_v22  ;;  %1937 = vmatmul.f32.gmra.mxu0 %v3442_v20  ;;  %v3954_v63 = vld [vmem:[#allocation71_spill] sm:$0xff]  ;;  %v3955_v22 = vld [vmem:[#allocation72_spill] sm:$0xff] }
 0x371   :  { %v1777_v24 = vpop.f32.mrf.mxu3 }
 0x372   :  { %v2219_v15 = vadd.f32 %v3658_v5, %v2114_v30  ;;  %v1778_v18 = vadd.f32 %v1777_v24, %v3940_v36  ;;  %v2116_v27 = vpop.f32.mrf.mxu2  ;;  %2050 = vmatmul.f32.gmra.mxu1 %v3447_v41  ;;  %v3956_v24 = vld [vmem:[#allocation22_spill] sm:$0xff] }
 0x374   :  { %2315 = vst [vmem:[#allocation7 + $0x58] sm:$0xff] %v2219_v15  ;;  %v1891_v35 = vadd.f32 %v1890_v2, %v1778_v18  ;;  %v3957_v18 = vld [vmem:[#allocation73_spill] sm:$0xff] }
 0x375   :  { %v1893_v14 = vpop.f32.mrf.mxu0 }
 0x376   :  { %v2004_v60 = vadd.f32 %v2003_v58, %v1891_v35  ;;  %1827 = vmatmul.f32.gmra.mxu3 %v3450_v34 }
 0x377   :  { %2166 = vmatmul.f32.gmra.mxu2 %v3453_v37  ;;  %v2006_v47 = vpop.f32.mrf.mxu1 }
 0x378   :  { %v2117_v0 = vadd.f32 %v2116_v27, %v2004_v60  ;;  %1940 = vmatmul.f32.gmra.mxu0 %v3456_v4  ;;  %v3958_v60 = vld [vmem:[#allocation74_spill] sm:$0xff] }
 0x379   :  { %v1780_v20 = vpop.f32.mrf.mxu3 }
 0x37a   :  { %v2222_v55 = vadd.f32 %v3658_v5, %v2117_v0  ;;  %v1781_v52 = vadd.f32 %v1780_v20, %v3941_v31  ;;  %v2119_v49 = vpop.f32.mrf.mxu2  ;;  %2053 = vmatmul.f32.gmra.mxu1 %v3461_v46 }
 0x37c   :  { %2318 = vst [vmem:[#allocation7 + $0x70] sm:$0xff] %v2222_v55  ;;  %v1894_v41 = vadd.f32 %v1893_v14, %v1781_v52  ;;  %v3960_v55 = vld [vmem:[#allocation76_spill] sm:$0xff] }
 0x37d   :  { %v1896_v23 = vpop.f32.mrf.mxu0 }
 0x37e   :  { %v2007_v39 = vadd.f32 %v2006_v47, %v1894_v41  ;;  %1830 = vmatmul.f32.gmra.mxu3 %v3464_v28  ;;  %v3945_v28 = vld [vmem:[#allocation64_spill] sm:$0xff]  ;;  %v3959_v47 = vld [vmem:[#allocation75_spill] sm:$0xff] }
 0x37f   :  { %2169 = vmatmul.f32.gmra.mxu2 %v3467_v48  ;;  %v2009_v34 = vpop.f32.mrf.mxu1 }
 0x380   :  { %v2120_v37 = vadd.f32 %v2119_v49, %v2007_v39  ;;  %1943 = vmatmul.f32.gmra.mxu0 %v3942_v6  ;;  %v3961_v49 = vld [vmem:[#allocation24_spill] sm:$0xff]  ;;  %v3962_v39 = vld [vmem:[#allocation77_spill] sm:$0xff] }
 0x381   :  { %v1783_v4 = vpop.f32.mrf.mxu3 }
 0x382   :  { %v2225_v11 = vadd.f32 %v3658_v5, %v2120_v37  ;;  %v1784_v61 = vadd.f32 %v1783_v4, %v3943_v17  ;;  %v2122_v53 = vpop.f32.mrf.mxu2  ;;  %2056 = vmatmul.f32.gmra.mxu1 %v3475_v9  ;;  %v3963_v4 = vld [vmem:[#allocation78_spill] sm:$0xff] }
 0x384   :  { %2321 = vst [vmem:[#allocation7 + $0x88] sm:$0xff] %v2225_v11  ;;  %v1897_v46 = vadd.f32 %v1896_v23, %v1784_v61  ;;  %v3964_v11 = vld [vmem:[#allocation79_spill] sm:$0xff] }
 0x385   :  { %v1899_v21 = vpop.f32.mrf.mxu0 }
 0x386   :  { %v2010_v56 = vadd.f32 %v2009_v34, %v1897_v46  ;;  %1833 = vmatmul.f32.gmra.mxu3 %v3944_v16 }
 0x387   :  { %2172 = vmatmul.f32.gmra.mxu2 %v3945_v28  ;;  %v2012_v48 = vpop.f32.mrf.mxu1 }
 0x388   :  { %v2123_v45 = vadd.f32 %v2122_v53, %v2010_v56  ;;  %1946 = vmatmul.f32.gmra.mxu0 %v3946_v38  ;;  %v3965_v53 = vld [vmem:[#allocation80_spill] sm:$0xff]  ;;  %v3966_v56 = vld [vmem:[#allocation26_spill] sm:$0xff] }
 0x389   :  { %v1786_v50 = vpop.f32.mrf.mxu3 }
 0x38a   :  { %v2228_v25 = vadd.f32 %v3658_v5, %v2123_v45  ;;  %v1787_v62 = vadd.f32 %v1786_v50, %v3947_v33  ;;  %v2125_v13 = vpop.f32.mrf.mxu2  ;;  %2059 = vmatmul.f32.gmra.mxu1 %v3489_v42  ;;  %v3969_v33 = vld [vmem:[#allocation83_spill] sm:$0xff] }
 0x38c   :  { %2324 = vst [vmem:[#allocation7 + $0xa0] sm:$0xff] %v2228_v25  ;;  %v1900_v9 = vadd.f32 %v1899_v21, %v1787_v62  ;;  %v3968_v25 = vld [vmem:[#allocation82_spill] sm:$0xff] }
 0x38d   :  { %v1902_v19 = vpop.f32.mrf.mxu0 }
 0x38e   :  { %v2013_v7 = vadd.f32 %v2012_v48, %v1900_v9  ;;  %1836 = vmatmul.f32.gmra.mxu3 %v3948_v40  ;;  %v3967_v48 = vld [vmem:[#allocation81_spill] sm:$0xff]  ;;  %v3970_v9 = vld [vmem:[#allocation84_spill] sm:$0xff] }
 0x38f   :  { %2175 = vmatmul.f32.gmra.mxu2 %v3949_v44  ;;  %v2015_v59 = vpop.f32.mrf.mxu1  ;;  %v3971_v40 = vld [vmem:[#allocation28_spill] sm:$0xff] }
 0x390   :  { %v2126_v54 = vadd.f32 %v2125_v13, %v2013_v7  ;;  %1949 = vmatmul.f32.gmra.mxu0 %v3950_v57 }
 0x391   :  { %v1789_v51 = vpop.f32.mrf.mxu3 }
 0x392   :  { %v2231_v3 = vadd.f32 %v3658_v5, %v2126_v54  ;;  %v1790_v26 = vadd.f32 %v1789_v51, %v3951_v43  ;;  %v2128_v12 = vpop.f32.mrf.mxu2  ;;  %2062 = vmatmul.f32.gmra.mxu1 %v3952_v8  ;;  %v3972_v54 = vld [vmem:[#allocation85_spill] sm:$0xff]  ;;  %v3973_v43 = vld [vmem:[#allocation86_spill] sm:$0xff] }
 0x394   :  { %2327 = vst [vmem:[#allocation7 + $0xb8] sm:$0xff] %v2231_v3  ;;  %v1903_v42 = vadd.f32 %v1902_v19, %v1790_v26  ;;  %v3974_v26 = vld [vmem:[#allocation87_spill] sm:$0xff] }
 0x395   :  { %v1905_v32 = vpop.f32.mrf.mxu0 }
 0x396   :  { %v2016_v1 = vadd.f32 %v2015_v59, %v1903_v42  ;;  %1839 = vmatmul.f32.gmra.mxu3 %v3953_v10  ;;  %v3975_v42 = vld [vmem:[#allocation88_spill] sm:$0xff]  ;;  %v3976_v10 = vld [vmem:[#allocation31_spill] sm:$0xff] }
 0x397   :  { %2178 = vmatmul.f32.gmra.mxu2 %v3954_v63  ;;  %v2018_v29 = vpop.f32.mrf.mxu1 }
 0x398   :  { %v2129_v2 = vadd.f32 %v2128_v12, %v2016_v1  ;;  %1952 = vmatmul.f32.gmra.mxu0 %v3955_v22 }
 0x399   :  { %v1792_v58 = vpop.f32.mrf.mxu3 }
 0x39a   :  { %v2234_v30 = vadd.f32 %v3658_v5, %v2129_v2  ;;  %v1793_v15 = vadd.f32 %v1792_v58, %v3956_v24  ;;  %v2131_v36 = vpop.f32.mrf.mxu2  ;;  %2065 = vmatmul.f32.gmra.mxu1 %v3957_v18  ;;  %v3977_v2 = vld [vmem:[#allocation29_spill] sm:$0xff] }
 0x39b   :  { %v3978_v24 = vld [vmem:[#allocation89_spill] sm:$0xff] }
 0x39c   :  { %2330 = vst [vmem:[#allocation7 + $0xd0] sm:$0xff] %v2234_v30  ;;  %v1906_v27 = vadd.f32 %v1905_v32, %v1793_v15  ;;  %v3979_v15 = vld [vmem:[#allocation90_spill] sm:$0xff] }
 0x39d   :  { %v1908_v35 = vpop.f32.mrf.mxu0 }
 0x39e   :  { %v2019_v14 = vadd.f32 %v2018_v29, %v1906_v27  ;;  %1842 = vmatmul.f32.gmra.mxu3 %v3958_v60  ;;  %v3980_v27 = vld [vmem:[#allocation91_spill] sm:$0xff]  ;;  %v3981_v60 = vld [vmem:[#allocation34_spill] sm:$0xff] }
 0x39f   :  { %2181 = vmatmul.f32.gmra.mxu2 %v3959_v47  ;;  %v2021_v0 = vpop.f32.mrf.mxu1 }
 0x3a0   :  { %v2132_v20 = vadd.f32 %v2131_v36, %v2019_v14  ;;  %1955 = vmatmul.f32.gmra.mxu0 %v3960_v55 }
 0x3a1   :  { %v1795_v31 = vpop.f32.mrf.mxu3 }
 0x3a2   :  { %v2237_v52 = vadd.f32 %v3658_v5, %v2132_v20  ;;  %v1796_v41 = vadd.f32 %v1795_v31, %v3961_v49  ;;  %v2134_v23 = vpop.f32.mrf.mxu2  ;;  %2068 = vmatmul.f32.gmra.mxu1 %v3962_v39  ;;  %v3982_v20 = vld [vmem:[#allocation32_spill] sm:$0xff] }
 0x3a3   :  { %v3983_v49 = vld [vmem:[#allocation92_spill] sm:$0xff] }
 0x3a4   :  { %2333 = vst [vmem:[#allocation7 + $0xe8] sm:$0xff] %v2237_v52  ;;  %v1909_v34 = vadd.f32 %v1908_v35, %v1796_v41  ;;  %v3984_v41 = vld [vmem:[#allocation93_spill] sm:$0xff] }
 0x3a5   :  { %v1911_v37 = vpop.f32.mrf.mxu0 }
 0x3a6   :  { %v2022_v6 = vadd.f32 %v2021_v0, %v1909_v34  ;;  %1845 = vmatmul.f32.gmra.mxu3 %v3963_v4  ;;  %v3985_v34 = vld [vmem:[#allocation94_spill] sm:$0xff]  ;;  %v3986_v4 = vld [vmem:[#allocation37_spill] sm:$0xff] }
 0x3a7   :  { %2184 = vmatmul.f32.gmra.mxu2 %v3964_v11  ;;  %v2024_v17 = vpop.f32.mrf.mxu1 }
 0x3a8   :  { %v2135_v61 = vadd.f32 %v2134_v23, %v2022_v6  ;;  %1958 = vmatmul.f32.gmra.mxu0 %v3965_v53 }
 0x3a9   :  { %v1798_v46 = vpop.f32.mrf.mxu3 }
 0x3aa   :  { %v2240_v21 = vadd.f32 %v3658_v5, %v2135_v61  ;;  %v1799_v16 = vadd.f32 %v1798_v46, %v3966_v56  ;;  %v2137_v28 = vpop.f32.mrf.mxu2  ;;  %2071 = vmatmul.f32.gmra.mxu1 %v3967_v48  ;;  %v3987_v61 = vld [vmem:[#allocation35_spill] sm:$0xff] }
 0x3ac   :  { %2336 = vst [vmem:[#allocation7 + $0x100] sm:$0xff] %v2240_v21  ;;  %v1912_v45 = vadd.f32 %v1911_v37, %v1799_v16 }
 0x3ad   :  { %v1914_v38 = vpop.f32.mrf.mxu0 }
 0x3ae   :  { %v2025_v50 = vadd.f32 %v2024_v17, %v1912_v45  ;;  %1848 = vmatmul.f32.gmra.mxu3 %v3968_v25  ;;  %v3988_v45 = vld [vmem:[#allocation40_spill] sm:$0xff] }
 0x3af   :  { %2187 = vmatmul.f32.gmra.mxu2 %v3969_v33  ;;  %v2027_v62 = vpop.f32.mrf.mxu1 }
 0x3b0   :  { %v2138_v13 = vadd.f32 %v2137_v28, %v2025_v50  ;;  %1961 = vmatmul.f32.gmra.mxu0 %v3970_v9 }
 0x3b1   :  { %v1801_v19 = vpop.f32.mrf.mxu3 }
 0x3b2   :  { %v2243_v7 = vadd.f32 %v3658_v5, %v2138_v13  ;;  %v1802_v44 = vadd.f32 %v1801_v19, %v3971_v40  ;;  %v2140_v59 = vpop.f32.mrf.mxu2  ;;  %2074 = vmatmul.f32.gmra.mxu1 %v3972_v54  ;;  %v3989_v40 = vld [vmem:[#allocation43_spill] sm:$0xff] }
 0x3b4   :  { %2339 = vst [vmem:[#allocation7 + $0x118] sm:$0xff] %v2243_v7  ;;  %v1915_v57 = vadd.f32 %v1914_v38, %v1802_v44 }
 0x3b5   :  { %v1917_v51 = vpop.f32.mrf.mxu0 }
 0x3b6   :  { %v2028_v3 = vadd.f32 %v2027_v62, %v1915_v57  ;;  %1851 = vmatmul.f32.gmra.mxu3 %v3973_v43 }
 0x3b7   :  { %2190 = vmatmul.f32.gmra.mxu2 %v3974_v26  ;;  %v2030_v12 = vpop.f32.mrf.mxu1 }
 0x3b8   :  { %v2141_v8 = vadd.f32 %v2140_v59, %v2028_v3  ;;  %1964 = vmatmul.f32.gmra.mxu0 %v3975_v42 }
 0x3b9   :  { %v1804_v32 = vpop.f32.mrf.mxu3 }
 0x3ba   :  { %v2246_v1 = vadd.f32 %v3658_v5, %v2141_v8  ;;  %v1805_v63 = vadd.f32 %v1804_v32, %v3976_v10  ;;  %v2143_v29 = vpop.f32.mrf.mxu2  ;;  %2077 = vmatmul.f32.gmra.mxu1 %v3977_v2  ;;  %v3990_v8 = vld [vmem:[#allocation46_spill] sm:$0xff] }
 0x3bc   :  { %2342 = vst [vmem:[#allocation7 + $0x130] sm:$0xff] %v2246_v1  ;;  %v1918_v22 = vadd.f32 %v1917_v51, %v1805_v63 }
 0x3bd   :  { %v1920_v58 = vpop.f32.mrf.mxu0 }
 0x3be   :  { %v2031_v30 = vadd.f32 %v2030_v12, %v1918_v22  ;;  %1854 = vmatmul.f32.gmra.mxu3 %v3978_v24 }
 0x3bf   :  { %2193 = vmatmul.f32.gmra.mxu2 %v3979_v15  ;;  %v2033_v36 = vpop.f32.mrf.mxu1 }
 0x3c0   :  { %v2144_v18 = vadd.f32 %v2143_v29, %v2031_v30  ;;  %1967 = vmatmul.f32.gmra.mxu0 %v3980_v27  ;;  %v3991_v30 = vld [vmem:[#allocation49_spill] sm:$0xff] }
 0x3c1   :  { %v1807_v35 = vpop.f32.mrf.mxu3 }
 0x3c2   :  { %v2249_v14 = vadd.f32 %v3658_v5, %v2144_v18  ;;  %v1808_v47 = vadd.f32 %v1807_v35, %v3981_v60  ;;  %v2146_v0 = vpop.f32.mrf.mxu2  ;;  %2080 = vmatmul.f32.gmra.mxu1 %v3982_v20 }
 0x3c4   :  { %2345 = vst [vmem:[#allocation7 + $0x148] sm:$0xff] %v2249_v14  ;;  %v1921_v55 = vadd.f32 %v1920_v58, %v1808_v47 }
 0x3c5   :  { %v1923_v31 = vpop.f32.mrf.mxu0 }
 0x3c6   :  { %v2034_v52 = vadd.f32 %v2033_v36, %v1921_v55  ;;  %1857 = vmatmul.f32.gmra.mxu3 %v3983_v49 }
 0x3c7   :  { %2196 = vmatmul.f32.gmra.mxu2 %v3984_v41  ;;  %v2036_v23 = vpop.f32.mrf.mxu1 }
 0x3c8   :  { %v2147_v39 = vadd.f32 %v2146_v0, %v2034_v52  ;;  %1970 = vmatmul.f32.gmra.mxu0 %v3985_v34  ;;  %v3992_v0 = vld [vmem:[#allocation52_spill] sm:$0xff] }
 0x3c9   :  { %v1810_v37 = vpop.f32.mrf.mxu3 }
 0x3ca   :  { %v2252_v6 = vadd.f32 %v3658_v5, %v2147_v39  ;;  %v1811_v11 = vadd.f32 %v1810_v37, %v3986_v4  ;;  %v2149_v17 = vpop.f32.mrf.mxu2  ;;  %2083 = vmatmul.f32.gmra.mxu1 %v3987_v61  ;;  %v3993_v37 = vld [vmem:[#allocation55_spill] sm:$0xff] }
 0x3cc   :  { %2348 = vst [vmem:[#allocation7 + $0x160] sm:$0xff] %v2252_v6  ;;  %v1924_v53 = vadd.f32 %v1923_v31, %v1811_v11 }
 0x3cd   :  { %v1926_v46 = vpop.f32.mrf.mxu0 }
 0x3ce   :  { %v2037_v21 = vadd.f32 %v2036_v23, %v1924_v53 }
 0x3cf   :  { %v2039_v56 = vpop.f32.mrf.mxu1 }
 0x3d0   :  { %v2150_v16 = vadd.f32 %v2149_v17, %v2037_v21 }
 0x3d1   :  { %v1813_v28 = vpop.f32.mrf.mxu3 }
 0x3d2   :  { %v2255_v48 = vadd.f32 %v3658_v5, %v2150_v16  ;;  %v1814_v38 = vadd.f32 %v1813_v28, %v3988_v45  ;;  %v2152_v50 = vpop.f32.mrf.mxu2  ;;  %v3994_v16 = vld [vmem:[#allocation58_spill] sm:$0xff] }
 0x3d4   :  { %2351 = vst [vmem:[#allocation7 + $0x178] sm:$0xff] %v2255_v48  ;;  %v1927_v25 = vadd.f32 %v1926_v46, %v1814_v38 }
 0x3d5   :  { %v1929_v33 = vpop.f32.mrf.mxu0 }
 0x3d6   :  { %v2040_v62 = vadd.f32 %v2039_v56, %v1927_v25 }
 0x3d7   :  { %v2042_v13 = vpop.f32.mrf.mxu1 }
 0x3d8   :  { %v2153_v9 = vadd.f32 %v2152_v50, %v2040_v62 }
 0x3d9   :  { %v1816_v19 = vpop.f32.mrf.mxu3 }
 0x3da   :  { %v2258_v7 = vadd.f32 %v3658_v5, %v2153_v9  ;;  %v1817_v44 = vadd.f32 %v1816_v19, %v3989_v40  ;;  %v2155_v59 = vpop.f32.mrf.mxu2  ;;  %v3995_v9 = vld [vmem:[#allocation61_spill] sm:$0xff] }
 0x3dc   :  { %2354 = vst [vmem:[#allocation7 + $0x190] sm:$0xff] %v2258_v7  ;;  %v1930_v54 = vadd.f32 %v1929_v33, %v1817_v44 }
 0x3dd   :  { %v1932_v57 = vpop.f32.mrf.mxu0 }
 0x3de   :  { %v2043_v51 = vadd.f32 %v2042_v13, %v1930_v54 }
 0x3df   :  { %v2045_v3 = vpop.f32.mrf.mxu1 }
 0x3e0   :  { %v2156_v43 = vadd.f32 %v2155_v59, %v2043_v51 }
 0x3e1   :  { %v1819_v26 = vpop.f32.mrf.mxu3 }
 0x3e2   :  { %v2261_v12 = vadd.f32 %v3658_v5, %v2156_v43  ;;  %v1820_v42 = vadd.f32 %v1819_v26, %v3990_v8  ;;  %v2158_v32 = vpop.f32.mrf.mxu2  ;;  %v3996_v43 = vld [vmem:[#allocation39_spill] sm:$0xff] }
 0x3e4   :  { %2357 = vst [vmem:[#allocation7 + $0x1a8] sm:$0xff] %v2261_v12  ;;  %v1933_v1 = vadd.f32 %v1932_v57, %v1820_v42 }
 0x3e5   :  { %v1935_v10 = vpop.f32.mrf.mxu0 }
 0x3e6   :  { %v2046_v63 = vadd.f32 %v2045_v3, %v1933_v1 }
 0x3e7   :  { %v2048_v29 = vpop.f32.mrf.mxu1 }
 0x3e8   :  { %v2159_v2 = vadd.f32 %v2158_v32, %v2046_v63 }
 0x3e9   :  { %v1822_v22 = vpop.f32.mrf.mxu3 }
 0x3ea   :  { %v2264_v58 = vadd.f32 %v3658_v5, %v2159_v2  ;;  %v1823_v24 = vadd.f32 %v1822_v22, %v3991_v30  ;;  %v2161_v15 = vpop.f32.mrf.mxu2  ;;  %v3997_v2 = vld [vmem:[#allocation42_spill] sm:$0xff] }
 0x3ec   :  { %2360 = vst [vmem:[#allocation7 + $0x1c0] sm:$0xff] %v2264_v58  ;;  %v1936_v36 = vadd.f32 %v1935_v10, %v1823_v24 }
 0x3ed   :  { %v1938_v18 = vpop.f32.mrf.mxu0 }
 0x3ee   :  { %v2049_v27 = vadd.f32 %v2048_v29, %v1936_v36 }
 0x3ef   :  { %v2051_v35 = vpop.f32.mrf.mxu1 }
 0x3f0   :  { %v2162_v14 = vadd.f32 %v2161_v15, %v2049_v27 }
 0x3f1   :  { %v1825_v60 = vpop.f32.mrf.mxu3 }
 0x3f2   :  { %v2267_v47 = vadd.f32 %v3658_v5, %v2162_v14  ;;  %v1826_v20 = vadd.f32 %v1825_v60, %v3992_v0  ;;  %v2164_v55 = vpop.f32.mrf.mxu2  ;;  %v3998_v14 = vld [vmem:[#allocation45_spill] sm:$0xff] }
 0x3f4   :  { %2363 = vst [vmem:[#allocation7 + $0x1d8] sm:$0xff] %v2267_v47  ;;  %v1939_v31 = vadd.f32 %v1938_v18, %v1826_v20 }
 0x3f5   :  { %v1941_v52 = vpop.f32.mrf.mxu0 }
 0x3f6   :  { %v2052_v49 = vadd.f32 %v2051_v35, %v1939_v31 }
 0x3f7   :  { %v2054_v41 = vpop.f32.mrf.mxu1 }
 0x3f8   :  { %v2165_v23 = vadd.f32 %v2164_v55, %v2052_v49 }
 0x3f9   :  { %v1828_v39 = vpop.f32.mrf.mxu3 }
 0x3fa   :  { %v2270_v34 = vadd.f32 %v3658_v5, %v2165_v23  ;;  %v1829_v6 = vadd.f32 %v1828_v39, %v3993_v37  ;;  %v2167_v4 = vpop.f32.mrf.mxu2  ;;  %v3999_v23 = vld [vmem:[#allocation48_spill] sm:$0xff] }
 0x3fc   :  { %2366 = vst [vmem:[#allocation7 + $0x1f0] sm:$0xff] %v2270_v34  ;;  %v1942_v11 = vadd.f32 %v1941_v52, %v1829_v6 }
 0x3fd   :  { %v1944_v17 = vpop.f32.mrf.mxu0 }
 0x3fe   :  { %v2055_v61 = vadd.f32 %v2054_v41, %v1942_v11 }
 0x3ff   :  { %v2057_v53 = vpop.f32.mrf.mxu1 }
 0x400   :  { %v2168_v46 = vadd.f32 %v2167_v4, %v2055_v61 }
 0x401   :  { %v1831_v21 = vpop.f32.mrf.mxu3 }
 0x402   :  { %v2273_v56 = vadd.f32 %v3658_v5, %v2168_v46  ;;  %v1832_v28 = vadd.f32 %v1831_v21, %v3994_v16  ;;  %v2170_v48 = vpop.f32.mrf.mxu2  ;;  %v4000_v46 = vld [vmem:[#allocation51_spill] sm:$0xff] }
 0x404   :  { %2369 = vst [vmem:[#allocation7 + $0x208] sm:$0xff] %v2273_v56  ;;  %v1945_v45 = vadd.f32 %v1944_v17, %v1832_v28 }
 0x405   :  { %v1947_v38 = vpop.f32.mrf.mxu0 }
 0x406   :  { %v2058_v50 = vadd.f32 %v2057_v53, %v1945_v45 }
 0x407   :  { %v2060_v25 = vpop.f32.mrf.mxu1 }
 0x408   :  { %v2171_v33 = vadd.f32 %v2170_v48, %v2058_v50 }
 0x409   :  { %v1834_v62 = vpop.f32.mrf.mxu3 }
 0x40a   :  { %v2276_v13 = vadd.f32 %v3658_v5, %v2171_v33  ;;  %v1835_v19 = vadd.f32 %v1834_v62, %v3995_v9  ;;  %v2173_v7 = vpop.f32.mrf.mxu2  ;;  %v4001_v33 = vld [vmem:[#allocation54_spill] sm:$0xff] }
 0x40c   :  { %2372 = vst [vmem:[#allocation7 + $0x220] sm:$0xff] %v2276_v13  ;;  %v1948_v40 = vadd.f32 %v1947_v38, %v1835_v19 }
 0x40d   :  { %v1950_v44 = vpop.f32.mrf.mxu0 }
 0x40e   :  { %v2061_v59 = vadd.f32 %v2060_v25, %v1948_v40 }
 0x40f   :  { %v2063_v54 = vpop.f32.mrf.mxu1 }
 0x410   :  { %v2174_v57 = vadd.f32 %v2173_v7, %v2061_v59 }
 0x411   :  { %v1837_v51 = vpop.f32.mrf.mxu3 }
 0x412   :  { %v2279_v3 = vadd.f32 %v3658_v5, %v2174_v57  ;;  %v1838_v26 = vadd.f32 %v1837_v51, %v3996_v43  ;;  %v2176_v12 = vpop.f32.mrf.mxu2  ;;  %v4002_v57 = vld [vmem:[#allocation57_spill] sm:$0xff] }
 0x414   :  { %2375 = vst [vmem:[#allocation7 + $0x238] sm:$0xff] %v2279_v3  ;;  %v1951_v8 = vadd.f32 %v1950_v44, %v1838_v26 }
 0x415   :  { %v1953_v42 = vpop.f32.mrf.mxu0 }
 0x416   :  { %v2064_v32 = vadd.f32 %v2063_v54, %v1951_v8 }
 0x417   :  { %v2066_v1 = vpop.f32.mrf.mxu1 }
 0x418   :  { %v2177_v10 = vadd.f32 %v2176_v12, %v2064_v32 }
 0x419   :  { %v1840_v63 = vpop.f32.mrf.mxu3 }
 0x41a   :  { %v2282_v29 = vadd.f32 %v3658_v5, %v2177_v10  ;;  %v1841_v22 = vadd.f32 %v1840_v63, %v3997_v2  ;;  %v2179_v58 = vpop.f32.mrf.mxu2 }
 0x41c   :  { %2378 = vst [vmem:[#allocation7 + $0x250] sm:$0xff] %v2282_v29  ;;  %v1954_v30 = vadd.f32 %v1953_v42, %v1841_v22 }
 0x41d   :  { %v1956_v24 = vpop.f32.mrf.mxu0 }
 0x41e   :  { %v2067_v15 = vadd.f32 %v2066_v1, %v1954_v30  ;;  %v4003_v1 = vld [vmem:[#allocation60_spill] sm:$0xff] }
 0x41f   :  { %v2069_v36 = vpop.f32.mrf.mxu1 }
 0x420   :  { %v2180_v18 = vadd.f32 %v2179_v58, %v2067_v15 }
 0x421   :  { %v1843_v27 = vpop.f32.mrf.mxu3 }
 0x422   :  { %v2285_v35 = vadd.f32 %v3658_v5, %v2180_v18  ;;  %v1844_v60 = vadd.f32 %v1843_v27, %v3998_v14  ;;  %v2182_v47 = vpop.f32.mrf.mxu2 }
 0x424   :  { %2381 = vst [vmem:[#allocation7 + $0x268] sm:$0xff] %v2285_v35  ;;  %v1957_v0 = vadd.f32 %v1956_v24, %v1844_v60 }
 0x425   :  { %v1959_v20 = vpop.f32.mrf.mxu0 }
 0x426   :  { %v2070_v55 = vadd.f32 %v2069_v36, %v1957_v0 }
 0x427   :  { %v2072_v31 = vpop.f32.mrf.mxu1 }
 0x428   :  { %v2183_v52 = vadd.f32 %v2182_v47, %v2070_v55 }
 0x429   :  { %v1846_v49 = vpop.f32.mrf.mxu3 }
 0x42a   :  { %v2288_v41 = vadd.f32 %v3658_v5, %v2183_v52  ;;  %v1847_v39 = vadd.f32 %v1846_v49, %v3999_v23  ;;  %v2185_v34 = vpop.f32.mrf.mxu2 }
 0x42c   :  { %2384 = vst [vmem:[#allocation7 + $0x280] sm:$0xff] %v2288_v41  ;;  %v1960_v37 = vadd.f32 %v1959_v20, %v1847_v39 }
 0x42d   :  { %v1962_v6 = vpop.f32.mrf.mxu0 }
 0x42e   :  { %v2073_v4 = vadd.f32 %v2072_v31, %v1960_v37 }
 0x42f   :  { %v2075_v11 = vpop.f32.mrf.mxu1 }
 0x430   :  { %v2186_v17 = vadd.f32 %v2185_v34, %v2073_v4 }
 0x431   :  { %v1849_v61 = vpop.f32.mrf.mxu3 }
 0x432   :  { %v2291_v53 = vadd.f32 %v3658_v5, %v2186_v17  ;;  %v1850_v21 = vadd.f32 %v1849_v61, %v4000_v46  ;;  %v2188_v56 = vpop.f32.mrf.mxu2 }
 0x434   :  { %2387 = vst [vmem:[#allocation7 + $0x298] sm:$0xff] %v2291_v53  ;;  %v1963_v16 = vadd.f32 %v1962_v6, %v1850_v21 }
 0x435   :  { %v1965_v28 = vpop.f32.mrf.mxu0 }
 0x436   :  { %v2076_v48 = vadd.f32 %v2075_v11, %v1963_v16 }
 0x437   :  { %v2078_v45 = vpop.f32.mrf.mxu1 }
 0x438   :  { %v2189_v38 = vadd.f32 %v2188_v56, %v2076_v48 }
 0x439   :  { %v1852_v50 = vpop.f32.mrf.mxu3 }
 0x43a   :  { %v2294_v25 = vadd.f32 %v3658_v5, %v2189_v38  ;;  %v1853_v62 = vadd.f32 %v1852_v50, %v4001_v33  ;;  %v2191_v13 = vpop.f32.mrf.mxu2 }
 0x43c   :  { %2390 = vst [vmem:[#allocation7 + $0x2b0] sm:$0xff] %v2294_v25  ;;  %v1966_v9 = vadd.f32 %v1965_v28, %v1853_v62 }
 0x43d   :  { %v1968_v7 = vpop.f32.mrf.mxu0 }
 0x43e   :  { %v2079_v19 = vadd.f32 %v2078_v45, %v1966_v9 }
 0x43f   :  { %v2081_v59 = vpop.f32.mrf.mxu1 }
 0x440   :  { %v2192_v40 = vadd.f32 %v2191_v13, %v2079_v19 }
 0x441   :  { %v1855_v44 = vpop.f32.mrf.mxu3 }
 0x442   :  { %v2297_v54 = vadd.f32 %v3658_v5, %v2192_v40  ;;  %v1856_v51 = vadd.f32 %v1855_v44, %v4002_v57  ;;  %v2194_v3 = vpop.f32.mrf.mxu2 }
 0x444   :  { %2393 = vst [vmem:[#allocation7 + $0x2c8] sm:$0xff] %v2297_v54  ;;  %v1969_v43 = vadd.f32 %v1968_v7, %v1856_v51 }
 0x445   :  { %v1971_v42 = vpop.f32.mrf.mxu0 }
 0x446   :  { %v2082_v26 = vadd.f32 %v2081_v59, %v1969_v43 }
 0x447   :  { %v2084_v63 = vpop.f32.mrf.mxu1 }
 0x448   :  { %v2195_v12 = vadd.f32 %v2194_v3, %v2082_v26 }
 0x449   :  { %v1858_v8 = vpop.f32.mrf.mxu3 }
 0x44a   :  { %v2300_v32 = vadd.f32 %v3658_v5, %v2195_v12  ;;  %v1859_v10 = vadd.f32 %v1858_v8, %v4003_v1  ;;  %v2197_v2 = vpop.f32.mrf.mxu2 }
 0x44c   :  { %2396 = vst [vmem:[#allocation7 + $0x2e0] sm:$0xff] %v2300_v32  ;;  %v1972_v29 = vadd.f32 %v1971_v42, %v1859_v10 }
 0x44e   :  { %v2085_v22 = vadd.f32 %v2084_v63, %v1972_v29 }
 0x450   :  { %v2198_v58 = vadd.f32 %v2197_v2, %v2085_v22 }
 0x452   :  { %v2303_v30 = vadd.f32 %v3658_v5, %v2198_v58 }
 0x454   :  { %2399 = vst [vmem:[#allocation7 + $0x2f8] sm:$0xff] %v2303_v30 }
 0x455   :  { %2412 = dma.vmem_to_hbm [thread:$0]  %s2405_s25, 12288, %s2407_s28, [#allocation4], %s2787_s30, %s2787_s30, %s2788_s6  }
 0x456   :  { %2781 = dma.done.wait [#allocation4], 12288  }
 0x457   :  { %2782 = vsyncadd [#allocation4], 4294955008 }
 0x458   :  { %2417 = vsyncpa [#allocation3], 1 }
 0x459   :  { %2418 = vsyncpa [#allocation6], 1 }
 0x45a   :  { %2419 = vsyncpa [#allocation4], 1 }

</bundles_post_ra>
